<compile_context>
chip_gen: v6e
topology: v6e:2x2x1
jax: 0.10.0
libtpu: 0.0.40
codegen_flags: <defaults>
</compile_context>

<pallas_src>
import jax
import jax.numpy as jnp
from jax.experimental import pallas as pl
from jax.experimental.pallas import tpu as pltpu

_LANES = 128                            # lane-dense minor dim of the flattened 2-D view
_TARGET_TILE_BYTES = 4 * 1024 * 1024    # ~4 MiB per operand per pipeline buffer
_MIN_PALLAS_BYTES = 4 * 1024 * 1024     # below this, XLA's fused add is already at roofline
_VMEM_SLACK_BYTES = 4 * 1024 * 1024     # headroom on top of 3 arrays x 2 buffers


def _add_kernel(a_ref, b_ref, o_ref):
    # Elementwise add on the current VMEM tile (VPU); the kernel is HBM-DMA bound.
    o_ref[...] = a_ref[...] + b_ref[...]


def _round_up(x: int, m: int) -> int:
    return ((x + m - 1) // m) * m


def pallas_add(a: jax.Array, b: jax.Array) -> jax.Array:
    assert a.shape == b.shape, "Add expects x[0] and x[1] to have the same shape"
    assert a.dtype == b.dtype, "Add expects x[0] and x[1] to have the same dtype"
    orig_shape = a.shape

    itemsize = a.dtype.itemsize
    n = a.size
    nbytes = n * itemsize

    # XLA fallback:
    #  * small tensors: pallas_call launch + pipeline warm-up dominate, XLA is at roofline.
    #  * flat size not a multiple of 128: a lane-dense Pallas layout would need pad/slice
    #    copies (~2 extra HBM passes, the dominant cost the review flagged). XLA's fused
    #    add is HBM-roofline-bound for this op, so nothing is lost.
    if n == 0 or nbytes < _MIN_PALLAS_BYTES or n % _LANES != 0:
        return a + b

    # Sublane granularity per dtype width (f32: 8, bf16: 16, int8/fp8: 32).
    sublane = {4: 8, 2: 16, 1: 32}.get(itemsize, 8)

    # Lane-dense 2-D view of the flat data.  reshape of a contiguous array is free
    # (metadata only) — no pad, no slice, no extra HBM traffic.
    rows = n // _LANES
    a2 = a.reshape(rows, _LANES)
    b2 = b.reshape(rows, _LANES)

    # Row tile targeting ~4 MiB per operand per buffer, then:
    #  - force at least 2 grid steps (v7x has 2 TensorCores; "parallel" shards the grid),
    #  - balance the row count per step so neither core gets a tiny ragged remainder.
    target_rows = max(
        sublane, (_TARGET_TILE_BYTES // (_LANES * itemsize)) // sublane * sublane
    )
    num_blocks = max(2, pl.cdiv(rows, target_rows))
    tile_rows = max(sublane, _round_up(pl.cdiv(rows, num_blocks), sublane))
    grid = (pl.cdiv(rows, tile_rows),)   # ragged final row-block is masked by Pallas

    # Derived VMEM budget: 3 arrays x 2 pipeline buffers x tile + slack.
    # (<= ~28 MiB at the 4 MiB target: under v7x's 64 MiB physical per-TC VMEM and
    #  above v5e's 16 MiB scoped default.)
    tile_bytes = tile_rows * _LANES * itemsize
    vmem_limit = 3 * 2 * tile_bytes + _VMEM_SLACK_BYTES

    out2 = pl.pallas_call(
        _add_kernel,
        out_shape=jax.ShapeDtypeStruct((rows, _LANES), a.dtype),
        grid=grid,
        in_specs=[
            pl.BlockSpec((tile_rows, _LANES), lambda i: (i, 0)),
            pl.BlockSpec((tile_rows, _LANES), lambda i: (i, 0)),
        ],
        out_specs=pl.BlockSpec((tile_rows, _LANES), lambda i: (i, 0)),
        compiler_params=pltpu.CompilerParams(
            dimension_semantics=("parallel",),
            vmem_limit_bytes=vmem_limit,
        ),
    )(a2, b2)

    return out2.reshape(orig_shape)


class Add:
    """JAX/Pallas port of the PyTorch Add module. `arg` is unused in forward."""

    def __init__(self, arg):
        self.arg = arg

    def __call__(self, x):
        return pallas_add(x[0], x[1])


if __name__ == "__main__":
    key = jax.random.PRNGKey(0)
    ks = jax.random.split(key, 8)
    mod = Add(arg=1)

    def check(x0, x1, atol=1e-6, rtol=1e-6):
        out = jax.block_until_ready(mod([x0, x1]))
        ref = x0 + x1
        assert out.shape == ref.shape and out.dtype == ref.dtype
        assert jnp.allclose(out.astype(jnp.float32), ref.astype(jnp.float32),
                            atol=atol, rtol=rtol)
        return out

    # 1) Small NCHW feature maps, consistent with typical module usage
    #    (takes the small-input XLA fallback path).
    check(jax.random.normal(ks[0], (2, 4, 16, 16), dtype=jnp.float32),
          jax.random.normal(ks[1], (2, 4, 16, 16), dtype=jnp.float32))

    # 2) Aligned size -> lane-dense 2-D Pallas path; grid forced to 2 steps (both TCs on v7x).
    check(jax.random.normal(ks[2], (8, 32, 64, 64), dtype=jnp.float32),
          jax.random.normal(ks[3], (8, 32, 64, 64), dtype=jnp.float32))

    # 3) Ragged size (flat length not a multiple of the row tile) -> zero-copy Pallas path
    #    with a masked final row-block; no pad / no output slice.
    check(jax.random.normal(ks[4], (16, 32, 33, 129), dtype=jnp.float32),
          jax.random.normal(ks[5], (16, 32, 33, 129), dtype=jnp.float32))

    # 4) bf16, aligned -> exercises 16-row sublane packing on the Pallas path.
    z0 = jax.random.normal(ks[6], (16, 32, 64, 64), dtype=jnp.float32).astype(jnp.bfloat16)
    z1 = jax.random.normal(ks[7], (16, 32, 64, 64), dtype=jnp.float32).astype(jnp.bfloat16)
    check(z0, z1, atol=1e-2, rtol=1e-2)

    # 5) bf16, ragged -> masked final block with 2-byte sublane packing.
    w0 = jax.random.normal(ks[0], (16, 32, 33, 129), dtype=jnp.float32).astype(jnp.bfloat16)
    w1 = jax.random.normal(ks[1], (16, 32, 33, 129), dtype=jnp.float32).astype(jnp.bfloat16)
    check(w0, w1, atol=1e-2, rtol=1e-2)

    print("KERNEL_OK")
</pallas_src>

<mosaic_0001>
module attributes {stable_mosaic.version = 11 : i64} {
  func.func @_add_kernel(%arg0: i32, %arg1: memref<4096x128xf32, #tpu.memory_space<vmem>>, %arg2: memref<4096x128xf32, #tpu.memory_space<vmem>>, %arg3: memref<4096x128xf32, #tpu.memory_space<vmem>>) attributes {dimension_semantics = [#tpu.dimension_semantics<parallel>], iteration_bounds = array<i64: 2>, scalar_prefetch = 0 : i64, scratch_operands = 0 : i64, tpu.core_type = #tpu.core_type<tc>, window_params = [{transform_indices = @transform_0, window_bounds = array<i64: 4096, 128>}, {transform_indices = @transform_1, window_bounds = array<i64: 4096, 128>}, {transform_indices = @transform_2, window_bounds = array<i64: 4096, 128>}]} {
    %c0 = arith.constant 0 : index
    %c0_0 = arith.constant 0 : index
    %0 = vector.load %arg1[%c0, %c0_0] : memref<4096x128xf32, #tpu.memory_space<vmem>>, vector<4096x128xf32>
    %c0_1 = arith.constant 0 : index
    %c0_2 = arith.constant 0 : index
    %1 = vector.load %arg2[%c0_1, %c0_2] : memref<4096x128xf32, #tpu.memory_space<vmem>>, vector<4096x128xf32>
    %2 = arith.addf %0, %1 : vector<4096x128xf32>
    %c0_3 = arith.constant 0 : index
    %c0_4 = arith.constant 0 : index
    %3 = vector.load %arg3[%c0_3, %c0_4] : memref<4096x128xf32, #tpu.memory_space<vmem>>, vector<4096x128xf32>
    tpu.vector_store %arg3[%c0_3, %c0_4], %2 {strides = array<i32>} : memref<4096x128xf32, #tpu.memory_space<vmem>>, vector<4096x128xf32>,
    return
  }
  func.func @transform_0(%arg0: i32) -> (i32, i32) {
    %c0_i32 = arith.constant 0 : i32
    %c0_i32_0 = arith.constant 0 : i32
    return %arg0, %c0_i32 : i32, i32
  }
  func.func @transform_1(%arg0: i32) -> (i32, i32) {
    %c0_i32 = arith.constant 0 : i32
    %c0_i32_0 = arith.constant 0 : i32
    return %arg0, %c0_i32 : i32, i32
  }
  func.func @transform_2(%arg0: i32) -> (i32, i32) {
    %c0_i32 = arith.constant 0 : i32
    %c0_i32_0 = arith.constant 0 : i32
    return %arg0, %c0_i32 : i32, i32
  }
}

</mosaic_0001>

<bundles_post_ra>
// kernel: tpu_custom_call.1
= control target key start
LH: loop header
LB: loop body
LE: loop exit
PB: predicated region body
PF: predicated region fallthrough
CT: control target
= control target key end

     0   :  { %7 = vsyncpa [#allocation3], 0  ;;  %s4348_s0 = inlined_call_operand.hbm [shape: f32[8192,128], index: 0, kind: input, shape index: {}]   ;;  %s4349_s1 = inlined_call_operand.hbm [shape: f32[8192,128], index: 1, kind: input, shape index: {}]   ;;  %s4350_s2 = inlined_call_operand.hbm [shape: f32[8192,128], index: 2, kind: output, shape index: {}]  }
   0x1   :  { %9 = vsyncpa [#allocation3 + $0x1], 0 }
   0x2   :  { %10 = vsyncpa [#allocation6], 0 }
   0x3   :  { %12 = vsyncpa [#allocation6 + $0x1], 0 }
   0x4   :  { %13 = vsyncpa [#allocation4], 0 }
   0x5   :  { %15 = vsyncpa [#allocation4 + $0x1], 0  ;;  %s2587_s9 = smov 0   ;;  %s2589_s10 = smov 0  }
   0x6   :  { %s2591_s11 = smov 0   ;;  %s2593_s12 = smov 0  }
   0x7 LB: > { %s2608_s13 = sadd.s32 4294967295, %s2563_s12   ;;  %s2363_s14 = sadd.s32 4294967294, %s2563_s12   ;;  %s2563_s12 = sphi %s2593_s12, %s4366_s12   ;;  %s2559_s11 = sphi %s2591_s11, %s4365_s11   ;;  %s2555_s10 = sphi %s2589_s10, %s4364_s10   ;;  %s2551_s9 = sphi %s2587_s9, %s4363_s9  }
   0x8   : > { %s2612_s15 = sadd.s32 1, %s2563_s12   ;;  %s28_s16 = sadd.s32 1, %s2559_s11 }
   0x9   : > { %s25_s17 = ssub.s32 %s2563_s12, %s2612_s15  ;;  %p35_p0 = scmp.ne.s32.totalorder %s2559_s11, %s2555_s10 }
   0xa   : > { %p26_p1 = scmp.eq.s32.totalorder %s25_s17, 0  ;;  %p36_p2 = scmp.eq.s32.totalorder %s2563_s12, 0 }
   0xb   : > { %p41_p3 = scmp.ne.s32.totalorder %s2555_s10, %s2551_s9  ;;  %p42_p4 = scmp.eq.s32.totalorder %s2608_s13, 0 }
   0xc   : > { %s2624_s18 = scalar_select %p26_p1, %s2559_s11, %s28_s16  }
   0xd   : > { %p2626_p5 = por %p36_p2, %p35_p0  ;;  %p2630_p6 = por %p42_p4, %p41_p3 }
   0xe   : > { %p91_p7 = scmp.eq.s32.totalorder %s2608_s13, 1  ;;  %p97_p8 = scmp.eq.s32.totalorder %s2363_s14, 1 }
   0xf   : > { %s4354_s20 = scalar_select %p2630_p6, 1, 0 }
  0x10   : > { %p2401_p10 = scmp.lt.s32.totalorder %s2563_s12, 2  ;;  %p2637_p11 = por %p91_p7, %p35_p0 }
  0x11   : > { %p2641_p12 = por %p97_p8, %p41_p3  ;;  %s2646_s23 = sand.u32 1, %s2559_s11  }
  0x12   : > { %s4355_s21 = scalar_select %p2637_p11, 1, 0 }
  0x13   : > { %s4356_s22 = scalar_select %p2641_p12, 1, 0 }
  0x14   : > { %s2381_s24 = sshll.u32 %s2563_s12, 16  ;;  %s2366_s25 = sshll.u32 %s2646_s23, 12 }
  0x15   : > { %s2655_s28 = scalar_lea.hbm %s4348_s0, %s2381_s24  ;;  %s121_s29 = scalar_lea.vmem [#allocation2], %s2366_s25 }
  0x16   : > { %s128_s30 = sshll.u32 %s121_s29, 4  ;;  %p2661_p13 = pnand %p2401_p10, %p2626_p5  ;;  %s2665_s30 = int_to_ptr.vmem [resolvable:$true] %s128_s30 }
  0x17   : > { %s118_s4 = scalar_lea.sflag [#allocation3], %s2646_s23  ;;  %s2439_s5 = scalar_lea.hbm %s2655_s28, 65536 }
  0x18   : > { %p2440_p0 = scmp.ne.s32.totalorder %s2655_s28, %s2439_s5  ;;  %p2441_p1 = pneg %p2661_p13 }
  0x19   : > { %s2444_s8 = scalar_lea.hbm %s4348_s0, 131072  ;;  %p2445_p4 = scmp.lt.s32.totalorder %s2655_s28, %s4348_s0 }
  0x1a   : > { %p2442_p2 = pnand %p2441_p1, %p2440_p0  ;;  %p2446_p5 = scmp.lt.s32.totalorder %s2444_s8, %s2439_s5 }
  0x1c   : > { %p2443_p3 = pneg %p2442_p2  ;;  %p2447_p7 = por %p2446_p5, %p2445_p4 }
  0x1e   : > { %p2448_p8 = pnand %p2447_p7, %p2443_p3 }
  0x20   : > { %2451 = shalt.err (!%p2448_p8)
}
  0x21   : > { %s2452_s17 = scalar_lea.vmem %s2665_s30, 65536  ;;  %s2565_s19 = smov [#allocation2]  }
  0x22   : > { %p2453_p10 = scmp.ne.s32.totalorder %s2665_s30, %s2452_s17  ;;  %s2457_s26 = sshll.u32 %s2565_s19, 4  ;;  %s2458_s26 = int_to_ptr.vmem [resolvable:$false] %s2457_s26 }
  0x23   : > { %s2459_s27 = scalar_lea.vmem %s2458_s26, 131072  ;;  %p2460_p9 = scmp.lt.s32.totalorder %s2665_s30, %s2458_s26 }
  0x24   : > { %p2455_p0 = pnand %p2453_p10, %p2441_p1  ;;  %p2461_p12 = scmp.lt.s32.totalorder %s2459_s27, %s2452_s17 }
  0x26   : > { %p2456_p2 = pneg %p2455_p0  ;;  %p2462_p11 = por %p2461_p12, %p2460_p9 }
  0x28   : > { %p2463_p4 = pnand %p2462_p11, %p2456_p2 }
  0x2a   : > { %2466 = shalt.err (!%p2463_p4)
}
  0x2b   : > { %s2566_s29 = smov 128   ;;  %s2567_s5 = smov 8  }
  0x2c   : > { %2393 = dma.hbm_to_vmem [thread:$0]  (!%p2661_p13), %s2655_s28, 65536, %s2665_s30, %s118_s4, %s2566_s29, %s2566_s29, %s2567_s5  }
  0x2d   : > { %p2372_p9 = scmp.ge.s32.totalorder %s2563_s12, 1  ;;  %p157_p11 = scmp.lt.s32.totalorder %s2563_s12, 3 }
  0x2e   : > { %s2708_s14 = scalar_lea.hbm %s4349_s1, %s2381_s24  ;;  %s142_s16 = scalar_lea.vmem [#allocation5], %s2366_s25 }
  0x2f   : > { %p2699_p12 = pnand %p2372_p9, %p157_p11  ;;  %s149_s17 = sshll.u32 %s142_s16, 4  ;;  %s2712_s17 = int_to_ptr.vmem [resolvable:$true] %s149_s17 }
  0x30   : > { %s139_s28 = scalar_lea.sflag [#allocation6], %s2646_s23  ;;  %s2467_s30 = scalar_lea.hbm %s2708_s14, 65536 }
  0x31   : > { %p2468_p3 = scmp.ne.s32.totalorder %s2708_s14, %s2467_s30  ;;  %s2472_s24 = scalar_lea.hbm %s4349_s1, 131072 }
  0x32   : > { %p2473_p8 = scmp.lt.s32.totalorder %s2708_s14, %s4349_s1  ;;  %p2474_p10 = scmp.lt.s32.totalorder %s2472_s24, %s2467_s30 }
  0x33   : > { %p2470_p5 = pnand %p2468_p3, %p2441_p1 }
  0x34   : > { %p2475_p0 = por %p2474_p10, %p2473_p8 }
  0x35   : > { %p2471_p7 = pneg %p2470_p5 }
  0x37   : > { %p2476_p2 = pnand %p2475_p0, %p2471_p7 }
  0x39   : > { %2479 = shalt.err (!%p2476_p2)
}
  0x3a   : > { %s2480_s23 = scalar_lea.vmem %s2712_s17, 65536  ;;  %s2568_s25 = smov [#allocation5]  }
  0x3b   : > { %p2481_p4 = scmp.ne.s32.totalorder %s2712_s17, %s2480_s23  ;;  %s2485_s7 = sshll.u32 %s2568_s25, 4  ;;  %s2486_s7 = int_to_ptr.vmem [resolvable:$false] %s2485_s7 }
  0x3c   : > { %s2487_s8 = scalar_lea.vmem %s2486_s7, 131072  ;;  %p2488_p3 = scmp.lt.s32.totalorder %s2712_s17, %s2486_s7 }
  0x3d   : > { %p2483_p9 = pnand %p2481_p4, %p2441_p1  ;;  %p2489_p5 = scmp.lt.s32.totalorder %s2487_s8, %s2480_s23 }
  0x3f   : > { %p2484_p11 = pneg %p2483_p9  ;;  %p2490_p6 = por %p2489_p5, %p2488_p3 }
  0x41   : > { %p2491_p8 = pnand %p2490_p6, %p2484_p11 }
  0x43   : > { %2494 = shalt.err (!%p2491_p8)
}
  0x44   : > { %2396 = dma.hbm_to_vmem [thread:$0]  (!%p2661_p13), %s2708_s14, 65536, %s2712_s17, %s139_s28, %s2566_s29, %s2566_s29, %s2567_s5  }
  0x45   : > { %161 = sbr.rel (%p2699_p12) target bundleno = 492 (0x1ec), region = 28  ;;  %s2743_s16 = sand.u32 (!%p2699_p12), 1, %s2555_s10  }
  0x46   : > { %s2373_s30 = sshll.u32 (!%p2699_p12), %s2743_s16, 12  ;;  %s164_s4 = scalar_lea.sflag (!%p2699_p12), [#allocation3], %s2743_s16 }
  0x47   : > { %s2747_s19 = scalar_lea.vmem (!%p2699_p12), [#allocation2], %s2373_s30  ;;  %p4359_p6 = scmp.ne.s32.totalorder (!%p2699_p12), %s4354_s20, 0 }
  0x4a   : > { %2538 = dma.done.wait (%p4359_p6), %s164_s4, 65536  }
  0x4b   : > { %2540 = vsyncadd (%p4359_p6), %s164_s4, 4294901760  ;;  %s173_s3 = scalar_lea.sflag [#allocation6], %s2743_s16  ;;  %s2754_s29 = scalar_lea.vmem [#allocation5], %s2373_s30 }
  0x4c   : > { %2542 = dma.done.wait (%p4359_p6), %s173_s3, 65536  }
  0x4d   : > { %2544 = vsyncadd (%p4359_p6), %s173_s3, 4294901760  ;;  %v205_v0 = vld [vmem:[%s2747_s19] sm:$0xff]  ;;  %v206_v2 = vld [vmem:[%s2747_s19 + $0x8] sm:$0xff]  ;;  %s2769_s20 = scalar_lea.vmem [#allocation7], %s2373_s30  ;;  %s2383_s5 = sshll.u32 %s2608_s13, 16 }
  0x4e   : > { %v717_v1 = vld [vmem:[%s2754_s29] sm:$0xff]  ;;  %v718_v4 = vld [vmem:[%s2754_s29 + $0x8] sm:$0xff]  ;;  %v207_v5 = vld [vmem:[%s2747_s19 + $0x10] sm:$0xff]  ;;  %s2267_s6 = sshll.u32 %s2769_s20, 4  ;;  %s4299_s17 = scalar_lea.hbm %s4350_s2, %s2383_s5  ;;  %s4301_s6 = int_to_ptr.vmem [resolvable:$true] %s2267_s6 }
  0x4f   : > { %v1229_v3 = vadd.f32 %v717_v1, %v205_v0  ;;  %v719_v6 = vld [vmem:[%s2754_s29 + $0x10] sm:$0xff]  ;;  %v1230_v7 = vadd.f32 %v718_v4, %v206_v2  ;;  %v208_v9 = vld [vmem:[%s2747_s19 + $0x18] sm:$0xff]  ;;  %v209_v11 = vld [vmem:[%s2747_s19 + $0x20] sm:$0xff]  ;;  %s2254_s28 = scalar_lea.sflag [#allocation4], %s2743_s16  ;;  %s2495_s24 = scalar_lea.vmem %s4301_s6, 65536 }
  0x50   : > { %v1231_v8 = vadd.f32 %v719_v6, %v207_v5  ;;  %v720_v10 = vld [vmem:[%s2754_s29 + $0x18] sm:$0xff]  ;;  %v721_v13 = vld [vmem:[%s2754_s29 + $0x20] sm:$0xff]  ;;  %v210_v14 = vld [vmem:[%s2747_s19 + $0x28] sm:$0xff]  ;;  %p2496_p13 = scmp.ne.s32.totalorder %s4301_s6, %s2495_s24  ;;  %p4360_p1 = scmp.ne.s32.totalorder %s4355_s21, 0 }
  0x51   : > { %1741 = vst [vmem:[%s2769_s20] sm:$0xff] %v1229_v3  ;;  %v1232_v12 = vadd.f32 %v720_v10, %v208_v9  ;;  %v722_v15 = vld [vmem:[%s2754_s29 + $0x28] sm:$0xff]  ;;  %1742 = vst [vmem:[%s2769_s20 + $0x8] sm:$0xff] %v1230_v7  ;;  %v1233_v16 = vadd.f32 %v721_v13, %v209_v11  ;;  %v211_v18 = vld [vmem:[%s2747_s19 + $0x30] sm:$0xff]  ;;  %s2569_s26 = smov [#allocation7]  }
  0x52   : > { %1743 = vst [vmem:[%s2769_s20 + $0x10] sm:$0xff] %v1231_v8  ;;  %v1234_v17 = vadd.f32 %v722_v15, %v210_v14  ;;  %v723_v19 = vld [vmem:[%s2754_s29 + $0x30] sm:$0xff]  ;;  %v212_v20 = vld [vmem:[%s2747_s19 + $0x38] sm:$0xff]  ;;  %v213_v23 = vld [vmem:[%s2747_s19 + $0x40] sm:$0xff]  ;;  %p2497_p12 = pnand %p2496_p13, %p4360_p1  ;;  %s2499_s27 = sshll.u32 %s2569_s26, 4  ;;  %s2500_s27 = int_to_ptr.vmem [resolvable:$false] %s2499_s27 }
  0x53   : > { %1744 = vst [vmem:[%s2769_s20 + $0x18] sm:$0xff] %v1232_v12  ;;  %v1235_v21 = vadd.f32 %v723_v19, %v211_v18  ;;  %v724_v22 = vld [vmem:[%s2754_s29 + $0x38] sm:$0xff]  ;;  %v725_v24 = vld [vmem:[%s2754_s29 + $0x40] sm:$0xff]  ;;  %1745 = vst [vmem:[%s2769_s20 + $0x20] sm:$0xff] %v1233_v16  ;;  %s2501_s23 = scalar_lea.vmem %s2500_s27, 131072  ;;  %p2502_p10 = scmp.lt.s32.totalorder %s4301_s6, %s2500_s27 }
  0x54   : > { %1746 = vst [vmem:[%s2769_s20 + $0x28] sm:$0xff] %v1234_v17  ;;  %v1236_v25 = vadd.f32 %v724_v22, %v212_v20  ;;  %v1237_v26 = vadd.f32 %v725_v24, %v213_v23  ;;  %v214_v27 = vld [vmem:[%s2747_s19 + $0x48] sm:$0xff]  ;;  %v215_v29 = vld [vmem:[%s2747_s19 + $0x50] sm:$0xff]  ;;  %v216_v32 = vld [vmem:[%s2747_s19 + $0x58] sm:$0xff]  ;;  %p2498_p7 = pneg %p2497_p12  ;;  %p2503_p0 = scmp.lt.s32.totalorder %s2501_s23, %s2495_s24 }
  0x55   : > { %v726_v28 = vld [vmem:[%s2754_s29 + $0x48] sm:$0xff]  ;;  %1747 = vst [vmem:[%s2769_s20 + $0x30] sm:$0xff] %v1235_v21  ;;  %v727_v31 = vld [vmem:[%s2754_s29 + $0x50] sm:$0xff]  ;;  %v728_v33 = vld [vmem:[%s2754_s29 + $0x58] sm:$0xff] }
  0x56   : > { %v1238_v30 = vadd.f32 %v726_v28, %v214_v27  ;;  %1748 = vst [vmem:[%s2769_s20 + $0x38] sm:$0xff] %v1236_v25  ;;  %1749 = vst [vmem:[%s2769_s20 + $0x40] sm:$0xff] %v1237_v26  ;;  %v1239_v34 = vadd.f32 %v727_v31, %v215_v29  ;;  %v1240_v35 = vadd.f32 %v728_v33, %v216_v32  ;;  %v217_v36 = vld [vmem:[%s2747_s19 + $0x60] sm:$0xff]  ;;  %v218_v38 = vld [vmem:[%s2747_s19 + $0x68] sm:$0xff]  ;;  %p2504_p2 = por %p2503_p0, %p2502_p10 }
  0x57   : > { %v729_v37 = vld [vmem:[%s2754_s29 + $0x60] sm:$0xff]  ;;  %v730_v40 = vld [vmem:[%s2754_s29 + $0x68] sm:$0xff]  ;;  %v219_v41 = vld [vmem:[%s2747_s19 + $0x70] sm:$0xff] }
  0x58   : > { %1750 = vst [vmem:[%s2769_s20 + $0x48] sm:$0xff] %v1238_v30  ;;  %v1241_v39 = vadd.f32 %v729_v37, %v217_v36  ;;  %v731_v42 = vld [vmem:[%s2754_s29 + $0x70] sm:$0xff]  ;;  %1751 = vst [vmem:[%s2769_s20 + $0x50] sm:$0xff] %v1239_v34  ;;  %v1242_v43 = vadd.f32 %v730_v40, %v218_v38  ;;  %v220_v45 = vld [vmem:[%s2747_s19 + $0x78] sm:$0xff]  ;;  %p2505_p4 = pnand %p2504_p2, %p2498_p7 }
  0x59   : > { %1752 = vst [vmem:[%s2769_s20 + $0x58] sm:$0xff] %v1240_v35  ;;  %v1243_v44 = vadd.f32 %v731_v42, %v219_v41  ;;  %v732_v46 = vld [vmem:[%s2754_s29 + $0x78] sm:$0xff]  ;;  %v221_v47 = vld [vmem:[%s2747_s19 + $0x80] sm:$0xff]  ;;  %v222_v50 = vld [vmem:[%s2747_s19 + $0x88] sm:$0xff] }
  0x5a   : > { %1753 = vst [vmem:[%s2769_s20 + $0x60] sm:$0xff] %v1241_v39  ;;  %v1244_v48 = vadd.f32 %v732_v46, %v220_v45  ;;  %v733_v49 = vld [vmem:[%s2754_s29 + $0x80] sm:$0xff]  ;;  %v734_v51 = vld [vmem:[%s2754_s29 + $0x88] sm:$0xff]  ;;  %1754 = vst [vmem:[%s2769_s20 + $0x68] sm:$0xff] %v1242_v43 }
  0x5b   : > { %1755 = vst [vmem:[%s2769_s20 + $0x70] sm:$0xff] %v1243_v44  ;;  %v1245_v52 = vadd.f32 %v733_v49, %v221_v47  ;;  %v1246_v53 = vadd.f32 %v734_v51, %v222_v50  ;;  %v223_v54 = vld [vmem:[%s2747_s19 + $0x90] sm:$0xff]  ;;  %v224_v56 = vld [vmem:[%s2747_s19 + $0x98] sm:$0xff]  ;;  %v225_v59 = vld [vmem:[%s2747_s19 + $0xa0] sm:$0xff] }
  0x5c   : > { %v735_v55 = vld [vmem:[%s2754_s29 + $0x90] sm:$0xff]  ;;  %1756 = vst [vmem:[%s2769_s20 + $0x78] sm:$0xff] %v1244_v48  ;;  %v736_v58 = vld [vmem:[%s2754_s29 + $0x98] sm:$0xff]  ;;  %v737_v60 = vld [vmem:[%s2754_s29 + $0xa0] sm:$0xff] }
  0x5d   : > { %v1247_v57 = vadd.f32 %v735_v55, %v223_v54  ;;  %1757 = vst [vmem:[%s2769_s20 + $0x80] sm:$0xff] %v1245_v52  ;;  %1758 = vst [vmem:[%s2769_s20 + $0x88] sm:$0xff] %v1246_v53  ;;  %v1248_v61 = vadd.f32 %v736_v58, %v224_v56  ;;  %v1249_v62 = vadd.f32 %v737_v60, %v225_v59  ;;  %v226_v63 = vld [vmem:[%s2747_s19 + $0xa8] sm:$0xff]  ;;  %v227_v1 = vld [vmem:[%s2747_s19 + $0xb0] sm:$0xff] }
  0x5e   : > { %v738_v0 = vld [vmem:[%s2754_s29 + $0xa8] sm:$0xff]  ;;  %v739_v3 = vld [vmem:[%s2754_s29 + $0xb0] sm:$0xff]  ;;  %v228_v4 = vld [vmem:[%s2747_s19 + $0xb8] sm:$0xff] }
  0x5f   : > { %1759 = vst [vmem:[%s2769_s20 + $0x90] sm:$0xff] %v1247_v57  ;;  %v1250_v2 = vadd.f32 %v738_v0, %v226_v63  ;;  %v740_v5 = vld [vmem:[%s2754_s29 + $0xb8] sm:$0xff]  ;;  %1760 = vst [vmem:[%s2769_s20 + $0x98] sm:$0xff] %v1248_v61  ;;  %v1251_v6 = vadd.f32 %v739_v3, %v227_v1  ;;  %v229_v8 = vld [vmem:[%s2747_s19 + $0xc0] sm:$0xff] }
  0x60   : > { %1761 = vst [vmem:[%s2769_s20 + $0xa0] sm:$0xff] %v1249_v62  ;;  %v1252_v7 = vadd.f32 %v740_v5, %v228_v4  ;;  %v741_v9 = vld [vmem:[%s2754_s29 + $0xc0] sm:$0xff]  ;;  %v230_v10 = vld [vmem:[%s2747_s19 + $0xc8] sm:$0xff]  ;;  %v231_v13 = vld [vmem:[%s2747_s19 + $0xd0] sm:$0xff] }
  0x61   : > { %1762 = vst [vmem:[%s2769_s20 + $0xa8] sm:$0xff] %v1250_v2  ;;  %v1253_v11 = vadd.f32 %v741_v9, %v229_v8  ;;  %v742_v12 = vld [vmem:[%s2754_s29 + $0xc8] sm:$0xff]  ;;  %v743_v14 = vld [vmem:[%s2754_s29 + $0xd0] sm:$0xff]  ;;  %1763 = vst [vmem:[%s2769_s20 + $0xb0] sm:$0xff] %v1251_v6 }
  0x62   : > { %1764 = vst [vmem:[%s2769_s20 + $0xb8] sm:$0xff] %v1252_v7  ;;  %v1254_v15 = vadd.f32 %v742_v12, %v230_v10  ;;  %v1255_v16 = vadd.f32 %v743_v14, %v231_v13  ;;  %v232_v17 = vld [vmem:[%s2747_s19 + $0xd8] sm:$0xff]  ;;  %v233_v19 = vld [vmem:[%s2747_s19 + $0xe0] sm:$0xff]  ;;  %v234_v22 = vld [vmem:[%s2747_s19 + $0xe8] sm:$0xff] }
  0x63   : > { %v744_v18 = vld [vmem:[%s2754_s29 + $0xd8] sm:$0xff]  ;;  %1765 = vst [vmem:[%s2769_s20 + $0xc0] sm:$0xff] %v1253_v11  ;;  %v745_v21 = vld [vmem:[%s2754_s29 + $0xe0] sm:$0xff]  ;;  %v746_v23 = vld [vmem:[%s2754_s29 + $0xe8] sm:$0xff] }
  0x64   : > { %v1256_v20 = vadd.f32 %v744_v18, %v232_v17  ;;  %1766 = vst [vmem:[%s2769_s20 + $0xc8] sm:$0xff] %v1254_v15  ;;  %1767 = vst [vmem:[%s2769_s20 + $0xd0] sm:$0xff] %v1255_v16  ;;  %v1257_v24 = vadd.f32 %v745_v21, %v233_v19  ;;  %v1258_v25 = vadd.f32 %v746_v23, %v234_v22  ;;  %v235_v26 = vld [vmem:[%s2747_s19 + $0xf0] sm:$0xff]  ;;  %v236_v28 = vld [vmem:[%s2747_s19 + $0xf8] sm:$0xff] }
  0x65   : > { %v747_v27 = vld [vmem:[%s2754_s29 + $0xf0] sm:$0xff]  ;;  %v748_v30 = vld [vmem:[%s2754_s29 + $0xf8] sm:$0xff]  ;;  %v237_v31 = vld [vmem:[%s2747_s19 + $0x100] sm:$0xff] }
  0x66   : > { %1768 = vst [vmem:[%s2769_s20 + $0xd8] sm:$0xff] %v1256_v20  ;;  %v1259_v29 = vadd.f32 %v747_v27, %v235_v26  ;;  %v749_v32 = vld [vmem:[%s2754_s29 + $0x100] sm:$0xff]  ;;  %1769 = vst [vmem:[%s2769_s20 + $0xe0] sm:$0xff] %v1257_v24  ;;  %v1260_v33 = vadd.f32 %v748_v30, %v236_v28  ;;  %v238_v35 = vld [vmem:[%s2747_s19 + $0x108] sm:$0xff] }
  0x67   : > { %1770 = vst [vmem:[%s2769_s20 + $0xe8] sm:$0xff] %v1258_v25  ;;  %v1261_v34 = vadd.f32 %v749_v32, %v237_v31  ;;  %v750_v36 = vld [vmem:[%s2754_s29 + $0x108] sm:$0xff]  ;;  %v239_v37 = vld [vmem:[%s2747_s19 + $0x110] sm:$0xff]  ;;  %v240_v40 = vld [vmem:[%s2747_s19 + $0x118] sm:$0xff] }
  0x68   : > { %1771 = vst [vmem:[%s2769_s20 + $0xf0] sm:$0xff] %v1259_v29  ;;  %v1262_v38 = vadd.f32 %v750_v36, %v238_v35  ;;  %v751_v39 = vld [vmem:[%s2754_s29 + $0x110] sm:$0xff]  ;;  %v752_v41 = vld [vmem:[%s2754_s29 + $0x118] sm:$0xff]  ;;  %1772 = vst [vmem:[%s2769_s20 + $0xf8] sm:$0xff] %v1260_v33 }
  0x69   : > { %1773 = vst [vmem:[%s2769_s20 + $0x100] sm:$0xff] %v1261_v34  ;;  %v1263_v42 = vadd.f32 %v751_v39, %v239_v37  ;;  %v1264_v43 = vadd.f32 %v752_v41, %v240_v40  ;;  %v241_v44 = vld [vmem:[%s2747_s19 + $0x120] sm:$0xff]  ;;  %v242_v46 = vld [vmem:[%s2747_s19 + $0x128] sm:$0xff]  ;;  %v243_v49 = vld [vmem:[%s2747_s19 + $0x130] sm:$0xff] }
  0x6a   : > { %v753_v45 = vld [vmem:[%s2754_s29 + $0x120] sm:$0xff]  ;;  %1774 = vst [vmem:[%s2769_s20 + $0x108] sm:$0xff] %v1262_v38  ;;  %v754_v48 = vld [vmem:[%s2754_s29 + $0x128] sm:$0xff]  ;;  %v755_v50 = vld [vmem:[%s2754_s29 + $0x130] sm:$0xff] }
  0x6b   : > { %v1265_v47 = vadd.f32 %v753_v45, %v241_v44  ;;  %1775 = vst [vmem:[%s2769_s20 + $0x110] sm:$0xff] %v1263_v42  ;;  %1776 = vst [vmem:[%s2769_s20 + $0x118] sm:$0xff] %v1264_v43  ;;  %v1266_v51 = vadd.f32 %v754_v48, %v242_v46  ;;  %v1267_v52 = vadd.f32 %v755_v50, %v243_v49  ;;  %v244_v53 = vld [vmem:[%s2747_s19 + $0x138] sm:$0xff]  ;;  %v245_v55 = vld [vmem:[%s2747_s19 + $0x140] sm:$0xff] }
  0x6c   : > { %v756_v54 = vld [vmem:[%s2754_s29 + $0x138] sm:$0xff]  ;;  %v757_v57 = vld [vmem:[%s2754_s29 + $0x140] sm:$0xff]  ;;  %v246_v58 = vld [vmem:[%s2747_s19 + $0x148] sm:$0xff] }
  0x6d   : > { %1777 = vst [vmem:[%s2769_s20 + $0x120] sm:$0xff] %v1265_v47  ;;  %v1268_v56 = vadd.f32 %v756_v54, %v244_v53  ;;  %v758_v59 = vld [vmem:[%s2754_s29 + $0x148] sm:$0xff]  ;;  %1778 = vst [vmem:[%s2769_s20 + $0x128] sm:$0xff] %v1266_v51  ;;  %v1269_v60 = vadd.f32 %v757_v57, %v245_v55  ;;  %v247_v62 = vld [vmem:[%s2747_s19 + $0x150] sm:$0xff] }
  0x6e   : > { %1779 = vst [vmem:[%s2769_s20 + $0x130] sm:$0xff] %v1267_v52  ;;  %v1270_v61 = vadd.f32 %v758_v59, %v246_v58  ;;  %v759_v63 = vld [vmem:[%s2754_s29 + $0x150] sm:$0xff]  ;;  %v248_v0 = vld [vmem:[%s2747_s19 + $0x158] sm:$0xff]  ;;  %v249_v3 = vld [vmem:[%s2747_s19 + $0x160] sm:$0xff] }
  0x6f   : > { %1780 = vst [vmem:[%s2769_s20 + $0x138] sm:$0xff] %v1268_v56  ;;  %v1271_v1 = vadd.f32 %v759_v63, %v247_v62  ;;  %v760_v2 = vld [vmem:[%s2754_s29 + $0x158] sm:$0xff]  ;;  %v761_v4 = vld [vmem:[%s2754_s29 + $0x160] sm:$0xff]  ;;  %1781 = vst [vmem:[%s2769_s20 + $0x140] sm:$0xff] %v1269_v60 }
  0x70   : > { %1782 = vst [vmem:[%s2769_s20 + $0x148] sm:$0xff] %v1270_v61  ;;  %v1272_v5 = vadd.f32 %v760_v2, %v248_v0  ;;  %v1273_v6 = vadd.f32 %v761_v4, %v249_v3  ;;  %v250_v7 = vld [vmem:[%s2747_s19 + $0x168] sm:$0xff]  ;;  %v251_v9 = vld [vmem:[%s2747_s19 + $0x170] sm:$0xff]  ;;  %v252_v12 = vld [vmem:[%s2747_s19 + $0x178] sm:$0xff] }
  0x71   : > { %v762_v8 = vld [vmem:[%s2754_s29 + $0x168] sm:$0xff]  ;;  %1783 = vst [vmem:[%s2769_s20 + $0x150] sm:$0xff] %v1271_v1  ;;  %v763_v11 = vld [vmem:[%s2754_s29 + $0x170] sm:$0xff]  ;;  %v764_v13 = vld [vmem:[%s2754_s29 + $0x178] sm:$0xff] }
  0x72   : > { %v1274_v10 = vadd.f32 %v762_v8, %v250_v7  ;;  %1784 = vst [vmem:[%s2769_s20 + $0x158] sm:$0xff] %v1272_v5  ;;  %1785 = vst [vmem:[%s2769_s20 + $0x160] sm:$0xff] %v1273_v6  ;;  %v1275_v14 = vadd.f32 %v763_v11, %v251_v9  ;;  %v1276_v15 = vadd.f32 %v764_v13, %v252_v12  ;;  %v253_v16 = vld [vmem:[%s2747_s19 + $0x180] sm:$0xff]  ;;  %v254_v18 = vld [vmem:[%s2747_s19 + $0x188] sm:$0xff] }
  0x73   : > { %v765_v17 = vld [vmem:[%s2754_s29 + $0x180] sm:$0xff]  ;;  %v766_v20 = vld [vmem:[%s2754_s29 + $0x188] sm:$0xff]  ;;  %v255_v21 = vld [vmem:[%s2747_s19 + $0x190] sm:$0xff] }
  0x74   : > { %1786 = vst [vmem:[%s2769_s20 + $0x168] sm:$0xff] %v1274_v10  ;;  %v1277_v19 = vadd.f32 %v765_v17, %v253_v16  ;;  %v767_v22 = vld [vmem:[%s2754_s29 + $0x190] sm:$0xff]  ;;  %1787 = vst [vmem:[%s2769_s20 + $0x170] sm:$0xff] %v1275_v14  ;;  %v1278_v23 = vadd.f32 %v766_v20, %v254_v18  ;;  %v256_v25 = vld [vmem:[%s2747_s19 + $0x198] sm:$0xff] }
  0x75   : > { %1788 = vst [vmem:[%s2769_s20 + $0x178] sm:$0xff] %v1276_v15  ;;  %v1279_v24 = vadd.f32 %v767_v22, %v255_v21  ;;  %v768_v26 = vld [vmem:[%s2754_s29 + $0x198] sm:$0xff]  ;;  %v257_v27 = vld [vmem:[%s2747_s19 + $0x1a0] sm:$0xff]  ;;  %v258_v30 = vld [vmem:[%s2747_s19 + $0x1a8] sm:$0xff] }
  0x76   : > { %1789 = vst [vmem:[%s2769_s20 + $0x180] sm:$0xff] %v1277_v19  ;;  %v1280_v28 = vadd.f32 %v768_v26, %v256_v25  ;;  %v769_v29 = vld [vmem:[%s2754_s29 + $0x1a0] sm:$0xff]  ;;  %v770_v31 = vld [vmem:[%s2754_s29 + $0x1a8] sm:$0xff]  ;;  %1790 = vst [vmem:[%s2769_s20 + $0x188] sm:$0xff] %v1278_v23 }
  0x77   : > { %1791 = vst [vmem:[%s2769_s20 + $0x190] sm:$0xff] %v1279_v24  ;;  %v1281_v32 = vadd.f32 %v769_v29, %v257_v27  ;;  %v1282_v33 = vadd.f32 %v770_v31, %v258_v30  ;;  %v259_v34 = vld [vmem:[%s2747_s19 + $0x1b0] sm:$0xff]  ;;  %v260_v36 = vld [vmem:[%s2747_s19 + $0x1b8] sm:$0xff]  ;;  %v261_v39 = vld [vmem:[%s2747_s19 + $0x1c0] sm:$0xff] }
  0x78   : > { %v771_v35 = vld [vmem:[%s2754_s29 + $0x1b0] sm:$0xff]  ;;  %1792 = vst [vmem:[%s2769_s20 + $0x198] sm:$0xff] %v1280_v28  ;;  %v772_v38 = vld [vmem:[%s2754_s29 + $0x1b8] sm:$0xff]  ;;  %v773_v40 = vld [vmem:[%s2754_s29 + $0x1c0] sm:$0xff] }
  0x79   : > { %v1283_v37 = vadd.f32 %v771_v35, %v259_v34  ;;  %1793 = vst [vmem:[%s2769_s20 + $0x1a0] sm:$0xff] %v1281_v32  ;;  %1794 = vst [vmem:[%s2769_s20 + $0x1a8] sm:$0xff] %v1282_v33  ;;  %v1284_v41 = vadd.f32 %v772_v38, %v260_v36  ;;  %v1285_v42 = vadd.f32 %v773_v40, %v261_v39  ;;  %v262_v43 = vld [vmem:[%s2747_s19 + $0x1c8] sm:$0xff]  ;;  %v263_v45 = vld [vmem:[%s2747_s19 + $0x1d0] sm:$0xff] }
  0x7a   : > { %v774_v44 = vld [vmem:[%s2754_s29 + $0x1c8] sm:$0xff]  ;;  %v775_v47 = vld [vmem:[%s2754_s29 + $0x1d0] sm:$0xff]  ;;  %v264_v48 = vld [vmem:[%s2747_s19 + $0x1d8] sm:$0xff] }
  0x7b   : > { %1795 = vst [vmem:[%s2769_s20 + $0x1b0] sm:$0xff] %v1283_v37  ;;  %v1286_v46 = vadd.f32 %v774_v44, %v262_v43  ;;  %v776_v49 = vld [vmem:[%s2754_s29 + $0x1d8] sm:$0xff]  ;;  %1796 = vst [vmem:[%s2769_s20 + $0x1b8] sm:$0xff] %v1284_v41  ;;  %v1287_v50 = vadd.f32 %v775_v47, %v263_v45  ;;  %v265_v52 = vld [vmem:[%s2747_s19 + $0x1e0] sm:$0xff] }
  0x7c   : > { %1797 = vst [vmem:[%s2769_s20 + $0x1c0] sm:$0xff] %v1285_v42  ;;  %v1288_v51 = vadd.f32 %v776_v49, %v264_v48  ;;  %v777_v53 = vld [vmem:[%s2754_s29 + $0x1e0] sm:$0xff]  ;;  %v266_v54 = vld [vmem:[%s2747_s19 + $0x1e8] sm:$0xff]  ;;  %v267_v57 = vld [vmem:[%s2747_s19 + $0x1f0] sm:$0xff] }
  0x7d   : > { %1798 = vst [vmem:[%s2769_s20 + $0x1c8] sm:$0xff] %v1286_v46  ;;  %v1289_v55 = vadd.f32 %v777_v53, %v265_v52  ;;  %v778_v56 = vld [vmem:[%s2754_s29 + $0x1e8] sm:$0xff]  ;;  %v779_v58 = vld [vmem:[%s2754_s29 + $0x1f0] sm:$0xff]  ;;  %1799 = vst [vmem:[%s2769_s20 + $0x1d0] sm:$0xff] %v1287_v50 }
  0x7e   : > { %1800 = vst [vmem:[%s2769_s20 + $0x1d8] sm:$0xff] %v1288_v51  ;;  %v1290_v59 = vadd.f32 %v778_v56, %v266_v54  ;;  %v1291_v60 = vadd.f32 %v779_v58, %v267_v57  ;;  %v268_v61 = vld [vmem:[%s2747_s19 + $0x1f8] sm:$0xff]  ;;  %v269_v63 = vld [vmem:[%s2747_s19 + $0x200] sm:$0xff]  ;;  %v270_v2 = vld [vmem:[%s2747_s19 + $0x208] sm:$0xff] }
  0x7f   : > { %v780_v62 = vld [vmem:[%s2754_s29 + $0x1f8] sm:$0xff]  ;;  %1801 = vst [vmem:[%s2769_s20 + $0x1e0] sm:$0xff] %v1289_v55  ;;  %v781_v1 = vld [vmem:[%s2754_s29 + $0x200] sm:$0xff]  ;;  %v782_v3 = vld [vmem:[%s2754_s29 + $0x208] sm:$0xff] }
  0x80   : > { %v1292_v0 = vadd.f32 %v780_v62, %v268_v61  ;;  %1802 = vst [vmem:[%s2769_s20 + $0x1e8] sm:$0xff] %v1290_v59  ;;  %1803 = vst [vmem:[%s2769_s20 + $0x1f0] sm:$0xff] %v1291_v60  ;;  %v1293_v4 = vadd.f32 %v781_v1, %v269_v63  ;;  %v1294_v5 = vadd.f32 %v782_v3, %v270_v2  ;;  %v271_v6 = vld [vmem:[%s2747_s19 + $0x210] sm:$0xff]  ;;  %v272_v8 = vld [vmem:[%s2747_s19 + $0x218] sm:$0xff] }
  0x81   : > { %v783_v7 = vld [vmem:[%s2754_s29 + $0x210] sm:$0xff]  ;;  %v784_v10 = vld [vmem:[%s2754_s29 + $0x218] sm:$0xff]  ;;  %v273_v11 = vld [vmem:[%s2747_s19 + $0x220] sm:$0xff] }
  0x82   : > { %1804 = vst [vmem:[%s2769_s20 + $0x1f8] sm:$0xff] %v1292_v0  ;;  %v1295_v9 = vadd.f32 %v783_v7, %v271_v6  ;;  %v785_v12 = vld [vmem:[%s2754_s29 + $0x220] sm:$0xff]  ;;  %1805 = vst [vmem:[%s2769_s20 + $0x200] sm:$0xff] %v1293_v4  ;;  %v1296_v13 = vadd.f32 %v784_v10, %v272_v8  ;;  %v274_v15 = vld [vmem:[%s2747_s19 + $0x228] sm:$0xff] }
  0x83   : > { %1806 = vst [vmem:[%s2769_s20 + $0x208] sm:$0xff] %v1294_v5  ;;  %v1297_v14 = vadd.f32 %v785_v12, %v273_v11  ;;  %v786_v16 = vld [vmem:[%s2754_s29 + $0x228] sm:$0xff]  ;;  %v275_v17 = vld [vmem:[%s2747_s19 + $0x230] sm:$0xff]  ;;  %v276_v20 = vld [vmem:[%s2747_s19 + $0x238] sm:$0xff] }
  0x84   : > { %1807 = vst [vmem:[%s2769_s20 + $0x210] sm:$0xff] %v1295_v9  ;;  %v1298_v18 = vadd.f32 %v786_v16, %v274_v15  ;;  %v787_v19 = vld [vmem:[%s2754_s29 + $0x230] sm:$0xff]  ;;  %v788_v21 = vld [vmem:[%s2754_s29 + $0x238] sm:$0xff]  ;;  %1808 = vst [vmem:[%s2769_s20 + $0x218] sm:$0xff] %v1296_v13 }
  0x85   : > { %1809 = vst [vmem:[%s2769_s20 + $0x220] sm:$0xff] %v1297_v14  ;;  %v1299_v22 = vadd.f32 %v787_v19, %v275_v17  ;;  %v1300_v23 = vadd.f32 %v788_v21, %v276_v20  ;;  %v277_v24 = vld [vmem:[%s2747_s19 + $0x240] sm:$0xff]  ;;  %v278_v26 = vld [vmem:[%s2747_s19 + $0x248] sm:$0xff]  ;;  %v279_v29 = vld [vmem:[%s2747_s19 + $0x250] sm:$0xff] }
  0x86   : > { %v789_v25 = vld [vmem:[%s2754_s29 + $0x240] sm:$0xff]  ;;  %1810 = vst [vmem:[%s2769_s20 + $0x228] sm:$0xff] %v1298_v18  ;;  %v790_v28 = vld [vmem:[%s2754_s29 + $0x248] sm:$0xff]  ;;  %v791_v30 = vld [vmem:[%s2754_s29 + $0x250] sm:$0xff] }
  0x87   : > { %v1301_v27 = vadd.f32 %v789_v25, %v277_v24  ;;  %1811 = vst [vmem:[%s2769_s20 + $0x230] sm:$0xff] %v1299_v22  ;;  %1812 = vst [vmem:[%s2769_s20 + $0x238] sm:$0xff] %v1300_v23  ;;  %v1302_v31 = vadd.f32 %v790_v28, %v278_v26  ;;  %v1303_v32 = vadd.f32 %v791_v30, %v279_v29  ;;  %v280_v33 = vld [vmem:[%s2747_s19 + $0x258] sm:$0xff]  ;;  %v281_v35 = vld [vmem:[%s2747_s19 + $0x260] sm:$0xff] }
  0x88   : > { %v792_v34 = vld [vmem:[%s2754_s29 + $0x258] sm:$0xff]  ;;  %v793_v37 = vld [vmem:[%s2754_s29 + $0x260] sm:$0xff]  ;;  %v282_v38 = vld [vmem:[%s2747_s19 + $0x268] sm:$0xff] }
  0x89   : > { %1813 = vst [vmem:[%s2769_s20 + $0x240] sm:$0xff] %v1301_v27  ;;  %v1304_v36 = vadd.f32 %v792_v34, %v280_v33  ;;  %v794_v39 = vld [vmem:[%s2754_s29 + $0x268] sm:$0xff]  ;;  %1814 = vst [vmem:[%s2769_s20 + $0x248] sm:$0xff] %v1302_v31  ;;  %v1305_v40 = vadd.f32 %v793_v37, %v281_v35  ;;  %v283_v42 = vld [vmem:[%s2747_s19 + $0x270] sm:$0xff] }
  0x8a   : > { %1815 = vst [vmem:[%s2769_s20 + $0x250] sm:$0xff] %v1303_v32  ;;  %v1306_v41 = vadd.f32 %v794_v39, %v282_v38  ;;  %v795_v43 = vld [vmem:[%s2754_s29 + $0x270] sm:$0xff]  ;;  %v284_v44 = vld [vmem:[%s2747_s19 + $0x278] sm:$0xff]  ;;  %v285_v47 = vld [vmem:[%s2747_s19 + $0x280] sm:$0xff] }
  0x8b   : > { %1816 = vst [vmem:[%s2769_s20 + $0x258] sm:$0xff] %v1304_v36  ;;  %v1307_v45 = vadd.f32 %v795_v43, %v283_v42  ;;  %v796_v46 = vld [vmem:[%s2754_s29 + $0x278] sm:$0xff]  ;;  %v797_v48 = vld [vmem:[%s2754_s29 + $0x280] sm:$0xff]  ;;  %1817 = vst [vmem:[%s2769_s20 + $0x260] sm:$0xff] %v1305_v40 }
  0x8c   : > { %1818 = vst [vmem:[%s2769_s20 + $0x268] sm:$0xff] %v1306_v41  ;;  %v1308_v49 = vadd.f32 %v796_v46, %v284_v44  ;;  %v1309_v50 = vadd.f32 %v797_v48, %v285_v47  ;;  %v286_v51 = vld [vmem:[%s2747_s19 + $0x288] sm:$0xff]  ;;  %v287_v53 = vld [vmem:[%s2747_s19 + $0x290] sm:$0xff]  ;;  %v288_v56 = vld [vmem:[%s2747_s19 + $0x298] sm:$0xff] }
  0x8d   : > { %v798_v52 = vld [vmem:[%s2754_s29 + $0x288] sm:$0xff]  ;;  %1819 = vst [vmem:[%s2769_s20 + $0x270] sm:$0xff] %v1307_v45  ;;  %v799_v55 = vld [vmem:[%s2754_s29 + $0x290] sm:$0xff]  ;;  %v800_v57 = vld [vmem:[%s2754_s29 + $0x298] sm:$0xff] }
  0x8e   : > { %v1310_v54 = vadd.f32 %v798_v52, %v286_v51  ;;  %1820 = vst [vmem:[%s2769_s20 + $0x278] sm:$0xff] %v1308_v49  ;;  %1821 = vst [vmem:[%s2769_s20 + $0x280] sm:$0xff] %v1309_v50  ;;  %v1311_v58 = vadd.f32 %v799_v55, %v287_v53  ;;  %v1312_v59 = vadd.f32 %v800_v57, %v288_v56  ;;  %v289_v60 = vld [vmem:[%s2747_s19 + $0x2a0] sm:$0xff]  ;;  %v290_v62 = vld [vmem:[%s2747_s19 + $0x2a8] sm:$0xff] }
  0x8f   : > { %v801_v61 = vld [vmem:[%s2754_s29 + $0x2a0] sm:$0xff]  ;;  %v802_v0 = vld [vmem:[%s2754_s29 + $0x2a8] sm:$0xff]  ;;  %v291_v1 = vld [vmem:[%s2747_s19 + $0x2b0] sm:$0xff] }
  0x90   : > { %1822 = vst [vmem:[%s2769_s20 + $0x288] sm:$0xff] %v1310_v54  ;;  %v1313_v63 = vadd.f32 %v801_v61, %v289_v60  ;;  %v803_v2 = vld [vmem:[%s2754_s29 + $0x2b0] sm:$0xff]  ;;  %1823 = vst [vmem:[%s2769_s20 + $0x290] sm:$0xff] %v1311_v58  ;;  %v1314_v3 = vadd.f32 %v802_v0, %v290_v62  ;;  %v292_v5 = vld [vmem:[%s2747_s19 + $0x2b8] sm:$0xff] }
  0x91   : > { %1824 = vst [vmem:[%s2769_s20 + $0x298] sm:$0xff] %v1312_v59  ;;  %v1315_v4 = vadd.f32 %v803_v2, %v291_v1  ;;  %v804_v6 = vld [vmem:[%s2754_s29 + $0x2b8] sm:$0xff]  ;;  %v293_v7 = vld [vmem:[%s2747_s19 + $0x2c0] sm:$0xff]  ;;  %v294_v10 = vld [vmem:[%s2747_s19 + $0x2c8] sm:$0xff] }
  0x92   : > { %1825 = vst [vmem:[%s2769_s20 + $0x2a0] sm:$0xff] %v1313_v63  ;;  %v1316_v8 = vadd.f32 %v804_v6, %v292_v5  ;;  %v805_v9 = vld [vmem:[%s2754_s29 + $0x2c0] sm:$0xff]  ;;  %v806_v11 = vld [vmem:[%s2754_s29 + $0x2c8] sm:$0xff]  ;;  %1826 = vst [vmem:[%s2769_s20 + $0x2a8] sm:$0xff] %v1314_v3 }
  0x93   : > { %1827 = vst [vmem:[%s2769_s20 + $0x2b0] sm:$0xff] %v1315_v4  ;;  %v1317_v12 = vadd.f32 %v805_v9, %v293_v7  ;;  %v1318_v13 = vadd.f32 %v806_v11, %v294_v10  ;;  %v295_v14 = vld [vmem:[%s2747_s19 + $0x2d0] sm:$0xff]  ;;  %v296_v16 = vld [vmem:[%s2747_s19 + $0x2d8] sm:$0xff]  ;;  %v297_v19 = vld [vmem:[%s2747_s19 + $0x2e0] sm:$0xff] }
  0x94   : > { %v807_v15 = vld [vmem:[%s2754_s29 + $0x2d0] sm:$0xff]  ;;  %1828 = vst [vmem:[%s2769_s20 + $0x2b8] sm:$0xff] %v1316_v8  ;;  %v808_v18 = vld [vmem:[%s2754_s29 + $0x2d8] sm:$0xff]  ;;  %v809_v20 = vld [vmem:[%s2754_s29 + $0x2e0] sm:$0xff] }
  0x95   : > { %v1319_v17 = vadd.f32 %v807_v15, %v295_v14  ;;  %1829 = vst [vmem:[%s2769_s20 + $0x2c0] sm:$0xff] %v1317_v12  ;;  %1830 = vst [vmem:[%s2769_s20 + $0x2c8] sm:$0xff] %v1318_v13  ;;  %v1320_v21 = vadd.f32 %v808_v18, %v296_v16  ;;  %v1321_v22 = vadd.f32 %v809_v20, %v297_v19  ;;  %v298_v23 = vld [vmem:[%s2747_s19 + $0x2e8] sm:$0xff]  ;;  %v299_v25 = vld [vmem:[%s2747_s19 + $0x2f0] sm:$0xff] }
  0x96   : > { %v810_v24 = vld [vmem:[%s2754_s29 + $0x2e8] sm:$0xff]  ;;  %v811_v27 = vld [vmem:[%s2754_s29 + $0x2f0] sm:$0xff]  ;;  %v300_v28 = vld [vmem:[%s2747_s19 + $0x2f8] sm:$0xff] }
  0x97   : > { %1831 = vst [vmem:[%s2769_s20 + $0x2d0] sm:$0xff] %v1319_v17  ;;  %v1322_v26 = vadd.f32 %v810_v24, %v298_v23  ;;  %v812_v29 = vld [vmem:[%s2754_s29 + $0x2f8] sm:$0xff]  ;;  %1832 = vst [vmem:[%s2769_s20 + $0x2d8] sm:$0xff] %v1320_v21  ;;  %v1323_v30 = vadd.f32 %v811_v27, %v299_v25  ;;  %v301_v32 = vld [vmem:[%s2747_s19 + $0x300] sm:$0xff] }
  0x98   : > { %1833 = vst [vmem:[%s2769_s20 + $0x2e0] sm:$0xff] %v1321_v22  ;;  %v1324_v31 = vadd.f32 %v812_v29, %v300_v28  ;;  %v813_v33 = vld [vmem:[%s2754_s29 + $0x300] sm:$0xff]  ;;  %v302_v34 = vld [vmem:[%s2747_s19 + $0x308] sm:$0xff]  ;;  %v303_v37 = vld [vmem:[%s2747_s19 + $0x310] sm:$0xff] }
  0x99   : > { %1834 = vst [vmem:[%s2769_s20 + $0x2e8] sm:$0xff] %v1322_v26  ;;  %v1325_v35 = vadd.f32 %v813_v33, %v301_v32  ;;  %v814_v36 = vld [vmem:[%s2754_s29 + $0x308] sm:$0xff]  ;;  %v815_v38 = vld [vmem:[%s2754_s29 + $0x310] sm:$0xff]  ;;  %1835 = vst [vmem:[%s2769_s20 + $0x2f0] sm:$0xff] %v1323_v30 }
  0x9a   : > { %1836 = vst [vmem:[%s2769_s20 + $0x2f8] sm:$0xff] %v1324_v31  ;;  %v1326_v39 = vadd.f32 %v814_v36, %v302_v34  ;;  %v1327_v40 = vadd.f32 %v815_v38, %v303_v37  ;;  %v304_v41 = vld [vmem:[%s2747_s19 + $0x318] sm:$0xff]  ;;  %v305_v43 = vld [vmem:[%s2747_s19 + $0x320] sm:$0xff]  ;;  %v306_v46 = vld [vmem:[%s2747_s19 + $0x328] sm:$0xff] }
  0x9b   : > { %v816_v42 = vld [vmem:[%s2754_s29 + $0x318] sm:$0xff]  ;;  %1837 = vst [vmem:[%s2769_s20 + $0x300] sm:$0xff] %v1325_v35  ;;  %v817_v45 = vld [vmem:[%s2754_s29 + $0x320] sm:$0xff]  ;;  %v818_v47 = vld [vmem:[%s2754_s29 + $0x328] sm:$0xff] }
  0x9c   : > { %v1328_v44 = vadd.f32 %v816_v42, %v304_v41  ;;  %1838 = vst [vmem:[%s2769_s20 + $0x308] sm:$0xff] %v1326_v39  ;;  %1839 = vst [vmem:[%s2769_s20 + $0x310] sm:$0xff] %v1327_v40  ;;  %v1329_v48 = vadd.f32 %v817_v45, %v305_v43  ;;  %v1330_v49 = vadd.f32 %v818_v47, %v306_v46  ;;  %v307_v50 = vld [vmem:[%s2747_s19 + $0x330] sm:$0xff]  ;;  %v308_v52 = vld [vmem:[%s2747_s19 + $0x338] sm:$0xff] }
  0x9d   : > { %v819_v51 = vld [vmem:[%s2754_s29 + $0x330] sm:$0xff]  ;;  %v820_v54 = vld [vmem:[%s2754_s29 + $0x338] sm:$0xff]  ;;  %v309_v55 = vld [vmem:[%s2747_s19 + $0x340] sm:$0xff] }
  0x9e   : > { %1840 = vst [vmem:[%s2769_s20 + $0x318] sm:$0xff] %v1328_v44  ;;  %v1331_v53 = vadd.f32 %v819_v51, %v307_v50  ;;  %v821_v56 = vld [vmem:[%s2754_s29 + $0x340] sm:$0xff]  ;;  %1841 = vst [vmem:[%s2769_s20 + $0x320] sm:$0xff] %v1329_v48  ;;  %v1332_v57 = vadd.f32 %v820_v54, %v308_v52  ;;  %v310_v59 = vld [vmem:[%s2747_s19 + $0x348] sm:$0xff] }
  0x9f   : > { %1842 = vst [vmem:[%s2769_s20 + $0x328] sm:$0xff] %v1330_v49  ;;  %v1333_v58 = vadd.f32 %v821_v56, %v309_v55  ;;  %v822_v60 = vld [vmem:[%s2754_s29 + $0x348] sm:$0xff]  ;;  %v311_v61 = vld [vmem:[%s2747_s19 + $0x350] sm:$0xff]  ;;  %v312_v0 = vld [vmem:[%s2747_s19 + $0x358] sm:$0xff] }
  0xa0   : > { %1843 = vst [vmem:[%s2769_s20 + $0x330] sm:$0xff] %v1331_v53  ;;  %v1334_v62 = vadd.f32 %v822_v60, %v310_v59  ;;  %v823_v63 = vld [vmem:[%s2754_s29 + $0x350] sm:$0xff]  ;;  %v824_v1 = vld [vmem:[%s2754_s29 + $0x358] sm:$0xff]  ;;  %1844 = vst [vmem:[%s2769_s20 + $0x338] sm:$0xff] %v1332_v57 }
  0xa1   : > { %1845 = vst [vmem:[%s2769_s20 + $0x340] sm:$0xff] %v1333_v58  ;;  %v1335_v2 = vadd.f32 %v823_v63, %v311_v61  ;;  %v1336_v3 = vadd.f32 %v824_v1, %v312_v0  ;;  %v313_v4 = vld [vmem:[%s2747_s19 + $0x360] sm:$0xff]  ;;  %v314_v6 = vld [vmem:[%s2747_s19 + $0x368] sm:$0xff]  ;;  %v315_v9 = vld [vmem:[%s2747_s19 + $0x370] sm:$0xff] }
  0xa2   : > { %v825_v5 = vld [vmem:[%s2754_s29 + $0x360] sm:$0xff]  ;;  %1846 = vst [vmem:[%s2769_s20 + $0x348] sm:$0xff] %v1334_v62  ;;  %v826_v8 = vld [vmem:[%s2754_s29 + $0x368] sm:$0xff]  ;;  %v827_v10 = vld [vmem:[%s2754_s29 + $0x370] sm:$0xff] }
  0xa3   : > { %v1337_v7 = vadd.f32 %v825_v5, %v313_v4  ;;  %1847 = vst [vmem:[%s2769_s20 + $0x350] sm:$0xff] %v1335_v2  ;;  %1848 = vst [vmem:[%s2769_s20 + $0x358] sm:$0xff] %v1336_v3  ;;  %v1338_v11 = vadd.f32 %v826_v8, %v314_v6  ;;  %v1339_v12 = vadd.f32 %v827_v10, %v315_v9  ;;  %v316_v13 = vld [vmem:[%s2747_s19 + $0x378] sm:$0xff]  ;;  %v317_v15 = vld [vmem:[%s2747_s19 + $0x380] sm:$0xff] }
  0xa4   : > { %v828_v14 = vld [vmem:[%s2754_s29 + $0x378] sm:$0xff]  ;;  %v829_v17 = vld [vmem:[%s2754_s29 + $0x380] sm:$0xff]  ;;  %v318_v18 = vld [vmem:[%s2747_s19 + $0x388] sm:$0xff] }
  0xa5   : > { %1849 = vst [vmem:[%s2769_s20 + $0x360] sm:$0xff] %v1337_v7  ;;  %v1340_v16 = vadd.f32 %v828_v14, %v316_v13  ;;  %v830_v19 = vld [vmem:[%s2754_s29 + $0x388] sm:$0xff]  ;;  %1850 = vst [vmem:[%s2769_s20 + $0x368] sm:$0xff] %v1338_v11  ;;  %v1341_v20 = vadd.f32 %v829_v17, %v317_v15  ;;  %v319_v22 = vld [vmem:[%s2747_s19 + $0x390] sm:$0xff] }
  0xa6   : > { %1851 = vst [vmem:[%s2769_s20 + $0x370] sm:$0xff] %v1339_v12  ;;  %v1342_v21 = vadd.f32 %v830_v19, %v318_v18  ;;  %v831_v23 = vld [vmem:[%s2754_s29 + $0x390] sm:$0xff]  ;;  %v320_v24 = vld [vmem:[%s2747_s19 + $0x398] sm:$0xff]  ;;  %v321_v27 = vld [vmem:[%s2747_s19 + $0x3a0] sm:$0xff] }
  0xa7   : > { %1852 = vst [vmem:[%s2769_s20 + $0x378] sm:$0xff] %v1340_v16  ;;  %v1343_v25 = vadd.f32 %v831_v23, %v319_v22  ;;  %v832_v26 = vld [vmem:[%s2754_s29 + $0x398] sm:$0xff]  ;;  %v833_v28 = vld [vmem:[%s2754_s29 + $0x3a0] sm:$0xff]  ;;  %1853 = vst [vmem:[%s2769_s20 + $0x380] sm:$0xff] %v1341_v20 }
  0xa8   : > { %1854 = vst [vmem:[%s2769_s20 + $0x388] sm:$0xff] %v1342_v21  ;;  %v1344_v29 = vadd.f32 %v832_v26, %v320_v24  ;;  %v1345_v30 = vadd.f32 %v833_v28, %v321_v27  ;;  %v322_v31 = vld [vmem:[%s2747_s19 + $0x3a8] sm:$0xff]  ;;  %v323_v33 = vld [vmem:[%s2747_s19 + $0x3b0] sm:$0xff]  ;;  %v324_v36 = vld [vmem:[%s2747_s19 + $0x3b8] sm:$0xff] }
  0xa9   : > { %v834_v32 = vld [vmem:[%s2754_s29 + $0x3a8] sm:$0xff]  ;;  %1855 = vst [vmem:[%s2769_s20 + $0x390] sm:$0xff] %v1343_v25  ;;  %v835_v35 = vld [vmem:[%s2754_s29 + $0x3b0] sm:$0xff]  ;;  %v836_v37 = vld [vmem:[%s2754_s29 + $0x3b8] sm:$0xff] }
  0xaa   : > { %v1346_v34 = vadd.f32 %v834_v32, %v322_v31  ;;  %1856 = vst [vmem:[%s2769_s20 + $0x398] sm:$0xff] %v1344_v29  ;;  %1857 = vst [vmem:[%s2769_s20 + $0x3a0] sm:$0xff] %v1345_v30  ;;  %v1347_v38 = vadd.f32 %v835_v35, %v323_v33  ;;  %v1348_v39 = vadd.f32 %v836_v37, %v324_v36  ;;  %v325_v40 = vld [vmem:[%s2747_s19 + $0x3c0] sm:$0xff]  ;;  %v326_v42 = vld [vmem:[%s2747_s19 + $0x3c8] sm:$0xff] }
  0xab   : > { %v837_v41 = vld [vmem:[%s2754_s29 + $0x3c0] sm:$0xff]  ;;  %v838_v44 = vld [vmem:[%s2754_s29 + $0x3c8] sm:$0xff]  ;;  %v327_v45 = vld [vmem:[%s2747_s19 + $0x3d0] sm:$0xff] }
  0xac   : > { %1858 = vst [vmem:[%s2769_s20 + $0x3a8] sm:$0xff] %v1346_v34  ;;  %v1349_v43 = vadd.f32 %v837_v41, %v325_v40  ;;  %v839_v46 = vld [vmem:[%s2754_s29 + $0x3d0] sm:$0xff]  ;;  %1859 = vst [vmem:[%s2769_s20 + $0x3b0] sm:$0xff] %v1347_v38  ;;  %v1350_v47 = vadd.f32 %v838_v44, %v326_v42  ;;  %v328_v49 = vld [vmem:[%s2747_s19 + $0x3d8] sm:$0xff] }
  0xad   : > { %1860 = vst [vmem:[%s2769_s20 + $0x3b8] sm:$0xff] %v1348_v39  ;;  %v1351_v48 = vadd.f32 %v839_v46, %v327_v45  ;;  %v840_v50 = vld [vmem:[%s2754_s29 + $0x3d8] sm:$0xff]  ;;  %v329_v51 = vld [vmem:[%s2747_s19 + $0x3e0] sm:$0xff]  ;;  %v330_v54 = vld [vmem:[%s2747_s19 + $0x3e8] sm:$0xff] }
  0xae   : > { %1861 = vst [vmem:[%s2769_s20 + $0x3c0] sm:$0xff] %v1349_v43  ;;  %v1352_v52 = vadd.f32 %v840_v50, %v328_v49  ;;  %v841_v53 = vld [vmem:[%s2754_s29 + $0x3e0] sm:$0xff]  ;;  %v842_v55 = vld [vmem:[%s2754_s29 + $0x3e8] sm:$0xff]  ;;  %1862 = vst [vmem:[%s2769_s20 + $0x3c8] sm:$0xff] %v1350_v47 }
  0xaf   : > { %1863 = vst [vmem:[%s2769_s20 + $0x3d0] sm:$0xff] %v1351_v48  ;;  %v1353_v56 = vadd.f32 %v841_v53, %v329_v51  ;;  %v1354_v57 = vadd.f32 %v842_v55, %v330_v54  ;;  %v331_v58 = vld [vmem:[%s2747_s19 + $0x3f0] sm:$0xff]  ;;  %v332_v60 = vld [vmem:[%s2747_s19 + $0x3f8] sm:$0xff]  ;;  %v333_v63 = vld [vmem:[%s2747_s19 + $0x400] sm:$0xff] }
  0xb0   : > { %v843_v59 = vld [vmem:[%s2754_s29 + $0x3f0] sm:$0xff]  ;;  %1864 = vst [vmem:[%s2769_s20 + $0x3d8] sm:$0xff] %v1352_v52  ;;  %v844_v62 = vld [vmem:[%s2754_s29 + $0x3f8] sm:$0xff]  ;;  %v845_v0 = vld [vmem:[%s2754_s29 + $0x400] sm:$0xff] }
  0xb1   : > { %v1355_v61 = vadd.f32 %v843_v59, %v331_v58  ;;  %1865 = vst [vmem:[%s2769_s20 + $0x3e0] sm:$0xff] %v1353_v56  ;;  %1866 = vst [vmem:[%s2769_s20 + $0x3e8] sm:$0xff] %v1354_v57  ;;  %v1356_v1 = vadd.f32 %v844_v62, %v332_v60  ;;  %v1357_v2 = vadd.f32 %v845_v0, %v333_v63  ;;  %v334_v3 = vld [vmem:[%s2747_s19 + $0x408] sm:$0xff]  ;;  %v335_v5 = vld [vmem:[%s2747_s19 + $0x410] sm:$0xff] }
  0xb2   : > { %v846_v4 = vld [vmem:[%s2754_s29 + $0x408] sm:$0xff]  ;;  %v847_v7 = vld [vmem:[%s2754_s29 + $0x410] sm:$0xff]  ;;  %v336_v8 = vld [vmem:[%s2747_s19 + $0x418] sm:$0xff] }
  0xb3   : > { %1867 = vst [vmem:[%s2769_s20 + $0x3f0] sm:$0xff] %v1355_v61  ;;  %v1358_v6 = vadd.f32 %v846_v4, %v334_v3  ;;  %v848_v9 = vld [vmem:[%s2754_s29 + $0x418] sm:$0xff]  ;;  %1868 = vst [vmem:[%s2769_s20 + $0x3f8] sm:$0xff] %v1356_v1  ;;  %v1359_v10 = vadd.f32 %v847_v7, %v335_v5  ;;  %v337_v12 = vld [vmem:[%s2747_s19 + $0x420] sm:$0xff] }
  0xb4   : > { %1869 = vst [vmem:[%s2769_s20 + $0x400] sm:$0xff] %v1357_v2  ;;  %v1360_v11 = vadd.f32 %v848_v9, %v336_v8  ;;  %v849_v13 = vld [vmem:[%s2754_s29 + $0x420] sm:$0xff]  ;;  %v338_v14 = vld [vmem:[%s2747_s19 + $0x428] sm:$0xff]  ;;  %v339_v17 = vld [vmem:[%s2747_s19 + $0x430] sm:$0xff] }
  0xb5   : > { %1870 = vst [vmem:[%s2769_s20 + $0x408] sm:$0xff] %v1358_v6  ;;  %v1361_v15 = vadd.f32 %v849_v13, %v337_v12  ;;  %v850_v16 = vld [vmem:[%s2754_s29 + $0x428] sm:$0xff]  ;;  %v851_v18 = vld [vmem:[%s2754_s29 + $0x430] sm:$0xff]  ;;  %1871 = vst [vmem:[%s2769_s20 + $0x410] sm:$0xff] %v1359_v10 }
  0xb6   : > { %1872 = vst [vmem:[%s2769_s20 + $0x418] sm:$0xff] %v1360_v11  ;;  %v1362_v19 = vadd.f32 %v850_v16, %v338_v14  ;;  %v1363_v20 = vadd.f32 %v851_v18, %v339_v17  ;;  %v340_v21 = vld [vmem:[%s2747_s19 + $0x438] sm:$0xff]  ;;  %v341_v23 = vld [vmem:[%s2747_s19 + $0x440] sm:$0xff]  ;;  %v342_v26 = vld [vmem:[%s2747_s19 + $0x448] sm:$0xff] }
  0xb7   : > { %v852_v22 = vld [vmem:[%s2754_s29 + $0x438] sm:$0xff]  ;;  %1873 = vst [vmem:[%s2769_s20 + $0x420] sm:$0xff] %v1361_v15  ;;  %v853_v25 = vld [vmem:[%s2754_s29 + $0x440] sm:$0xff]  ;;  %v854_v27 = vld [vmem:[%s2754_s29 + $0x448] sm:$0xff] }
  0xb8   : > { %v1364_v24 = vadd.f32 %v852_v22, %v340_v21  ;;  %1874 = vst [vmem:[%s2769_s20 + $0x428] sm:$0xff] %v1362_v19  ;;  %1875 = vst [vmem:[%s2769_s20 + $0x430] sm:$0xff] %v1363_v20  ;;  %v1365_v28 = vadd.f32 %v853_v25, %v341_v23  ;;  %v1366_v29 = vadd.f32 %v854_v27, %v342_v26  ;;  %v343_v30 = vld [vmem:[%s2747_s19 + $0x450] sm:$0xff]  ;;  %v344_v32 = vld [vmem:[%s2747_s19 + $0x458] sm:$0xff] }
  0xb9   : > { %v855_v31 = vld [vmem:[%s2754_s29 + $0x450] sm:$0xff]  ;;  %v856_v34 = vld [vmem:[%s2754_s29 + $0x458] sm:$0xff]  ;;  %v345_v35 = vld [vmem:[%s2747_s19 + $0x460] sm:$0xff] }
  0xba   : > { %1876 = vst [vmem:[%s2769_s20 + $0x438] sm:$0xff] %v1364_v24  ;;  %v1367_v33 = vadd.f32 %v855_v31, %v343_v30  ;;  %v857_v36 = vld [vmem:[%s2754_s29 + $0x460] sm:$0xff]  ;;  %1877 = vst [vmem:[%s2769_s20 + $0x440] sm:$0xff] %v1365_v28  ;;  %v1368_v37 = vadd.f32 %v856_v34, %v344_v32  ;;  %v346_v39 = vld [vmem:[%s2747_s19 + $0x468] sm:$0xff] }
  0xbb   : > { %1878 = vst [vmem:[%s2769_s20 + $0x448] sm:$0xff] %v1366_v29  ;;  %v1369_v38 = vadd.f32 %v857_v36, %v345_v35  ;;  %v858_v40 = vld [vmem:[%s2754_s29 + $0x468] sm:$0xff]  ;;  %v347_v41 = vld [vmem:[%s2747_s19 + $0x470] sm:$0xff]  ;;  %v348_v44 = vld [vmem:[%s2747_s19 + $0x478] sm:$0xff] }
  0xbc   : > { %1879 = vst [vmem:[%s2769_s20 + $0x450] sm:$0xff] %v1367_v33  ;;  %v1370_v42 = vadd.f32 %v858_v40, %v346_v39  ;;  %v859_v43 = vld [vmem:[%s2754_s29 + $0x470] sm:$0xff]  ;;  %v860_v45 = vld [vmem:[%s2754_s29 + $0x478] sm:$0xff]  ;;  %1880 = vst [vmem:[%s2769_s20 + $0x458] sm:$0xff] %v1368_v37 }
  0xbd   : > { %1881 = vst [vmem:[%s2769_s20 + $0x460] sm:$0xff] %v1369_v38  ;;  %v1371_v46 = vadd.f32 %v859_v43, %v347_v41  ;;  %v1372_v47 = vadd.f32 %v860_v45, %v348_v44  ;;  %v349_v48 = vld [vmem:[%s2747_s19 + $0x480] sm:$0xff]  ;;  %v350_v50 = vld [vmem:[%s2747_s19 + $0x488] sm:$0xff]  ;;  %v351_v53 = vld [vmem:[%s2747_s19 + $0x490] sm:$0xff] }
  0xbe   : > { %v861_v49 = vld [vmem:[%s2754_s29 + $0x480] sm:$0xff]  ;;  %1882 = vst [vmem:[%s2769_s20 + $0x468] sm:$0xff] %v1370_v42  ;;  %v862_v52 = vld [vmem:[%s2754_s29 + $0x488] sm:$0xff]  ;;  %v863_v54 = vld [vmem:[%s2754_s29 + $0x490] sm:$0xff] }
  0xbf   : > { %v1373_v51 = vadd.f32 %v861_v49, %v349_v48  ;;  %1883 = vst [vmem:[%s2769_s20 + $0x470] sm:$0xff] %v1371_v46  ;;  %1884 = vst [vmem:[%s2769_s20 + $0x478] sm:$0xff] %v1372_v47  ;;  %v1374_v55 = vadd.f32 %v862_v52, %v350_v50  ;;  %v1375_v56 = vadd.f32 %v863_v54, %v351_v53  ;;  %v352_v57 = vld [vmem:[%s2747_s19 + $0x498] sm:$0xff]  ;;  %v353_v59 = vld [vmem:[%s2747_s19 + $0x4a0] sm:$0xff] }
  0xc0   : > { %v864_v58 = vld [vmem:[%s2754_s29 + $0x498] sm:$0xff]  ;;  %v865_v61 = vld [vmem:[%s2754_s29 + $0x4a0] sm:$0xff]  ;;  %v354_v62 = vld [vmem:[%s2747_s19 + $0x4a8] sm:$0xff] }
  0xc1   : > { %1885 = vst [vmem:[%s2769_s20 + $0x480] sm:$0xff] %v1373_v51  ;;  %v1376_v60 = vadd.f32 %v864_v58, %v352_v57  ;;  %v866_v63 = vld [vmem:[%s2754_s29 + $0x4a8] sm:$0xff]  ;;  %1886 = vst [vmem:[%s2769_s20 + $0x488] sm:$0xff] %v1374_v55  ;;  %v1377_v0 = vadd.f32 %v865_v61, %v353_v59  ;;  %v355_v2 = vld [vmem:[%s2747_s19 + $0x4b0] sm:$0xff] }
  0xc2   : > { %1887 = vst [vmem:[%s2769_s20 + $0x490] sm:$0xff] %v1375_v56  ;;  %v1378_v1 = vadd.f32 %v866_v63, %v354_v62  ;;  %v867_v3 = vld [vmem:[%s2754_s29 + $0x4b0] sm:$0xff]  ;;  %v356_v4 = vld [vmem:[%s2747_s19 + $0x4b8] sm:$0xff]  ;;  %v357_v7 = vld [vmem:[%s2747_s19 + $0x4c0] sm:$0xff] }
  0xc3   : > { %1888 = vst [vmem:[%s2769_s20 + $0x498] sm:$0xff] %v1376_v60  ;;  %v1379_v5 = vadd.f32 %v867_v3, %v355_v2  ;;  %v868_v6 = vld [vmem:[%s2754_s29 + $0x4b8] sm:$0xff]  ;;  %v869_v8 = vld [vmem:[%s2754_s29 + $0x4c0] sm:$0xff]  ;;  %1889 = vst [vmem:[%s2769_s20 + $0x4a0] sm:$0xff] %v1377_v0 }
  0xc4   : > { %1890 = vst [vmem:[%s2769_s20 + $0x4a8] sm:$0xff] %v1378_v1  ;;  %v1380_v9 = vadd.f32 %v868_v6, %v356_v4  ;;  %v1381_v10 = vadd.f32 %v869_v8, %v357_v7  ;;  %v358_v11 = vld [vmem:[%s2747_s19 + $0x4c8] sm:$0xff]  ;;  %v359_v13 = vld [vmem:[%s2747_s19 + $0x4d0] sm:$0xff]  ;;  %v360_v16 = vld [vmem:[%s2747_s19 + $0x4d8] sm:$0xff] }
  0xc5   : > { %v870_v12 = vld [vmem:[%s2754_s29 + $0x4c8] sm:$0xff]  ;;  %1891 = vst [vmem:[%s2769_s20 + $0x4b0] sm:$0xff] %v1379_v5  ;;  %v871_v15 = vld [vmem:[%s2754_s29 + $0x4d0] sm:$0xff]  ;;  %v872_v17 = vld [vmem:[%s2754_s29 + $0x4d8] sm:$0xff] }
  0xc6   : > { %v1382_v14 = vadd.f32 %v870_v12, %v358_v11  ;;  %1892 = vst [vmem:[%s2769_s20 + $0x4b8] sm:$0xff] %v1380_v9  ;;  %1893 = vst [vmem:[%s2769_s20 + $0x4c0] sm:$0xff] %v1381_v10  ;;  %v1383_v18 = vadd.f32 %v871_v15, %v359_v13  ;;  %v1384_v19 = vadd.f32 %v872_v17, %v360_v16  ;;  %v361_v20 = vld [vmem:[%s2747_s19 + $0x4e0] sm:$0xff]  ;;  %v362_v22 = vld [vmem:[%s2747_s19 + $0x4e8] sm:$0xff] }
  0xc7   : > { %v873_v21 = vld [vmem:[%s2754_s29 + $0x4e0] sm:$0xff]  ;;  %v874_v24 = vld [vmem:[%s2754_s29 + $0x4e8] sm:$0xff]  ;;  %v363_v25 = vld [vmem:[%s2747_s19 + $0x4f0] sm:$0xff] }
  0xc8   : > { %1894 = vst [vmem:[%s2769_s20 + $0x4c8] sm:$0xff] %v1382_v14  ;;  %v1385_v23 = vadd.f32 %v873_v21, %v361_v20  ;;  %v875_v26 = vld [vmem:[%s2754_s29 + $0x4f0] sm:$0xff]  ;;  %1895 = vst [vmem:[%s2769_s20 + $0x4d0] sm:$0xff] %v1383_v18  ;;  %v1386_v27 = vadd.f32 %v874_v24, %v362_v22  ;;  %v364_v29 = vld [vmem:[%s2747_s19 + $0x4f8] sm:$0xff] }
  0xc9   : > { %1896 = vst [vmem:[%s2769_s20 + $0x4d8] sm:$0xff] %v1384_v19  ;;  %v1387_v28 = vadd.f32 %v875_v26, %v363_v25  ;;  %v876_v30 = vld [vmem:[%s2754_s29 + $0x4f8] sm:$0xff]  ;;  %v365_v31 = vld [vmem:[%s2747_s19 + $0x500] sm:$0xff]  ;;  %v366_v34 = vld [vmem:[%s2747_s19 + $0x508] sm:$0xff] }
  0xca   : > { %1897 = vst [vmem:[%s2769_s20 + $0x4e0] sm:$0xff] %v1385_v23  ;;  %v1388_v32 = vadd.f32 %v876_v30, %v364_v29  ;;  %v877_v33 = vld [vmem:[%s2754_s29 + $0x500] sm:$0xff]  ;;  %v878_v35 = vld [vmem:[%s2754_s29 + $0x508] sm:$0xff]  ;;  %1898 = vst [vmem:[%s2769_s20 + $0x4e8] sm:$0xff] %v1386_v27 }
  0xcb   : > { %1899 = vst [vmem:[%s2769_s20 + $0x4f0] sm:$0xff] %v1387_v28  ;;  %v1389_v36 = vadd.f32 %v877_v33, %v365_v31  ;;  %v1390_v37 = vadd.f32 %v878_v35, %v366_v34  ;;  %v367_v38 = vld [vmem:[%s2747_s19 + $0x510] sm:$0xff]  ;;  %v368_v40 = vld [vmem:[%s2747_s19 + $0x518] sm:$0xff]  ;;  %v369_v43 = vld [vmem:[%s2747_s19 + $0x520] sm:$0xff] }
  0xcc   : > { %v879_v39 = vld [vmem:[%s2754_s29 + $0x510] sm:$0xff]  ;;  %1900 = vst [vmem:[%s2769_s20 + $0x4f8] sm:$0xff] %v1388_v32  ;;  %v880_v42 = vld [vmem:[%s2754_s29 + $0x518] sm:$0xff]  ;;  %v881_v44 = vld [vmem:[%s2754_s29 + $0x520] sm:$0xff] }
  0xcd   : > { %v1391_v41 = vadd.f32 %v879_v39, %v367_v38  ;;  %1901 = vst [vmem:[%s2769_s20 + $0x500] sm:$0xff] %v1389_v36  ;;  %1902 = vst [vmem:[%s2769_s20 + $0x508] sm:$0xff] %v1390_v37  ;;  %v1392_v45 = vadd.f32 %v880_v42, %v368_v40  ;;  %v1393_v46 = vadd.f32 %v881_v44, %v369_v43  ;;  %v370_v47 = vld [vmem:[%s2747_s19 + $0x528] sm:$0xff]  ;;  %v371_v49 = vld [vmem:[%s2747_s19 + $0x530] sm:$0xff] }
  0xce   : > { %v882_v48 = vld [vmem:[%s2754_s29 + $0x528] sm:$0xff]  ;;  %v883_v51 = vld [vmem:[%s2754_s29 + $0x530] sm:$0xff]  ;;  %v372_v52 = vld [vmem:[%s2747_s19 + $0x538] sm:$0xff] }
  0xcf   : > { %1903 = vst [vmem:[%s2769_s20 + $0x510] sm:$0xff] %v1391_v41  ;;  %v1394_v50 = vadd.f32 %v882_v48, %v370_v47  ;;  %v884_v53 = vld [vmem:[%s2754_s29 + $0x538] sm:$0xff]  ;;  %1904 = vst [vmem:[%s2769_s20 + $0x518] sm:$0xff] %v1392_v45  ;;  %v1395_v54 = vadd.f32 %v883_v51, %v371_v49  ;;  %v373_v56 = vld [vmem:[%s2747_s19 + $0x540] sm:$0xff] }
  0xd0   : > { %1905 = vst [vmem:[%s2769_s20 + $0x520] sm:$0xff] %v1393_v46  ;;  %v1396_v55 = vadd.f32 %v884_v53, %v372_v52  ;;  %v885_v57 = vld [vmem:[%s2754_s29 + $0x540] sm:$0xff]  ;;  %v374_v58 = vld [vmem:[%s2747_s19 + $0x548] sm:$0xff]  ;;  %v375_v61 = vld [vmem:[%s2747_s19 + $0x550] sm:$0xff] }
  0xd1   : > { %1906 = vst [vmem:[%s2769_s20 + $0x528] sm:$0xff] %v1394_v50  ;;  %v1397_v59 = vadd.f32 %v885_v57, %v373_v56  ;;  %v886_v60 = vld [vmem:[%s2754_s29 + $0x548] sm:$0xff]  ;;  %v887_v62 = vld [vmem:[%s2754_s29 + $0x550] sm:$0xff]  ;;  %1907 = vst [vmem:[%s2769_s20 + $0x530] sm:$0xff] %v1395_v54 }
  0xd2   : > { %1908 = vst [vmem:[%s2769_s20 + $0x538] sm:$0xff] %v1396_v55  ;;  %v1398_v63 = vadd.f32 %v886_v60, %v374_v58  ;;  %v1399_v0 = vadd.f32 %v887_v62, %v375_v61  ;;  %v376_v1 = vld [vmem:[%s2747_s19 + $0x558] sm:$0xff]  ;;  %v377_v3 = vld [vmem:[%s2747_s19 + $0x560] sm:$0xff]  ;;  %v378_v6 = vld [vmem:[%s2747_s19 + $0x568] sm:$0xff] }
  0xd3   : > { %v888_v2 = vld [vmem:[%s2754_s29 + $0x558] sm:$0xff]  ;;  %1909 = vst [vmem:[%s2769_s20 + $0x540] sm:$0xff] %v1397_v59  ;;  %v889_v5 = vld [vmem:[%s2754_s29 + $0x560] sm:$0xff]  ;;  %v890_v7 = vld [vmem:[%s2754_s29 + $0x568] sm:$0xff] }
  0xd4   : > { %v1400_v4 = vadd.f32 %v888_v2, %v376_v1  ;;  %1910 = vst [vmem:[%s2769_s20 + $0x548] sm:$0xff] %v1398_v63  ;;  %1911 = vst [vmem:[%s2769_s20 + $0x550] sm:$0xff] %v1399_v0  ;;  %v1401_v8 = vadd.f32 %v889_v5, %v377_v3  ;;  %v1402_v9 = vadd.f32 %v890_v7, %v378_v6  ;;  %v379_v10 = vld [vmem:[%s2747_s19 + $0x570] sm:$0xff]  ;;  %v380_v12 = vld [vmem:[%s2747_s19 + $0x578] sm:$0xff] }
  0xd5   : > { %v891_v11 = vld [vmem:[%s2754_s29 + $0x570] sm:$0xff]  ;;  %v892_v14 = vld [vmem:[%s2754_s29 + $0x578] sm:$0xff]  ;;  %v381_v15 = vld [vmem:[%s2747_s19 + $0x580] sm:$0xff] }
  0xd6   : > { %1912 = vst [vmem:[%s2769_s20 + $0x558] sm:$0xff] %v1400_v4  ;;  %v1403_v13 = vadd.f32 %v891_v11, %v379_v10  ;;  %v893_v16 = vld [vmem:[%s2754_s29 + $0x580] sm:$0xff]  ;;  %1913 = vst [vmem:[%s2769_s20 + $0x560] sm:$0xff] %v1401_v8  ;;  %v1404_v17 = vadd.f32 %v892_v14, %v380_v12  ;;  %v382_v19 = vld [vmem:[%s2747_s19 + $0x588] sm:$0xff] }
  0xd7   : > { %1914 = vst [vmem:[%s2769_s20 + $0x568] sm:$0xff] %v1402_v9  ;;  %v1405_v18 = vadd.f32 %v893_v16, %v381_v15  ;;  %v894_v20 = vld [vmem:[%s2754_s29 + $0x588] sm:$0xff]  ;;  %v383_v21 = vld [vmem:[%s2747_s19 + $0x590] sm:$0xff]  ;;  %v384_v24 = vld [vmem:[%s2747_s19 + $0x598] sm:$0xff] }
  0xd8   : > { %1915 = vst [vmem:[%s2769_s20 + $0x570] sm:$0xff] %v1403_v13  ;;  %v1406_v22 = vadd.f32 %v894_v20, %v382_v19  ;;  %v895_v23 = vld [vmem:[%s2754_s29 + $0x590] sm:$0xff]  ;;  %v896_v25 = vld [vmem:[%s2754_s29 + $0x598] sm:$0xff]  ;;  %1916 = vst [vmem:[%s2769_s20 + $0x578] sm:$0xff] %v1404_v17 }
  0xd9   : > { %1917 = vst [vmem:[%s2769_s20 + $0x580] sm:$0xff] %v1405_v18  ;;  %v1407_v26 = vadd.f32 %v895_v23, %v383_v21  ;;  %v1408_v27 = vadd.f32 %v896_v25, %v384_v24  ;;  %v385_v28 = vld [vmem:[%s2747_s19 + $0x5a0] sm:$0xff]  ;;  %v386_v30 = vld [vmem:[%s2747_s19 + $0x5a8] sm:$0xff]  ;;  %v387_v33 = vld [vmem:[%s2747_s19 + $0x5b0] sm:$0xff] }
  0xda   : > { %v897_v29 = vld [vmem:[%s2754_s29 + $0x5a0] sm:$0xff]  ;;  %1918 = vst [vmem:[%s2769_s20 + $0x588] sm:$0xff] %v1406_v22  ;;  %v898_v32 = vld [vmem:[%s2754_s29 + $0x5a8] sm:$0xff]  ;;  %v899_v34 = vld [vmem:[%s2754_s29 + $0x5b0] sm:$0xff] }
  0xdb   : > { %v1409_v31 = vadd.f32 %v897_v29, %v385_v28  ;;  %1919 = vst [vmem:[%s2769_s20 + $0x590] sm:$0xff] %v1407_v26  ;;  %1920 = vst [vmem:[%s2769_s20 + $0x598] sm:$0xff] %v1408_v27  ;;  %v1410_v35 = vadd.f32 %v898_v32, %v386_v30  ;;  %v1411_v36 = vadd.f32 %v899_v34, %v387_v33  ;;  %v388_v37 = vld [vmem:[%s2747_s19 + $0x5b8] sm:$0xff]  ;;  %v389_v39 = vld [vmem:[%s2747_s19 + $0x5c0] sm:$0xff] }
  0xdc   : > { %v900_v38 = vld [vmem:[%s2754_s29 + $0x5b8] sm:$0xff]  ;;  %v901_v41 = vld [vmem:[%s2754_s29 + $0x5c0] sm:$0xff]  ;;  %v390_v42 = vld [vmem:[%s2747_s19 + $0x5c8] sm:$0xff] }
  0xdd   : > { %1921 = vst [vmem:[%s2769_s20 + $0x5a0] sm:$0xff] %v1409_v31  ;;  %v1412_v40 = vadd.f32 %v900_v38, %v388_v37  ;;  %v902_v43 = vld [vmem:[%s2754_s29 + $0x5c8] sm:$0xff]  ;;  %1922 = vst [vmem:[%s2769_s20 + $0x5a8] sm:$0xff] %v1410_v35  ;;  %v1413_v44 = vadd.f32 %v901_v41, %v389_v39  ;;  %v391_v46 = vld [vmem:[%s2747_s19 + $0x5d0] sm:$0xff] }
  0xde   : > { %1923 = vst [vmem:[%s2769_s20 + $0x5b0] sm:$0xff] %v1411_v36  ;;  %v1414_v45 = vadd.f32 %v902_v43, %v390_v42  ;;  %v903_v47 = vld [vmem:[%s2754_s29 + $0x5d0] sm:$0xff]  ;;  %v392_v48 = vld [vmem:[%s2747_s19 + $0x5d8] sm:$0xff]  ;;  %v393_v51 = vld [vmem:[%s2747_s19 + $0x5e0] sm:$0xff] }
  0xdf   : > { %1924 = vst [vmem:[%s2769_s20 + $0x5b8] sm:$0xff] %v1412_v40  ;;  %v1415_v49 = vadd.f32 %v903_v47, %v391_v46  ;;  %v904_v50 = vld [vmem:[%s2754_s29 + $0x5d8] sm:$0xff]  ;;  %v905_v52 = vld [vmem:[%s2754_s29 + $0x5e0] sm:$0xff]  ;;  %1925 = vst [vmem:[%s2769_s20 + $0x5c0] sm:$0xff] %v1413_v44 }
  0xe0   : > { %1926 = vst [vmem:[%s2769_s20 + $0x5c8] sm:$0xff] %v1414_v45  ;;  %v1416_v53 = vadd.f32 %v904_v50, %v392_v48  ;;  %v1417_v54 = vadd.f32 %v905_v52, %v393_v51  ;;  %v394_v55 = vld [vmem:[%s2747_s19 + $0x5e8] sm:$0xff]  ;;  %v395_v57 = vld [vmem:[%s2747_s19 + $0x5f0] sm:$0xff]  ;;  %v396_v60 = vld [vmem:[%s2747_s19 + $0x5f8] sm:$0xff] }
  0xe1   : > { %v906_v56 = vld [vmem:[%s2754_s29 + $0x5e8] sm:$0xff]  ;;  %1927 = vst [vmem:[%s2769_s20 + $0x5d0] sm:$0xff] %v1415_v49  ;;  %v907_v59 = vld [vmem:[%s2754_s29 + $0x5f0] sm:$0xff]  ;;  %v908_v61 = vld [vmem:[%s2754_s29 + $0x5f8] sm:$0xff] }
  0xe2   : > { %v1418_v58 = vadd.f32 %v906_v56, %v394_v55  ;;  %1928 = vst [vmem:[%s2769_s20 + $0x5d8] sm:$0xff] %v1416_v53  ;;  %1929 = vst [vmem:[%s2769_s20 + $0x5e0] sm:$0xff] %v1417_v54  ;;  %v1419_v62 = vadd.f32 %v907_v59, %v395_v57  ;;  %v1420_v63 = vadd.f32 %v908_v61, %v396_v60  ;;  %v397_v0 = vld [vmem:[%s2747_s19 + $0x600] sm:$0xff]  ;;  %v398_v2 = vld [vmem:[%s2747_s19 + $0x608] sm:$0xff] }
  0xe3   : > { %v909_v1 = vld [vmem:[%s2754_s29 + $0x600] sm:$0xff]  ;;  %v910_v4 = vld [vmem:[%s2754_s29 + $0x608] sm:$0xff]  ;;  %v399_v5 = vld [vmem:[%s2747_s19 + $0x610] sm:$0xff] }
  0xe4   : > { %1930 = vst [vmem:[%s2769_s20 + $0x5e8] sm:$0xff] %v1418_v58  ;;  %v1421_v3 = vadd.f32 %v909_v1, %v397_v0  ;;  %v911_v6 = vld [vmem:[%s2754_s29 + $0x610] sm:$0xff]  ;;  %1931 = vst [vmem:[%s2769_s20 + $0x5f0] sm:$0xff] %v1419_v62  ;;  %v1422_v7 = vadd.f32 %v910_v4, %v398_v2  ;;  %v400_v9 = vld [vmem:[%s2747_s19 + $0x618] sm:$0xff] }
  0xe5   : > { %1932 = vst [vmem:[%s2769_s20 + $0x5f8] sm:$0xff] %v1420_v63  ;;  %v1423_v8 = vadd.f32 %v911_v6, %v399_v5  ;;  %v912_v10 = vld [vmem:[%s2754_s29 + $0x618] sm:$0xff]  ;;  %v401_v11 = vld [vmem:[%s2747_s19 + $0x620] sm:$0xff]  ;;  %v402_v14 = vld [vmem:[%s2747_s19 + $0x628] sm:$0xff] }
  0xe6   : > { %1933 = vst [vmem:[%s2769_s20 + $0x600] sm:$0xff] %v1421_v3  ;;  %v1424_v12 = vadd.f32 %v912_v10, %v400_v9  ;;  %v913_v13 = vld [vmem:[%s2754_s29 + $0x620] sm:$0xff]  ;;  %v914_v15 = vld [vmem:[%s2754_s29 + $0x628] sm:$0xff]  ;;  %1934 = vst [vmem:[%s2769_s20 + $0x608] sm:$0xff] %v1422_v7 }
  0xe7   : > { %1935 = vst [vmem:[%s2769_s20 + $0x610] sm:$0xff] %v1423_v8  ;;  %v1425_v16 = vadd.f32 %v913_v13, %v401_v11  ;;  %v1426_v17 = vadd.f32 %v914_v15, %v402_v14  ;;  %v403_v18 = vld [vmem:[%s2747_s19 + $0x630] sm:$0xff]  ;;  %v404_v20 = vld [vmem:[%s2747_s19 + $0x638] sm:$0xff]  ;;  %v405_v23 = vld [vmem:[%s2747_s19 + $0x640] sm:$0xff] }
  0xe8   : > { %v915_v19 = vld [vmem:[%s2754_s29 + $0x630] sm:$0xff]  ;;  %1936 = vst [vmem:[%s2769_s20 + $0x618] sm:$0xff] %v1424_v12  ;;  %v916_v22 = vld [vmem:[%s2754_s29 + $0x638] sm:$0xff]  ;;  %v917_v24 = vld [vmem:[%s2754_s29 + $0x640] sm:$0xff] }
  0xe9   : > { %v1427_v21 = vadd.f32 %v915_v19, %v403_v18  ;;  %1937 = vst [vmem:[%s2769_s20 + $0x620] sm:$0xff] %v1425_v16  ;;  %1938 = vst [vmem:[%s2769_s20 + $0x628] sm:$0xff] %v1426_v17  ;;  %v1428_v25 = vadd.f32 %v916_v22, %v404_v20  ;;  %v1429_v26 = vadd.f32 %v917_v24, %v405_v23  ;;  %v406_v27 = vld [vmem:[%s2747_s19 + $0x648] sm:$0xff]  ;;  %v407_v29 = vld [vmem:[%s2747_s19 + $0x650] sm:$0xff] }
  0xea   : > { %v918_v28 = vld [vmem:[%s2754_s29 + $0x648] sm:$0xff]  ;;  %v919_v31 = vld [vmem:[%s2754_s29 + $0x650] sm:$0xff]  ;;  %v408_v32 = vld [vmem:[%s2747_s19 + $0x658] sm:$0xff] }
  0xeb   : > { %1939 = vst [vmem:[%s2769_s20 + $0x630] sm:$0xff] %v1427_v21  ;;  %v1430_v30 = vadd.f32 %v918_v28, %v406_v27  ;;  %v920_v33 = vld [vmem:[%s2754_s29 + $0x658] sm:$0xff]  ;;  %1940 = vst [vmem:[%s2769_s20 + $0x638] sm:$0xff] %v1428_v25  ;;  %v1431_v34 = vadd.f32 %v919_v31, %v407_v29  ;;  %v409_v36 = vld [vmem:[%s2747_s19 + $0x660] sm:$0xff] }
  0xec   : > { %1941 = vst [vmem:[%s2769_s20 + $0x640] sm:$0xff] %v1429_v26  ;;  %v1432_v35 = vadd.f32 %v920_v33, %v408_v32  ;;  %v921_v37 = vld [vmem:[%s2754_s29 + $0x660] sm:$0xff]  ;;  %v410_v38 = vld [vmem:[%s2747_s19 + $0x668] sm:$0xff]  ;;  %v411_v41 = vld [vmem:[%s2747_s19 + $0x670] sm:$0xff] }
  0xed   : > { %1942 = vst [vmem:[%s2769_s20 + $0x648] sm:$0xff] %v1430_v30  ;;  %v1433_v39 = vadd.f32 %v921_v37, %v409_v36  ;;  %v922_v40 = vld [vmem:[%s2754_s29 + $0x668] sm:$0xff]  ;;  %v923_v42 = vld [vmem:[%s2754_s29 + $0x670] sm:$0xff]  ;;  %1943 = vst [vmem:[%s2769_s20 + $0x650] sm:$0xff] %v1431_v34 }
  0xee   : > { %1944 = vst [vmem:[%s2769_s20 + $0x658] sm:$0xff] %v1432_v35  ;;  %v1434_v43 = vadd.f32 %v922_v40, %v410_v38  ;;  %v1435_v44 = vadd.f32 %v923_v42, %v411_v41  ;;  %v412_v45 = vld [vmem:[%s2747_s19 + $0x678] sm:$0xff]  ;;  %v413_v47 = vld [vmem:[%s2747_s19 + $0x680] sm:$0xff]  ;;  %v414_v50 = vld [vmem:[%s2747_s19 + $0x688] sm:$0xff] }
  0xef   : > { %v924_v46 = vld [vmem:[%s2754_s29 + $0x678] sm:$0xff]  ;;  %1945 = vst [vmem:[%s2769_s20 + $0x660] sm:$0xff] %v1433_v39  ;;  %v925_v49 = vld [vmem:[%s2754_s29 + $0x680] sm:$0xff]  ;;  %v926_v51 = vld [vmem:[%s2754_s29 + $0x688] sm:$0xff] }
  0xf0   : > { %v1436_v48 = vadd.f32 %v924_v46, %v412_v45  ;;  %1946 = vst [vmem:[%s2769_s20 + $0x668] sm:$0xff] %v1434_v43  ;;  %1947 = vst [vmem:[%s2769_s20 + $0x670] sm:$0xff] %v1435_v44  ;;  %v1437_v52 = vadd.f32 %v925_v49, %v413_v47  ;;  %v1438_v53 = vadd.f32 %v926_v51, %v414_v50  ;;  %v415_v54 = vld [vmem:[%s2747_s19 + $0x690] sm:$0xff]  ;;  %v416_v56 = vld [vmem:[%s2747_s19 + $0x698] sm:$0xff] }
  0xf1   : > { %v927_v55 = vld [vmem:[%s2754_s29 + $0x690] sm:$0xff]  ;;  %v928_v58 = vld [vmem:[%s2754_s29 + $0x698] sm:$0xff]  ;;  %v417_v59 = vld [vmem:[%s2747_s19 + $0x6a0] sm:$0xff] }
  0xf2   : > { %1948 = vst [vmem:[%s2769_s20 + $0x678] sm:$0xff] %v1436_v48  ;;  %v1439_v57 = vadd.f32 %v927_v55, %v415_v54  ;;  %v929_v60 = vld [vmem:[%s2754_s29 + $0x6a0] sm:$0xff]  ;;  %1949 = vst [vmem:[%s2769_s20 + $0x680] sm:$0xff] %v1437_v52  ;;  %v1440_v61 = vadd.f32 %v928_v58, %v416_v56  ;;  %v418_v63 = vld [vmem:[%s2747_s19 + $0x6a8] sm:$0xff] }
  0xf3   : > { %1950 = vst [vmem:[%s2769_s20 + $0x688] sm:$0xff] %v1438_v53  ;;  %v1441_v62 = vadd.f32 %v929_v60, %v417_v59  ;;  %v930_v0 = vld [vmem:[%s2754_s29 + $0x6a8] sm:$0xff]  ;;  %v419_v1 = vld [vmem:[%s2747_s19 + $0x6b0] sm:$0xff]  ;;  %v420_v4 = vld [vmem:[%s2747_s19 + $0x6b8] sm:$0xff] }
  0xf4   : > { %1951 = vst [vmem:[%s2769_s20 + $0x690] sm:$0xff] %v1439_v57  ;;  %v1442_v2 = vadd.f32 %v930_v0, %v418_v63  ;;  %v931_v3 = vld [vmem:[%s2754_s29 + $0x6b0] sm:$0xff]  ;;  %v932_v5 = vld [vmem:[%s2754_s29 + $0x6b8] sm:$0xff]  ;;  %1952 = vst [vmem:[%s2769_s20 + $0x698] sm:$0xff] %v1440_v61 }
  0xf5   : > { %1953 = vst [vmem:[%s2769_s20 + $0x6a0] sm:$0xff] %v1441_v62  ;;  %v1443_v6 = vadd.f32 %v931_v3, %v419_v1  ;;  %v1444_v7 = vadd.f32 %v932_v5, %v420_v4  ;;  %v421_v8 = vld [vmem:[%s2747_s19 + $0x6c0] sm:$0xff]  ;;  %v422_v10 = vld [vmem:[%s2747_s19 + $0x6c8] sm:$0xff]  ;;  %v423_v13 = vld [vmem:[%s2747_s19 + $0x6d0] sm:$0xff] }
  0xf6   : > { %v933_v9 = vld [vmem:[%s2754_s29 + $0x6c0] sm:$0xff]  ;;  %1954 = vst [vmem:[%s2769_s20 + $0x6a8] sm:$0xff] %v1442_v2  ;;  %v934_v12 = vld [vmem:[%s2754_s29 + $0x6c8] sm:$0xff]  ;;  %v935_v14 = vld [vmem:[%s2754_s29 + $0x6d0] sm:$0xff] }
  0xf7   : > { %v1445_v11 = vadd.f32 %v933_v9, %v421_v8  ;;  %1955 = vst [vmem:[%s2769_s20 + $0x6b0] sm:$0xff] %v1443_v6  ;;  %1956 = vst [vmem:[%s2769_s20 + $0x6b8] sm:$0xff] %v1444_v7  ;;  %v1446_v15 = vadd.f32 %v934_v12, %v422_v10  ;;  %v1447_v16 = vadd.f32 %v935_v14, %v423_v13  ;;  %v424_v17 = vld [vmem:[%s2747_s19 + $0x6d8] sm:$0xff]  ;;  %v425_v19 = vld [vmem:[%s2747_s19 + $0x6e0] sm:$0xff] }
  0xf8   : > { %v936_v18 = vld [vmem:[%s2754_s29 + $0x6d8] sm:$0xff]  ;;  %v937_v21 = vld [vmem:[%s2754_s29 + $0x6e0] sm:$0xff]  ;;  %v426_v22 = vld [vmem:[%s2747_s19 + $0x6e8] sm:$0xff] }
  0xf9   : > { %1957 = vst [vmem:[%s2769_s20 + $0x6c0] sm:$0xff] %v1445_v11  ;;  %v1448_v20 = vadd.f32 %v936_v18, %v424_v17  ;;  %v938_v23 = vld [vmem:[%s2754_s29 + $0x6e8] sm:$0xff]  ;;  %1958 = vst [vmem:[%s2769_s20 + $0x6c8] sm:$0xff] %v1446_v15  ;;  %v1449_v24 = vadd.f32 %v937_v21, %v425_v19  ;;  %v427_v26 = vld [vmem:[%s2747_s19 + $0x6f0] sm:$0xff] }
  0xfa   : > { %1959 = vst [vmem:[%s2769_s20 + $0x6d0] sm:$0xff] %v1447_v16  ;;  %v1450_v25 = vadd.f32 %v938_v23, %v426_v22  ;;  %v939_v27 = vld [vmem:[%s2754_s29 + $0x6f0] sm:$0xff]  ;;  %v428_v28 = vld [vmem:[%s2747_s19 + $0x6f8] sm:$0xff]  ;;  %v429_v31 = vld [vmem:[%s2747_s19 + $0x700] sm:$0xff] }
  0xfb   : > { %1960 = vst [vmem:[%s2769_s20 + $0x6d8] sm:$0xff] %v1448_v20  ;;  %v1451_v29 = vadd.f32 %v939_v27, %v427_v26  ;;  %v940_v30 = vld [vmem:[%s2754_s29 + $0x6f8] sm:$0xff]  ;;  %v941_v32 = vld [vmem:[%s2754_s29 + $0x700] sm:$0xff]  ;;  %1961 = vst [vmem:[%s2769_s20 + $0x6e0] sm:$0xff] %v1449_v24 }
  0xfc   : > { %1962 = vst [vmem:[%s2769_s20 + $0x6e8] sm:$0xff] %v1450_v25  ;;  %v1452_v33 = vadd.f32 %v940_v30, %v428_v28  ;;  %v1453_v34 = vadd.f32 %v941_v32, %v429_v31  ;;  %v430_v35 = vld [vmem:[%s2747_s19 + $0x708] sm:$0xff]  ;;  %v431_v37 = vld [vmem:[%s2747_s19 + $0x710] sm:$0xff]  ;;  %v432_v40 = vld [vmem:[%s2747_s19 + $0x718] sm:$0xff] }
  0xfd   : > { %v942_v36 = vld [vmem:[%s2754_s29 + $0x708] sm:$0xff]  ;;  %1963 = vst [vmem:[%s2769_s20 + $0x6f0] sm:$0xff] %v1451_v29  ;;  %v943_v39 = vld [vmem:[%s2754_s29 + $0x710] sm:$0xff]  ;;  %v944_v41 = vld [vmem:[%s2754_s29 + $0x718] sm:$0xff] }
  0xfe   : > { %v1454_v38 = vadd.f32 %v942_v36, %v430_v35  ;;  %1964 = vst [vmem:[%s2769_s20 + $0x6f8] sm:$0xff] %v1452_v33  ;;  %1965 = vst [vmem:[%s2769_s20 + $0x700] sm:$0xff] %v1453_v34  ;;  %v1455_v42 = vadd.f32 %v943_v39, %v431_v37  ;;  %v1456_v43 = vadd.f32 %v944_v41, %v432_v40  ;;  %v433_v44 = vld [vmem:[%s2747_s19 + $0x720] sm:$0xff]  ;;  %v434_v46 = vld [vmem:[%s2747_s19 + $0x728] sm:$0xff] }
  0xff   : > { %v945_v45 = vld [vmem:[%s2754_s29 + $0x720] sm:$0xff]  ;;  %v946_v48 = vld [vmem:[%s2754_s29 + $0x728] sm:$0xff]  ;;  %v435_v49 = vld [vmem:[%s2747_s19 + $0x730] sm:$0xff] }
 0x100   : > { %1966 = vst [vmem:[%s2769_s20 + $0x708] sm:$0xff] %v1454_v38  ;;  %v1457_v47 = vadd.f32 %v945_v45, %v433_v44  ;;  %v947_v50 = vld [vmem:[%s2754_s29 + $0x730] sm:$0xff]  ;;  %1967 = vst [vmem:[%s2769_s20 + $0x710] sm:$0xff] %v1455_v42  ;;  %v1458_v51 = vadd.f32 %v946_v48, %v434_v46  ;;  %v436_v53 = vld [vmem:[%s2747_s19 + $0x738] sm:$0xff] }
 0x101   : > { %1968 = vst [vmem:[%s2769_s20 + $0x718] sm:$0xff] %v1456_v43  ;;  %v1459_v52 = vadd.f32 %v947_v50, %v435_v49  ;;  %v948_v54 = vld [vmem:[%s2754_s29 + $0x738] sm:$0xff]  ;;  %v437_v55 = vld [vmem:[%s2747_s19 + $0x740] sm:$0xff]  ;;  %v438_v58 = vld [vmem:[%s2747_s19 + $0x748] sm:$0xff] }
 0x102   : > { %1969 = vst [vmem:[%s2769_s20 + $0x720] sm:$0xff] %v1457_v47  ;;  %v1460_v56 = vadd.f32 %v948_v54, %v436_v53  ;;  %v949_v57 = vld [vmem:[%s2754_s29 + $0x740] sm:$0xff]  ;;  %v950_v59 = vld [vmem:[%s2754_s29 + $0x748] sm:$0xff]  ;;  %1970 = vst [vmem:[%s2769_s20 + $0x728] sm:$0xff] %v1458_v51 }
 0x103   : > { %1971 = vst [vmem:[%s2769_s20 + $0x730] sm:$0xff] %v1459_v52  ;;  %v1461_v60 = vadd.f32 %v949_v57, %v437_v55  ;;  %v1462_v61 = vadd.f32 %v950_v59, %v438_v58  ;;  %v439_v62 = vld [vmem:[%s2747_s19 + $0x750] sm:$0xff]  ;;  %v440_v0 = vld [vmem:[%s2747_s19 + $0x758] sm:$0xff]  ;;  %v441_v3 = vld [vmem:[%s2747_s19 + $0x760] sm:$0xff] }
 0x104   : > { %v951_v63 = vld [vmem:[%s2754_s29 + $0x750] sm:$0xff]  ;;  %1972 = vst [vmem:[%s2769_s20 + $0x738] sm:$0xff] %v1460_v56  ;;  %v952_v2 = vld [vmem:[%s2754_s29 + $0x758] sm:$0xff]  ;;  %v953_v4 = vld [vmem:[%s2754_s29 + $0x760] sm:$0xff] }
 0x105   : > { %v1463_v1 = vadd.f32 %v951_v63, %v439_v62  ;;  %1973 = vst [vmem:[%s2769_s20 + $0x740] sm:$0xff] %v1461_v60  ;;  %1974 = vst [vmem:[%s2769_s20 + $0x748] sm:$0xff] %v1462_v61  ;;  %v1464_v5 = vadd.f32 %v952_v2, %v440_v0  ;;  %v1465_v6 = vadd.f32 %v953_v4, %v441_v3  ;;  %v442_v7 = vld [vmem:[%s2747_s19 + $0x768] sm:$0xff]  ;;  %v443_v9 = vld [vmem:[%s2747_s19 + $0x770] sm:$0xff] }
 0x106   : > { %v954_v8 = vld [vmem:[%s2754_s29 + $0x768] sm:$0xff]  ;;  %v955_v11 = vld [vmem:[%s2754_s29 + $0x770] sm:$0xff]  ;;  %v444_v12 = vld [vmem:[%s2747_s19 + $0x778] sm:$0xff] }
 0x107   : > { %1975 = vst [vmem:[%s2769_s20 + $0x750] sm:$0xff] %v1463_v1  ;;  %v1466_v10 = vadd.f32 %v954_v8, %v442_v7  ;;  %v956_v13 = vld [vmem:[%s2754_s29 + $0x778] sm:$0xff]  ;;  %1976 = vst [vmem:[%s2769_s20 + $0x758] sm:$0xff] %v1464_v5  ;;  %v1467_v14 = vadd.f32 %v955_v11, %v443_v9  ;;  %v445_v16 = vld [vmem:[%s2747_s19 + $0x780] sm:$0xff] }
 0x108   : > { %1977 = vst [vmem:[%s2769_s20 + $0x760] sm:$0xff] %v1465_v6  ;;  %v1468_v15 = vadd.f32 %v956_v13, %v444_v12  ;;  %v957_v17 = vld [vmem:[%s2754_s29 + $0x780] sm:$0xff]  ;;  %v446_v18 = vld [vmem:[%s2747_s19 + $0x788] sm:$0xff]  ;;  %v447_v21 = vld [vmem:[%s2747_s19 + $0x790] sm:$0xff] }
 0x109   : > { %1978 = vst [vmem:[%s2769_s20 + $0x768] sm:$0xff] %v1466_v10  ;;  %v1469_v19 = vadd.f32 %v957_v17, %v445_v16  ;;  %v958_v20 = vld [vmem:[%s2754_s29 + $0x788] sm:$0xff]  ;;  %v959_v22 = vld [vmem:[%s2754_s29 + $0x790] sm:$0xff]  ;;  %1979 = vst [vmem:[%s2769_s20 + $0x770] sm:$0xff] %v1467_v14 }
 0x10a   : > { %1980 = vst [vmem:[%s2769_s20 + $0x778] sm:$0xff] %v1468_v15  ;;  %v1470_v23 = vadd.f32 %v958_v20, %v446_v18  ;;  %v1471_v24 = vadd.f32 %v959_v22, %v447_v21  ;;  %v448_v25 = vld [vmem:[%s2747_s19 + $0x798] sm:$0xff]  ;;  %v449_v27 = vld [vmem:[%s2747_s19 + $0x7a0] sm:$0xff]  ;;  %v450_v30 = vld [vmem:[%s2747_s19 + $0x7a8] sm:$0xff] }
 0x10b   : > { %v960_v26 = vld [vmem:[%s2754_s29 + $0x798] sm:$0xff]  ;;  %1981 = vst [vmem:[%s2769_s20 + $0x780] sm:$0xff] %v1469_v19  ;;  %v961_v29 = vld [vmem:[%s2754_s29 + $0x7a0] sm:$0xff]  ;;  %v962_v31 = vld [vmem:[%s2754_s29 + $0x7a8] sm:$0xff] }
 0x10c   : > { %v1472_v28 = vadd.f32 %v960_v26, %v448_v25  ;;  %1982 = vst [vmem:[%s2769_s20 + $0x788] sm:$0xff] %v1470_v23  ;;  %1983 = vst [vmem:[%s2769_s20 + $0x790] sm:$0xff] %v1471_v24  ;;  %v1473_v32 = vadd.f32 %v961_v29, %v449_v27  ;;  %v1474_v33 = vadd.f32 %v962_v31, %v450_v30  ;;  %v451_v34 = vld [vmem:[%s2747_s19 + $0x7b0] sm:$0xff]  ;;  %v452_v36 = vld [vmem:[%s2747_s19 + $0x7b8] sm:$0xff] }
 0x10d   : > { %v963_v35 = vld [vmem:[%s2754_s29 + $0x7b0] sm:$0xff]  ;;  %v964_v38 = vld [vmem:[%s2754_s29 + $0x7b8] sm:$0xff]  ;;  %v453_v39 = vld [vmem:[%s2747_s19 + $0x7c0] sm:$0xff] }
 0x10e   : > { %1984 = vst [vmem:[%s2769_s20 + $0x798] sm:$0xff] %v1472_v28  ;;  %v1475_v37 = vadd.f32 %v963_v35, %v451_v34  ;;  %v965_v40 = vld [vmem:[%s2754_s29 + $0x7c0] sm:$0xff]  ;;  %1985 = vst [vmem:[%s2769_s20 + $0x7a0] sm:$0xff] %v1473_v32  ;;  %v1476_v41 = vadd.f32 %v964_v38, %v452_v36  ;;  %v454_v43 = vld [vmem:[%s2747_s19 + $0x7c8] sm:$0xff] }
 0x10f   : > { %1986 = vst [vmem:[%s2769_s20 + $0x7a8] sm:$0xff] %v1474_v33  ;;  %v1477_v42 = vadd.f32 %v965_v40, %v453_v39  ;;  %v966_v44 = vld [vmem:[%s2754_s29 + $0x7c8] sm:$0xff]  ;;  %v455_v45 = vld [vmem:[%s2747_s19 + $0x7d0] sm:$0xff]  ;;  %v456_v48 = vld [vmem:[%s2747_s19 + $0x7d8] sm:$0xff] }
 0x110   : > { %1987 = vst [vmem:[%s2769_s20 + $0x7b0] sm:$0xff] %v1475_v37  ;;  %v1478_v46 = vadd.f32 %v966_v44, %v454_v43  ;;  %v967_v47 = vld [vmem:[%s2754_s29 + $0x7d0] sm:$0xff]  ;;  %v968_v49 = vld [vmem:[%s2754_s29 + $0x7d8] sm:$0xff]  ;;  %1988 = vst [vmem:[%s2769_s20 + $0x7b8] sm:$0xff] %v1476_v41 }
 0x111   : > { %1989 = vst [vmem:[%s2769_s20 + $0x7c0] sm:$0xff] %v1477_v42  ;;  %v1479_v50 = vadd.f32 %v967_v47, %v455_v45  ;;  %v1480_v51 = vadd.f32 %v968_v49, %v456_v48  ;;  %v457_v52 = vld [vmem:[%s2747_s19 + $0x7e0] sm:$0xff]  ;;  %v458_v54 = vld [vmem:[%s2747_s19 + $0x7e8] sm:$0xff]  ;;  %v459_v57 = vld [vmem:[%s2747_s19 + $0x7f0] sm:$0xff] }
 0x112   : > { %v969_v53 = vld [vmem:[%s2754_s29 + $0x7e0] sm:$0xff]  ;;  %1990 = vst [vmem:[%s2769_s20 + $0x7c8] sm:$0xff] %v1478_v46  ;;  %v970_v56 = vld [vmem:[%s2754_s29 + $0x7e8] sm:$0xff]  ;;  %v971_v58 = vld [vmem:[%s2754_s29 + $0x7f0] sm:$0xff] }
 0x113   : > { %v1481_v55 = vadd.f32 %v969_v53, %v457_v52  ;;  %1991 = vst [vmem:[%s2769_s20 + $0x7d0] sm:$0xff] %v1479_v50  ;;  %1992 = vst [vmem:[%s2769_s20 + $0x7d8] sm:$0xff] %v1480_v51  ;;  %v1482_v59 = vadd.f32 %v970_v56, %v458_v54  ;;  %v1483_v60 = vadd.f32 %v971_v58, %v459_v57  ;;  %v460_v61 = vld [vmem:[%s2747_s19 + $0x7f8] sm:$0xff]  ;;  %v461_v63 = vld [vmem:[%s2747_s19 + $0x800] sm:$0xff] }
 0x114   : > { %v972_v62 = vld [vmem:[%s2754_s29 + $0x7f8] sm:$0xff]  ;;  %v973_v1 = vld [vmem:[%s2754_s29 + $0x800] sm:$0xff]  ;;  %v462_v2 = vld [vmem:[%s2747_s19 + $0x808] sm:$0xff] }
 0x115   : > { %1993 = vst [vmem:[%s2769_s20 + $0x7e0] sm:$0xff] %v1481_v55  ;;  %v1484_v0 = vadd.f32 %v972_v62, %v460_v61  ;;  %v974_v3 = vld [vmem:[%s2754_s29 + $0x808] sm:$0xff]  ;;  %1994 = vst [vmem:[%s2769_s20 + $0x7e8] sm:$0xff] %v1482_v59  ;;  %v1485_v4 = vadd.f32 %v973_v1, %v461_v63  ;;  %v463_v6 = vld [vmem:[%s2747_s19 + $0x810] sm:$0xff] }
 0x116   : > { %1995 = vst [vmem:[%s2769_s20 + $0x7f0] sm:$0xff] %v1483_v60  ;;  %v1486_v5 = vadd.f32 %v974_v3, %v462_v2  ;;  %v975_v7 = vld [vmem:[%s2754_s29 + $0x810] sm:$0xff]  ;;  %v464_v8 = vld [vmem:[%s2747_s19 + $0x818] sm:$0xff]  ;;  %v465_v11 = vld [vmem:[%s2747_s19 + $0x820] sm:$0xff] }
 0x117   : > { %1996 = vst [vmem:[%s2769_s20 + $0x7f8] sm:$0xff] %v1484_v0  ;;  %v1487_v9 = vadd.f32 %v975_v7, %v463_v6  ;;  %v976_v10 = vld [vmem:[%s2754_s29 + $0x818] sm:$0xff]  ;;  %v977_v12 = vld [vmem:[%s2754_s29 + $0x820] sm:$0xff]  ;;  %1997 = vst [vmem:[%s2769_s20 + $0x800] sm:$0xff] %v1485_v4 }
 0x118   : > { %1998 = vst [vmem:[%s2769_s20 + $0x808] sm:$0xff] %v1486_v5  ;;  %v1488_v13 = vadd.f32 %v976_v10, %v464_v8  ;;  %v1489_v14 = vadd.f32 %v977_v12, %v465_v11  ;;  %v466_v15 = vld [vmem:[%s2747_s19 + $0x828] sm:$0xff]  ;;  %v467_v17 = vld [vmem:[%s2747_s19 + $0x830] sm:$0xff]  ;;  %v468_v20 = vld [vmem:[%s2747_s19 + $0x838] sm:$0xff] }
 0x119   : > { %v978_v16 = vld [vmem:[%s2754_s29 + $0x828] sm:$0xff]  ;;  %1999 = vst [vmem:[%s2769_s20 + $0x810] sm:$0xff] %v1487_v9  ;;  %v979_v19 = vld [vmem:[%s2754_s29 + $0x830] sm:$0xff]  ;;  %v980_v21 = vld [vmem:[%s2754_s29 + $0x838] sm:$0xff] }
 0x11a   : > { %v1490_v18 = vadd.f32 %v978_v16, %v466_v15  ;;  %2000 = vst [vmem:[%s2769_s20 + $0x818] sm:$0xff] %v1488_v13  ;;  %2001 = vst [vmem:[%s2769_s20 + $0x820] sm:$0xff] %v1489_v14  ;;  %v1491_v22 = vadd.f32 %v979_v19, %v467_v17  ;;  %v1492_v23 = vadd.f32 %v980_v21, %v468_v20  ;;  %v469_v24 = vld [vmem:[%s2747_s19 + $0x840] sm:$0xff]  ;;  %v470_v26 = vld [vmem:[%s2747_s19 + $0x848] sm:$0xff] }
 0x11b   : > { %v981_v25 = vld [vmem:[%s2754_s29 + $0x840] sm:$0xff]  ;;  %v982_v28 = vld [vmem:[%s2754_s29 + $0x848] sm:$0xff]  ;;  %v471_v29 = vld [vmem:[%s2747_s19 + $0x850] sm:$0xff] }
 0x11c   : > { %2002 = vst [vmem:[%s2769_s20 + $0x828] sm:$0xff] %v1490_v18  ;;  %v1493_v27 = vadd.f32 %v981_v25, %v469_v24  ;;  %v983_v30 = vld [vmem:[%s2754_s29 + $0x850] sm:$0xff]  ;;  %2003 = vst [vmem:[%s2769_s20 + $0x830] sm:$0xff] %v1491_v22  ;;  %v1494_v31 = vadd.f32 %v982_v28, %v470_v26  ;;  %v472_v33 = vld [vmem:[%s2747_s19 + $0x858] sm:$0xff] }
 0x11d   : > { %2004 = vst [vmem:[%s2769_s20 + $0x838] sm:$0xff] %v1492_v23  ;;  %v1495_v32 = vadd.f32 %v983_v30, %v471_v29  ;;  %v984_v34 = vld [vmem:[%s2754_s29 + $0x858] sm:$0xff]  ;;  %v473_v35 = vld [vmem:[%s2747_s19 + $0x860] sm:$0xff]  ;;  %v474_v38 = vld [vmem:[%s2747_s19 + $0x868] sm:$0xff] }
 0x11e   : > { %2005 = vst [vmem:[%s2769_s20 + $0x840] sm:$0xff] %v1493_v27  ;;  %v1496_v36 = vadd.f32 %v984_v34, %v472_v33  ;;  %v985_v37 = vld [vmem:[%s2754_s29 + $0x860] sm:$0xff]  ;;  %v986_v39 = vld [vmem:[%s2754_s29 + $0x868] sm:$0xff]  ;;  %2006 = vst [vmem:[%s2769_s20 + $0x848] sm:$0xff] %v1494_v31 }
 0x11f   : > { %2007 = vst [vmem:[%s2769_s20 + $0x850] sm:$0xff] %v1495_v32  ;;  %v1497_v40 = vadd.f32 %v985_v37, %v473_v35  ;;  %v1498_v41 = vadd.f32 %v986_v39, %v474_v38  ;;  %v475_v42 = vld [vmem:[%s2747_s19 + $0x870] sm:$0xff]  ;;  %v476_v44 = vld [vmem:[%s2747_s19 + $0x878] sm:$0xff]  ;;  %v477_v47 = vld [vmem:[%s2747_s19 + $0x880] sm:$0xff] }
 0x120   : > { %v987_v43 = vld [vmem:[%s2754_s29 + $0x870] sm:$0xff]  ;;  %2008 = vst [vmem:[%s2769_s20 + $0x858] sm:$0xff] %v1496_v36  ;;  %v988_v46 = vld [vmem:[%s2754_s29 + $0x878] sm:$0xff]  ;;  %v989_v48 = vld [vmem:[%s2754_s29 + $0x880] sm:$0xff] }
 0x121   : > { %v1499_v45 = vadd.f32 %v987_v43, %v475_v42  ;;  %2009 = vst [vmem:[%s2769_s20 + $0x860] sm:$0xff] %v1497_v40  ;;  %2010 = vst [vmem:[%s2769_s20 + $0x868] sm:$0xff] %v1498_v41  ;;  %v1500_v49 = vadd.f32 %v988_v46, %v476_v44  ;;  %v1501_v50 = vadd.f32 %v989_v48, %v477_v47  ;;  %v478_v51 = vld [vmem:[%s2747_s19 + $0x888] sm:$0xff]  ;;  %v479_v53 = vld [vmem:[%s2747_s19 + $0x890] sm:$0xff] }
 0x122   : > { %v990_v52 = vld [vmem:[%s2754_s29 + $0x888] sm:$0xff]  ;;  %v991_v55 = vld [vmem:[%s2754_s29 + $0x890] sm:$0xff]  ;;  %v480_v56 = vld [vmem:[%s2747_s19 + $0x898] sm:$0xff] }
 0x123   : > { %2011 = vst [vmem:[%s2769_s20 + $0x870] sm:$0xff] %v1499_v45  ;;  %v1502_v54 = vadd.f32 %v990_v52, %v478_v51  ;;  %v992_v57 = vld [vmem:[%s2754_s29 + $0x898] sm:$0xff]  ;;  %2012 = vst [vmem:[%s2769_s20 + $0x878] sm:$0xff] %v1500_v49  ;;  %v1503_v58 = vadd.f32 %v991_v55, %v479_v53  ;;  %v481_v60 = vld [vmem:[%s2747_s19 + $0x8a0] sm:$0xff] }
 0x124   : > { %2013 = vst [vmem:[%s2769_s20 + $0x880] sm:$0xff] %v1501_v50  ;;  %v1504_v59 = vadd.f32 %v992_v57, %v480_v56  ;;  %v993_v61 = vld [vmem:[%s2754_s29 + $0x8a0] sm:$0xff]  ;;  %v482_v62 = vld [vmem:[%s2747_s19 + $0x8a8] sm:$0xff]  ;;  %v483_v1 = vld [vmem:[%s2747_s19 + $0x8b0] sm:$0xff] }
 0x125   : > { %2014 = vst [vmem:[%s2769_s20 + $0x888] sm:$0xff] %v1502_v54  ;;  %v1505_v63 = vadd.f32 %v993_v61, %v481_v60  ;;  %v994_v0 = vld [vmem:[%s2754_s29 + $0x8a8] sm:$0xff]  ;;  %v995_v2 = vld [vmem:[%s2754_s29 + $0x8b0] sm:$0xff]  ;;  %2015 = vst [vmem:[%s2769_s20 + $0x890] sm:$0xff] %v1503_v58 }
 0x126   : > { %2016 = vst [vmem:[%s2769_s20 + $0x898] sm:$0xff] %v1504_v59  ;;  %v1506_v3 = vadd.f32 %v994_v0, %v482_v62  ;;  %v1507_v4 = vadd.f32 %v995_v2, %v483_v1  ;;  %v484_v5 = vld [vmem:[%s2747_s19 + $0x8b8] sm:$0xff]  ;;  %v485_v7 = vld [vmem:[%s2747_s19 + $0x8c0] sm:$0xff]  ;;  %v486_v10 = vld [vmem:[%s2747_s19 + $0x8c8] sm:$0xff] }
 0x127   : > { %v996_v6 = vld [vmem:[%s2754_s29 + $0x8b8] sm:$0xff]  ;;  %2017 = vst [vmem:[%s2769_s20 + $0x8a0] sm:$0xff] %v1505_v63  ;;  %v997_v9 = vld [vmem:[%s2754_s29 + $0x8c0] sm:$0xff]  ;;  %v998_v11 = vld [vmem:[%s2754_s29 + $0x8c8] sm:$0xff] }
 0x128   : > { %v1508_v8 = vadd.f32 %v996_v6, %v484_v5  ;;  %2018 = vst [vmem:[%s2769_s20 + $0x8a8] sm:$0xff] %v1506_v3  ;;  %2019 = vst [vmem:[%s2769_s20 + $0x8b0] sm:$0xff] %v1507_v4  ;;  %v1509_v12 = vadd.f32 %v997_v9, %v485_v7  ;;  %v1510_v13 = vadd.f32 %v998_v11, %v486_v10  ;;  %v487_v14 = vld [vmem:[%s2747_s19 + $0x8d0] sm:$0xff]  ;;  %v488_v16 = vld [vmem:[%s2747_s19 + $0x8d8] sm:$0xff] }
 0x129   : > { %v999_v15 = vld [vmem:[%s2754_s29 + $0x8d0] sm:$0xff]  ;;  %v1000_v18 = vld [vmem:[%s2754_s29 + $0x8d8] sm:$0xff]  ;;  %v489_v19 = vld [vmem:[%s2747_s19 + $0x8e0] sm:$0xff] }
 0x12a   : > { %2020 = vst [vmem:[%s2769_s20 + $0x8b8] sm:$0xff] %v1508_v8  ;;  %v1511_v17 = vadd.f32 %v999_v15, %v487_v14  ;;  %v1001_v20 = vld [vmem:[%s2754_s29 + $0x8e0] sm:$0xff]  ;;  %2021 = vst [vmem:[%s2769_s20 + $0x8c0] sm:$0xff] %v1509_v12  ;;  %v1512_v21 = vadd.f32 %v1000_v18, %v488_v16  ;;  %v490_v23 = vld [vmem:[%s2747_s19 + $0x8e8] sm:$0xff] }
 0x12b   : > { %2022 = vst [vmem:[%s2769_s20 + $0x8c8] sm:$0xff] %v1510_v13  ;;  %v1513_v22 = vadd.f32 %v1001_v20, %v489_v19  ;;  %v1002_v24 = vld [vmem:[%s2754_s29 + $0x8e8] sm:$0xff]  ;;  %v491_v25 = vld [vmem:[%s2747_s19 + $0x8f0] sm:$0xff]  ;;  %v492_v28 = vld [vmem:[%s2747_s19 + $0x8f8] sm:$0xff] }
 0x12c   : > { %2023 = vst [vmem:[%s2769_s20 + $0x8d0] sm:$0xff] %v1511_v17  ;;  %v1514_v26 = vadd.f32 %v1002_v24, %v490_v23  ;;  %v1003_v27 = vld [vmem:[%s2754_s29 + $0x8f0] sm:$0xff]  ;;  %v1004_v29 = vld [vmem:[%s2754_s29 + $0x8f8] sm:$0xff]  ;;  %2024 = vst [vmem:[%s2769_s20 + $0x8d8] sm:$0xff] %v1512_v21 }
 0x12d   : > { %2025 = vst [vmem:[%s2769_s20 + $0x8e0] sm:$0xff] %v1513_v22  ;;  %v1515_v30 = vadd.f32 %v1003_v27, %v491_v25  ;;  %v1516_v31 = vadd.f32 %v1004_v29, %v492_v28  ;;  %v493_v32 = vld [vmem:[%s2747_s19 + $0x900] sm:$0xff]  ;;  %v494_v34 = vld [vmem:[%s2747_s19 + $0x908] sm:$0xff]  ;;  %v495_v37 = vld [vmem:[%s2747_s19 + $0x910] sm:$0xff] }
 0x12e   : > { %v1005_v33 = vld [vmem:[%s2754_s29 + $0x900] sm:$0xff]  ;;  %2026 = vst [vmem:[%s2769_s20 + $0x8e8] sm:$0xff] %v1514_v26  ;;  %v1006_v36 = vld [vmem:[%s2754_s29 + $0x908] sm:$0xff]  ;;  %v1007_v38 = vld [vmem:[%s2754_s29 + $0x910] sm:$0xff] }
 0x12f   : > { %v1517_v35 = vadd.f32 %v1005_v33, %v493_v32  ;;  %2027 = vst [vmem:[%s2769_s20 + $0x8f0] sm:$0xff] %v1515_v30  ;;  %2028 = vst [vmem:[%s2769_s20 + $0x8f8] sm:$0xff] %v1516_v31  ;;  %v1518_v39 = vadd.f32 %v1006_v36, %v494_v34  ;;  %v1519_v40 = vadd.f32 %v1007_v38, %v495_v37  ;;  %v496_v41 = vld [vmem:[%s2747_s19 + $0x918] sm:$0xff]  ;;  %v497_v43 = vld [vmem:[%s2747_s19 + $0x920] sm:$0xff] }
 0x130   : > { %v1008_v42 = vld [vmem:[%s2754_s29 + $0x918] sm:$0xff]  ;;  %v1009_v45 = vld [vmem:[%s2754_s29 + $0x920] sm:$0xff]  ;;  %v498_v46 = vld [vmem:[%s2747_s19 + $0x928] sm:$0xff] }
 0x131   : > { %2029 = vst [vmem:[%s2769_s20 + $0x900] sm:$0xff] %v1517_v35  ;;  %v1520_v44 = vadd.f32 %v1008_v42, %v496_v41  ;;  %v1010_v47 = vld [vmem:[%s2754_s29 + $0x928] sm:$0xff]  ;;  %2030 = vst [vmem:[%s2769_s20 + $0x908] sm:$0xff] %v1518_v39  ;;  %v1521_v48 = vadd.f32 %v1009_v45, %v497_v43  ;;  %v499_v50 = vld [vmem:[%s2747_s19 + $0x930] sm:$0xff] }
 0x132   : > { %2031 = vst [vmem:[%s2769_s20 + $0x910] sm:$0xff] %v1519_v40  ;;  %v1522_v49 = vadd.f32 %v1010_v47, %v498_v46  ;;  %v1011_v51 = vld [vmem:[%s2754_s29 + $0x930] sm:$0xff]  ;;  %v500_v52 = vld [vmem:[%s2747_s19 + $0x938] sm:$0xff]  ;;  %v501_v55 = vld [vmem:[%s2747_s19 + $0x940] sm:$0xff] }
 0x133   : > { %2032 = vst [vmem:[%s2769_s20 + $0x918] sm:$0xff] %v1520_v44  ;;  %v1523_v53 = vadd.f32 %v1011_v51, %v499_v50  ;;  %v1012_v54 = vld [vmem:[%s2754_s29 + $0x938] sm:$0xff]  ;;  %v1013_v56 = vld [vmem:[%s2754_s29 + $0x940] sm:$0xff]  ;;  %2033 = vst [vmem:[%s2769_s20 + $0x920] sm:$0xff] %v1521_v48 }
 0x134   : > { %2034 = vst [vmem:[%s2769_s20 + $0x928] sm:$0xff] %v1522_v49  ;;  %v1524_v57 = vadd.f32 %v1012_v54, %v500_v52  ;;  %v1525_v58 = vadd.f32 %v1013_v56, %v501_v55  ;;  %v502_v59 = vld [vmem:[%s2747_s19 + $0x948] sm:$0xff]  ;;  %v503_v61 = vld [vmem:[%s2747_s19 + $0x950] sm:$0xff]  ;;  %v504_v0 = vld [vmem:[%s2747_s19 + $0x958] sm:$0xff] }
 0x135   : > { %v1014_v60 = vld [vmem:[%s2754_s29 + $0x948] sm:$0xff]  ;;  %2035 = vst [vmem:[%s2769_s20 + $0x930] sm:$0xff] %v1523_v53  ;;  %v1015_v63 = vld [vmem:[%s2754_s29 + $0x950] sm:$0xff]  ;;  %v1016_v1 = vld [vmem:[%s2754_s29 + $0x958] sm:$0xff] }
 0x136   : > { %v1526_v62 = vadd.f32 %v1014_v60, %v502_v59  ;;  %2036 = vst [vmem:[%s2769_s20 + $0x938] sm:$0xff] %v1524_v57  ;;  %2037 = vst [vmem:[%s2769_s20 + $0x940] sm:$0xff] %v1525_v58  ;;  %v1527_v2 = vadd.f32 %v1015_v63, %v503_v61  ;;  %v1528_v3 = vadd.f32 %v1016_v1, %v504_v0  ;;  %v505_v4 = vld [vmem:[%s2747_s19 + $0x960] sm:$0xff]  ;;  %v506_v6 = vld [vmem:[%s2747_s19 + $0x968] sm:$0xff] }
 0x137   : > { %v1017_v5 = vld [vmem:[%s2754_s29 + $0x960] sm:$0xff]  ;;  %v1018_v8 = vld [vmem:[%s2754_s29 + $0x968] sm:$0xff]  ;;  %v507_v9 = vld [vmem:[%s2747_s19 + $0x970] sm:$0xff] }
 0x138   : > { %2038 = vst [vmem:[%s2769_s20 + $0x948] sm:$0xff] %v1526_v62  ;;  %v1529_v7 = vadd.f32 %v1017_v5, %v505_v4  ;;  %v1019_v10 = vld [vmem:[%s2754_s29 + $0x970] sm:$0xff]  ;;  %2039 = vst [vmem:[%s2769_s20 + $0x950] sm:$0xff] %v1527_v2  ;;  %v1530_v11 = vadd.f32 %v1018_v8, %v506_v6  ;;  %v508_v13 = vld [vmem:[%s2747_s19 + $0x978] sm:$0xff] }
 0x139   : > { %2040 = vst [vmem:[%s2769_s20 + $0x958] sm:$0xff] %v1528_v3  ;;  %v1531_v12 = vadd.f32 %v1019_v10, %v507_v9  ;;  %v1020_v14 = vld [vmem:[%s2754_s29 + $0x978] sm:$0xff]  ;;  %v509_v15 = vld [vmem:[%s2747_s19 + $0x980] sm:$0xff]  ;;  %v510_v18 = vld [vmem:[%s2747_s19 + $0x988] sm:$0xff] }
 0x13a   : > { %2041 = vst [vmem:[%s2769_s20 + $0x960] sm:$0xff] %v1529_v7  ;;  %v1532_v16 = vadd.f32 %v1020_v14, %v508_v13  ;;  %v1021_v17 = vld [vmem:[%s2754_s29 + $0x980] sm:$0xff]  ;;  %v1022_v19 = vld [vmem:[%s2754_s29 + $0x988] sm:$0xff]  ;;  %2042 = vst [vmem:[%s2769_s20 + $0x968] sm:$0xff] %v1530_v11 }
 0x13b   : > { %2043 = vst [vmem:[%s2769_s20 + $0x970] sm:$0xff] %v1531_v12  ;;  %v1533_v20 = vadd.f32 %v1021_v17, %v509_v15  ;;  %v1534_v21 = vadd.f32 %v1022_v19, %v510_v18  ;;  %v511_v22 = vld [vmem:[%s2747_s19 + $0x990] sm:$0xff]  ;;  %v512_v24 = vld [vmem:[%s2747_s19 + $0x998] sm:$0xff]  ;;  %v513_v27 = vld [vmem:[%s2747_s19 + $0x9a0] sm:$0xff] }
 0x13c   : > { %v1023_v23 = vld [vmem:[%s2754_s29 + $0x990] sm:$0xff]  ;;  %2044 = vst [vmem:[%s2769_s20 + $0x978] sm:$0xff] %v1532_v16  ;;  %v1024_v26 = vld [vmem:[%s2754_s29 + $0x998] sm:$0xff]  ;;  %v1025_v28 = vld [vmem:[%s2754_s29 + $0x9a0] sm:$0xff] }
 0x13d   : > { %v1535_v25 = vadd.f32 %v1023_v23, %v511_v22  ;;  %2045 = vst [vmem:[%s2769_s20 + $0x980] sm:$0xff] %v1533_v20  ;;  %2046 = vst [vmem:[%s2769_s20 + $0x988] sm:$0xff] %v1534_v21  ;;  %v1536_v29 = vadd.f32 %v1024_v26, %v512_v24  ;;  %v1537_v30 = vadd.f32 %v1025_v28, %v513_v27  ;;  %v514_v31 = vld [vmem:[%s2747_s19 + $0x9a8] sm:$0xff]  ;;  %v515_v33 = vld [vmem:[%s2747_s19 + $0x9b0] sm:$0xff] }
 0x13e   : > { %v1026_v32 = vld [vmem:[%s2754_s29 + $0x9a8] sm:$0xff]  ;;  %v1027_v35 = vld [vmem:[%s2754_s29 + $0x9b0] sm:$0xff]  ;;  %v516_v36 = vld [vmem:[%s2747_s19 + $0x9b8] sm:$0xff] }
 0x13f   : > { %2047 = vst [vmem:[%s2769_s20 + $0x990] sm:$0xff] %v1535_v25  ;;  %v1538_v34 = vadd.f32 %v1026_v32, %v514_v31  ;;  %v1028_v37 = vld [vmem:[%s2754_s29 + $0x9b8] sm:$0xff]  ;;  %2048 = vst [vmem:[%s2769_s20 + $0x998] sm:$0xff] %v1536_v29  ;;  %v1539_v38 = vadd.f32 %v1027_v35, %v515_v33  ;;  %v517_v40 = vld [vmem:[%s2747_s19 + $0x9c0] sm:$0xff] }
 0x140   : > { %2049 = vst [vmem:[%s2769_s20 + $0x9a0] sm:$0xff] %v1537_v30  ;;  %v1540_v39 = vadd.f32 %v1028_v37, %v516_v36  ;;  %v1029_v41 = vld [vmem:[%s2754_s29 + $0x9c0] sm:$0xff]  ;;  %v518_v42 = vld [vmem:[%s2747_s19 + $0x9c8] sm:$0xff]  ;;  %v519_v45 = vld [vmem:[%s2747_s19 + $0x9d0] sm:$0xff] }
 0x141   : > { %2050 = vst [vmem:[%s2769_s20 + $0x9a8] sm:$0xff] %v1538_v34  ;;  %v1541_v43 = vadd.f32 %v1029_v41, %v517_v40  ;;  %v1030_v44 = vld [vmem:[%s2754_s29 + $0x9c8] sm:$0xff]  ;;  %v1031_v46 = vld [vmem:[%s2754_s29 + $0x9d0] sm:$0xff]  ;;  %2051 = vst [vmem:[%s2769_s20 + $0x9b0] sm:$0xff] %v1539_v38 }
 0x142   : > { %2052 = vst [vmem:[%s2769_s20 + $0x9b8] sm:$0xff] %v1540_v39  ;;  %v1542_v47 = vadd.f32 %v1030_v44, %v518_v42  ;;  %v1543_v48 = vadd.f32 %v1031_v46, %v519_v45  ;;  %v520_v49 = vld [vmem:[%s2747_s19 + $0x9d8] sm:$0xff]  ;;  %v521_v51 = vld [vmem:[%s2747_s19 + $0x9e0] sm:$0xff]  ;;  %v522_v54 = vld [vmem:[%s2747_s19 + $0x9e8] sm:$0xff] }
 0x143   : > { %v1032_v50 = vld [vmem:[%s2754_s29 + $0x9d8] sm:$0xff]  ;;  %2053 = vst [vmem:[%s2769_s20 + $0x9c0] sm:$0xff] %v1541_v43  ;;  %v1033_v53 = vld [vmem:[%s2754_s29 + $0x9e0] sm:$0xff]  ;;  %v1034_v55 = vld [vmem:[%s2754_s29 + $0x9e8] sm:$0xff] }
 0x144   : > { %v1544_v52 = vadd.f32 %v1032_v50, %v520_v49  ;;  %2054 = vst [vmem:[%s2769_s20 + $0x9c8] sm:$0xff] %v1542_v47  ;;  %2055 = vst [vmem:[%s2769_s20 + $0x9d0] sm:$0xff] %v1543_v48  ;;  %v1545_v56 = vadd.f32 %v1033_v53, %v521_v51  ;;  %v1546_v57 = vadd.f32 %v1034_v55, %v522_v54  ;;  %v523_v58 = vld [vmem:[%s2747_s19 + $0x9f0] sm:$0xff]  ;;  %v524_v60 = vld [vmem:[%s2747_s19 + $0x9f8] sm:$0xff] }
 0x145   : > { %v1035_v59 = vld [vmem:[%s2754_s29 + $0x9f0] sm:$0xff]  ;;  %v1036_v62 = vld [vmem:[%s2754_s29 + $0x9f8] sm:$0xff]  ;;  %v525_v63 = vld [vmem:[%s2747_s19 + $0xa00] sm:$0xff] }
 0x146   : > { %2056 = vst [vmem:[%s2769_s20 + $0x9d8] sm:$0xff] %v1544_v52  ;;  %v1547_v61 = vadd.f32 %v1035_v59, %v523_v58  ;;  %v1037_v0 = vld [vmem:[%s2754_s29 + $0xa00] sm:$0xff]  ;;  %2057 = vst [vmem:[%s2769_s20 + $0x9e0] sm:$0xff] %v1545_v56  ;;  %v1548_v1 = vadd.f32 %v1036_v62, %v524_v60  ;;  %v526_v3 = vld [vmem:[%s2747_s19 + $0xa08] sm:$0xff] }
 0x147   : > { %2058 = vst [vmem:[%s2769_s20 + $0x9e8] sm:$0xff] %v1546_v57  ;;  %v1549_v2 = vadd.f32 %v1037_v0, %v525_v63  ;;  %v1038_v4 = vld [vmem:[%s2754_s29 + $0xa08] sm:$0xff]  ;;  %v527_v5 = vld [vmem:[%s2747_s19 + $0xa10] sm:$0xff]  ;;  %v528_v8 = vld [vmem:[%s2747_s19 + $0xa18] sm:$0xff] }
 0x148   : > { %2059 = vst [vmem:[%s2769_s20 + $0x9f0] sm:$0xff] %v1547_v61  ;;  %v1550_v6 = vadd.f32 %v1038_v4, %v526_v3  ;;  %v1039_v7 = vld [vmem:[%s2754_s29 + $0xa10] sm:$0xff]  ;;  %v1040_v9 = vld [vmem:[%s2754_s29 + $0xa18] sm:$0xff]  ;;  %2060 = vst [vmem:[%s2769_s20 + $0x9f8] sm:$0xff] %v1548_v1 }
 0x149   : > { %2061 = vst [vmem:[%s2769_s20 + $0xa00] sm:$0xff] %v1549_v2  ;;  %v1551_v10 = vadd.f32 %v1039_v7, %v527_v5  ;;  %v1552_v11 = vadd.f32 %v1040_v9, %v528_v8  ;;  %v529_v12 = vld [vmem:[%s2747_s19 + $0xa20] sm:$0xff]  ;;  %v530_v14 = vld [vmem:[%s2747_s19 + $0xa28] sm:$0xff]  ;;  %v531_v17 = vld [vmem:[%s2747_s19 + $0xa30] sm:$0xff] }
 0x14a   : > { %v1041_v13 = vld [vmem:[%s2754_s29 + $0xa20] sm:$0xff]  ;;  %2062 = vst [vmem:[%s2769_s20 + $0xa08] sm:$0xff] %v1550_v6  ;;  %v1042_v16 = vld [vmem:[%s2754_s29 + $0xa28] sm:$0xff]  ;;  %v1043_v18 = vld [vmem:[%s2754_s29 + $0xa30] sm:$0xff] }
 0x14b   : > { %v1553_v15 = vadd.f32 %v1041_v13, %v529_v12  ;;  %2063 = vst [vmem:[%s2769_s20 + $0xa10] sm:$0xff] %v1551_v10  ;;  %2064 = vst [vmem:[%s2769_s20 + $0xa18] sm:$0xff] %v1552_v11  ;;  %v1554_v19 = vadd.f32 %v1042_v16, %v530_v14  ;;  %v1555_v20 = vadd.f32 %v1043_v18, %v531_v17  ;;  %v532_v21 = vld [vmem:[%s2747_s19 + $0xa38] sm:$0xff]  ;;  %v533_v23 = vld [vmem:[%s2747_s19 + $0xa40] sm:$0xff] }
 0x14c   : > { %v1044_v22 = vld [vmem:[%s2754_s29 + $0xa38] sm:$0xff]  ;;  %v1045_v25 = vld [vmem:[%s2754_s29 + $0xa40] sm:$0xff]  ;;  %v534_v26 = vld [vmem:[%s2747_s19 + $0xa48] sm:$0xff] }
 0x14d   : > { %2065 = vst [vmem:[%s2769_s20 + $0xa20] sm:$0xff] %v1553_v15  ;;  %v1556_v24 = vadd.f32 %v1044_v22, %v532_v21  ;;  %v1046_v27 = vld [vmem:[%s2754_s29 + $0xa48] sm:$0xff]  ;;  %2066 = vst [vmem:[%s2769_s20 + $0xa28] sm:$0xff] %v1554_v19  ;;  %v1557_v28 = vadd.f32 %v1045_v25, %v533_v23  ;;  %v535_v30 = vld [vmem:[%s2747_s19 + $0xa50] sm:$0xff] }
 0x14e   : > { %2067 = vst [vmem:[%s2769_s20 + $0xa30] sm:$0xff] %v1555_v20  ;;  %v1558_v29 = vadd.f32 %v1046_v27, %v534_v26  ;;  %v1047_v31 = vld [vmem:[%s2754_s29 + $0xa50] sm:$0xff]  ;;  %v536_v32 = vld [vmem:[%s2747_s19 + $0xa58] sm:$0xff]  ;;  %v537_v35 = vld [vmem:[%s2747_s19 + $0xa60] sm:$0xff] }
 0x14f   : > { %2068 = vst [vmem:[%s2769_s20 + $0xa38] sm:$0xff] %v1556_v24  ;;  %v1559_v33 = vadd.f32 %v1047_v31, %v535_v30  ;;  %v1048_v34 = vld [vmem:[%s2754_s29 + $0xa58] sm:$0xff]  ;;  %v1049_v36 = vld [vmem:[%s2754_s29 + $0xa60] sm:$0xff]  ;;  %2069 = vst [vmem:[%s2769_s20 + $0xa40] sm:$0xff] %v1557_v28 }
 0x150   : > { %2070 = vst [vmem:[%s2769_s20 + $0xa48] sm:$0xff] %v1558_v29  ;;  %v1560_v37 = vadd.f32 %v1048_v34, %v536_v32  ;;  %v1561_v38 = vadd.f32 %v1049_v36, %v537_v35  ;;  %v538_v39 = vld [vmem:[%s2747_s19 + $0xa68] sm:$0xff]  ;;  %v539_v41 = vld [vmem:[%s2747_s19 + $0xa70] sm:$0xff]  ;;  %v540_v44 = vld [vmem:[%s2747_s19 + $0xa78] sm:$0xff] }
 0x151   : > { %v1050_v40 = vld [vmem:[%s2754_s29 + $0xa68] sm:$0xff]  ;;  %2071 = vst [vmem:[%s2769_s20 + $0xa50] sm:$0xff] %v1559_v33  ;;  %v1051_v43 = vld [vmem:[%s2754_s29 + $0xa70] sm:$0xff]  ;;  %v1052_v45 = vld [vmem:[%s2754_s29 + $0xa78] sm:$0xff] }
 0x152   : > { %v1562_v42 = vadd.f32 %v1050_v40, %v538_v39  ;;  %2072 = vst [vmem:[%s2769_s20 + $0xa58] sm:$0xff] %v1560_v37  ;;  %2073 = vst [vmem:[%s2769_s20 + $0xa60] sm:$0xff] %v1561_v38  ;;  %v1563_v46 = vadd.f32 %v1051_v43, %v539_v41  ;;  %v1564_v47 = vadd.f32 %v1052_v45, %v540_v44  ;;  %v541_v48 = vld [vmem:[%s2747_s19 + $0xa80] sm:$0xff]  ;;  %v542_v50 = vld [vmem:[%s2747_s19 + $0xa88] sm:$0xff] }
 0x153   : > { %v1053_v49 = vld [vmem:[%s2754_s29 + $0xa80] sm:$0xff]  ;;  %v1054_v52 = vld [vmem:[%s2754_s29 + $0xa88] sm:$0xff]  ;;  %v543_v53 = vld [vmem:[%s2747_s19 + $0xa90] sm:$0xff] }
 0x154   : > { %2074 = vst [vmem:[%s2769_s20 + $0xa68] sm:$0xff] %v1562_v42  ;;  %v1565_v51 = vadd.f32 %v1053_v49, %v541_v48  ;;  %v1055_v54 = vld [vmem:[%s2754_s29 + $0xa90] sm:$0xff]  ;;  %2075 = vst [vmem:[%s2769_s20 + $0xa70] sm:$0xff] %v1563_v46  ;;  %v1566_v55 = vadd.f32 %v1054_v52, %v542_v50  ;;  %v544_v57 = vld [vmem:[%s2747_s19 + $0xa98] sm:$0xff] }
 0x155   : > { %2076 = vst [vmem:[%s2769_s20 + $0xa78] sm:$0xff] %v1564_v47  ;;  %v1567_v56 = vadd.f32 %v1055_v54, %v543_v53  ;;  %v1056_v58 = vld [vmem:[%s2754_s29 + $0xa98] sm:$0xff]  ;;  %v545_v59 = vld [vmem:[%s2747_s19 + $0xaa0] sm:$0xff]  ;;  %v546_v62 = vld [vmem:[%s2747_s19 + $0xaa8] sm:$0xff] }
 0x156   : > { %2077 = vst [vmem:[%s2769_s20 + $0xa80] sm:$0xff] %v1565_v51  ;;  %v1568_v60 = vadd.f32 %v1056_v58, %v544_v57  ;;  %v1057_v61 = vld [vmem:[%s2754_s29 + $0xaa0] sm:$0xff]  ;;  %v1058_v63 = vld [vmem:[%s2754_s29 + $0xaa8] sm:$0xff]  ;;  %2078 = vst [vmem:[%s2769_s20 + $0xa88] sm:$0xff] %v1566_v55 }
 0x157   : > { %2079 = vst [vmem:[%s2769_s20 + $0xa90] sm:$0xff] %v1567_v56  ;;  %v1569_v0 = vadd.f32 %v1057_v61, %v545_v59  ;;  %v1570_v1 = vadd.f32 %v1058_v63, %v546_v62  ;;  %v547_v2 = vld [vmem:[%s2747_s19 + $0xab0] sm:$0xff]  ;;  %v548_v4 = vld [vmem:[%s2747_s19 + $0xab8] sm:$0xff]  ;;  %v549_v7 = vld [vmem:[%s2747_s19 + $0xac0] sm:$0xff] }
 0x158   : > { %v1059_v3 = vld [vmem:[%s2754_s29 + $0xab0] sm:$0xff]  ;;  %2080 = vst [vmem:[%s2769_s20 + $0xa98] sm:$0xff] %v1568_v60  ;;  %v1060_v6 = vld [vmem:[%s2754_s29 + $0xab8] sm:$0xff]  ;;  %v1061_v8 = vld [vmem:[%s2754_s29 + $0xac0] sm:$0xff] }
 0x159   : > { %v1571_v5 = vadd.f32 %v1059_v3, %v547_v2  ;;  %2081 = vst [vmem:[%s2769_s20 + $0xaa0] sm:$0xff] %v1569_v0  ;;  %2082 = vst [vmem:[%s2769_s20 + $0xaa8] sm:$0xff] %v1570_v1  ;;  %v1572_v9 = vadd.f32 %v1060_v6, %v548_v4  ;;  %v1573_v10 = vadd.f32 %v1061_v8, %v549_v7  ;;  %v550_v11 = vld [vmem:[%s2747_s19 + $0xac8] sm:$0xff]  ;;  %v551_v13 = vld [vmem:[%s2747_s19 + $0xad0] sm:$0xff] }
 0x15a   : > { %v1062_v12 = vld [vmem:[%s2754_s29 + $0xac8] sm:$0xff]  ;;  %v1063_v15 = vld [vmem:[%s2754_s29 + $0xad0] sm:$0xff]  ;;  %v552_v16 = vld [vmem:[%s2747_s19 + $0xad8] sm:$0xff] }
 0x15b   : > { %2083 = vst [vmem:[%s2769_s20 + $0xab0] sm:$0xff] %v1571_v5  ;;  %v1574_v14 = vadd.f32 %v1062_v12, %v550_v11  ;;  %v1064_v17 = vld [vmem:[%s2754_s29 + $0xad8] sm:$0xff]  ;;  %2084 = vst [vmem:[%s2769_s20 + $0xab8] sm:$0xff] %v1572_v9  ;;  %v1575_v18 = vadd.f32 %v1063_v15, %v551_v13  ;;  %v553_v20 = vld [vmem:[%s2747_s19 + $0xae0] sm:$0xff] }
 0x15c   : > { %2085 = vst [vmem:[%s2769_s20 + $0xac0] sm:$0xff] %v1573_v10  ;;  %v1576_v19 = vadd.f32 %v1064_v17, %v552_v16  ;;  %v1065_v21 = vld [vmem:[%s2754_s29 + $0xae0] sm:$0xff]  ;;  %v554_v22 = vld [vmem:[%s2747_s19 + $0xae8] sm:$0xff]  ;;  %v555_v25 = vld [vmem:[%s2747_s19 + $0xaf0] sm:$0xff] }
 0x15d   : > { %2086 = vst [vmem:[%s2769_s20 + $0xac8] sm:$0xff] %v1574_v14  ;;  %v1577_v23 = vadd.f32 %v1065_v21, %v553_v20  ;;  %v1066_v24 = vld [vmem:[%s2754_s29 + $0xae8] sm:$0xff]  ;;  %v1067_v26 = vld [vmem:[%s2754_s29 + $0xaf0] sm:$0xff]  ;;  %2087 = vst [vmem:[%s2769_s20 + $0xad0] sm:$0xff] %v1575_v18 }
 0x15e   : > { %2088 = vst [vmem:[%s2769_s20 + $0xad8] sm:$0xff] %v1576_v19  ;;  %v1578_v27 = vadd.f32 %v1066_v24, %v554_v22  ;;  %v1579_v28 = vadd.f32 %v1067_v26, %v555_v25  ;;  %v556_v29 = vld [vmem:[%s2747_s19 + $0xaf8] sm:$0xff]  ;;  %v557_v31 = vld [vmem:[%s2747_s19 + $0xb00] sm:$0xff]  ;;  %v558_v34 = vld [vmem:[%s2747_s19 + $0xb08] sm:$0xff] }
 0x15f   : > { %v1068_v30 = vld [vmem:[%s2754_s29 + $0xaf8] sm:$0xff]  ;;  %2089 = vst [vmem:[%s2769_s20 + $0xae0] sm:$0xff] %v1577_v23  ;;  %v1069_v33 = vld [vmem:[%s2754_s29 + $0xb00] sm:$0xff]  ;;  %v1070_v35 = vld [vmem:[%s2754_s29 + $0xb08] sm:$0xff] }
 0x160   : > { %v1580_v32 = vadd.f32 %v1068_v30, %v556_v29  ;;  %2090 = vst [vmem:[%s2769_s20 + $0xae8] sm:$0xff] %v1578_v27  ;;  %2091 = vst [vmem:[%s2769_s20 + $0xaf0] sm:$0xff] %v1579_v28  ;;  %v1581_v36 = vadd.f32 %v1069_v33, %v557_v31  ;;  %v1582_v37 = vadd.f32 %v1070_v35, %v558_v34  ;;  %v559_v38 = vld [vmem:[%s2747_s19 + $0xb10] sm:$0xff]  ;;  %v560_v40 = vld [vmem:[%s2747_s19 + $0xb18] sm:$0xff] }
 0x161   : > { %v1071_v39 = vld [vmem:[%s2754_s29 + $0xb10] sm:$0xff]  ;;  %v1072_v42 = vld [vmem:[%s2754_s29 + $0xb18] sm:$0xff]  ;;  %v561_v43 = vld [vmem:[%s2747_s19 + $0xb20] sm:$0xff] }
 0x162   : > { %2092 = vst [vmem:[%s2769_s20 + $0xaf8] sm:$0xff] %v1580_v32  ;;  %v1583_v41 = vadd.f32 %v1071_v39, %v559_v38  ;;  %v1073_v44 = vld [vmem:[%s2754_s29 + $0xb20] sm:$0xff]  ;;  %2093 = vst [vmem:[%s2769_s20 + $0xb00] sm:$0xff] %v1581_v36  ;;  %v1584_v45 = vadd.f32 %v1072_v42, %v560_v40  ;;  %v562_v47 = vld [vmem:[%s2747_s19 + $0xb28] sm:$0xff] }
 0x163   : > { %2094 = vst [vmem:[%s2769_s20 + $0xb08] sm:$0xff] %v1582_v37  ;;  %v1585_v46 = vadd.f32 %v1073_v44, %v561_v43  ;;  %v1074_v48 = vld [vmem:[%s2754_s29 + $0xb28] sm:$0xff]  ;;  %v563_v49 = vld [vmem:[%s2747_s19 + $0xb30] sm:$0xff]  ;;  %v564_v52 = vld [vmem:[%s2747_s19 + $0xb38] sm:$0xff] }
 0x164   : > { %2095 = vst [vmem:[%s2769_s20 + $0xb10] sm:$0xff] %v1583_v41  ;;  %v1586_v50 = vadd.f32 %v1074_v48, %v562_v47  ;;  %v1075_v51 = vld [vmem:[%s2754_s29 + $0xb30] sm:$0xff]  ;;  %v1076_v53 = vld [vmem:[%s2754_s29 + $0xb38] sm:$0xff]  ;;  %2096 = vst [vmem:[%s2769_s20 + $0xb18] sm:$0xff] %v1584_v45 }
 0x165   : > { %2097 = vst [vmem:[%s2769_s20 + $0xb20] sm:$0xff] %v1585_v46  ;;  %v1587_v54 = vadd.f32 %v1075_v51, %v563_v49  ;;  %v1588_v55 = vadd.f32 %v1076_v53, %v564_v52  ;;  %v565_v56 = vld [vmem:[%s2747_s19 + $0xb40] sm:$0xff]  ;;  %v566_v58 = vld [vmem:[%s2747_s19 + $0xb48] sm:$0xff]  ;;  %v567_v61 = vld [vmem:[%s2747_s19 + $0xb50] sm:$0xff] }
 0x166   : > { %v1077_v57 = vld [vmem:[%s2754_s29 + $0xb40] sm:$0xff]  ;;  %2098 = vst [vmem:[%s2769_s20 + $0xb28] sm:$0xff] %v1586_v50  ;;  %v1078_v60 = vld [vmem:[%s2754_s29 + $0xb48] sm:$0xff]  ;;  %v1079_v62 = vld [vmem:[%s2754_s29 + $0xb50] sm:$0xff] }
 0x167   : > { %v1589_v59 = vadd.f32 %v1077_v57, %v565_v56  ;;  %2099 = vst [vmem:[%s2769_s20 + $0xb30] sm:$0xff] %v1587_v54  ;;  %2100 = vst [vmem:[%s2769_s20 + $0xb38] sm:$0xff] %v1588_v55  ;;  %v1590_v63 = vadd.f32 %v1078_v60, %v566_v58  ;;  %v1591_v0 = vadd.f32 %v1079_v62, %v567_v61  ;;  %v568_v1 = vld [vmem:[%s2747_s19 + $0xb58] sm:$0xff]  ;;  %v569_v3 = vld [vmem:[%s2747_s19 + $0xb60] sm:$0xff] }
 0x168   : > { %v1080_v2 = vld [vmem:[%s2754_s29 + $0xb58] sm:$0xff]  ;;  %v1081_v5 = vld [vmem:[%s2754_s29 + $0xb60] sm:$0xff]  ;;  %v570_v6 = vld [vmem:[%s2747_s19 + $0xb68] sm:$0xff] }
 0x169   : > { %2101 = vst [vmem:[%s2769_s20 + $0xb40] sm:$0xff] %v1589_v59  ;;  %v1592_v4 = vadd.f32 %v1080_v2, %v568_v1  ;;  %v1082_v7 = vld [vmem:[%s2754_s29 + $0xb68] sm:$0xff]  ;;  %2102 = vst [vmem:[%s2769_s20 + $0xb48] sm:$0xff] %v1590_v63  ;;  %v1593_v8 = vadd.f32 %v1081_v5, %v569_v3  ;;  %v571_v10 = vld [vmem:[%s2747_s19 + $0xb70] sm:$0xff] }
 0x16a   : > { %2103 = vst [vmem:[%s2769_s20 + $0xb50] sm:$0xff] %v1591_v0  ;;  %v1594_v9 = vadd.f32 %v1082_v7, %v570_v6  ;;  %v1083_v11 = vld [vmem:[%s2754_s29 + $0xb70] sm:$0xff]  ;;  %v572_v12 = vld [vmem:[%s2747_s19 + $0xb78] sm:$0xff]  ;;  %v573_v15 = vld [vmem:[%s2747_s19 + $0xb80] sm:$0xff] }
 0x16b   : > { %2104 = vst [vmem:[%s2769_s20 + $0xb58] sm:$0xff] %v1592_v4  ;;  %v1595_v13 = vadd.f32 %v1083_v11, %v571_v10  ;;  %v1084_v14 = vld [vmem:[%s2754_s29 + $0xb78] sm:$0xff]  ;;  %v1085_v16 = vld [vmem:[%s2754_s29 + $0xb80] sm:$0xff]  ;;  %2105 = vst [vmem:[%s2769_s20 + $0xb60] sm:$0xff] %v1593_v8 }
 0x16c   : > { %2106 = vst [vmem:[%s2769_s20 + $0xb68] sm:$0xff] %v1594_v9  ;;  %v1596_v17 = vadd.f32 %v1084_v14, %v572_v12  ;;  %v1597_v18 = vadd.f32 %v1085_v16, %v573_v15  ;;  %v574_v19 = vld [vmem:[%s2747_s19 + $0xb88] sm:$0xff]  ;;  %v575_v21 = vld [vmem:[%s2747_s19 + $0xb90] sm:$0xff]  ;;  %v576_v24 = vld [vmem:[%s2747_s19 + $0xb98] sm:$0xff] }
 0x16d   : > { %v1086_v20 = vld [vmem:[%s2754_s29 + $0xb88] sm:$0xff]  ;;  %2107 = vst [vmem:[%s2769_s20 + $0xb70] sm:$0xff] %v1595_v13  ;;  %v1087_v23 = vld [vmem:[%s2754_s29 + $0xb90] sm:$0xff]  ;;  %v1088_v25 = vld [vmem:[%s2754_s29 + $0xb98] sm:$0xff] }
 0x16e   : > { %v1598_v22 = vadd.f32 %v1086_v20, %v574_v19  ;;  %2108 = vst [vmem:[%s2769_s20 + $0xb78] sm:$0xff] %v1596_v17  ;;  %2109 = vst [vmem:[%s2769_s20 + $0xb80] sm:$0xff] %v1597_v18  ;;  %v1599_v26 = vadd.f32 %v1087_v23, %v575_v21  ;;  %v1600_v27 = vadd.f32 %v1088_v25, %v576_v24  ;;  %v577_v28 = vld [vmem:[%s2747_s19 + $0xba0] sm:$0xff]  ;;  %v578_v30 = vld [vmem:[%s2747_s19 + $0xba8] sm:$0xff] }
 0x16f   : > { %v1089_v29 = vld [vmem:[%s2754_s29 + $0xba0] sm:$0xff]  ;;  %v1090_v32 = vld [vmem:[%s2754_s29 + $0xba8] sm:$0xff]  ;;  %v579_v33 = vld [vmem:[%s2747_s19 + $0xbb0] sm:$0xff] }
 0x170   : > { %2110 = vst [vmem:[%s2769_s20 + $0xb88] sm:$0xff] %v1598_v22  ;;  %v1601_v31 = vadd.f32 %v1089_v29, %v577_v28  ;;  %v1091_v34 = vld [vmem:[%s2754_s29 + $0xbb0] sm:$0xff]  ;;  %2111 = vst [vmem:[%s2769_s20 + $0xb90] sm:$0xff] %v1599_v26  ;;  %v1602_v35 = vadd.f32 %v1090_v32, %v578_v30  ;;  %v580_v37 = vld [vmem:[%s2747_s19 + $0xbb8] sm:$0xff] }
 0x171   : > { %2112 = vst [vmem:[%s2769_s20 + $0xb98] sm:$0xff] %v1600_v27  ;;  %v1603_v36 = vadd.f32 %v1091_v34, %v579_v33  ;;  %v1092_v38 = vld [vmem:[%s2754_s29 + $0xbb8] sm:$0xff]  ;;  %v581_v39 = vld [vmem:[%s2747_s19 + $0xbc0] sm:$0xff]  ;;  %v582_v42 = vld [vmem:[%s2747_s19 + $0xbc8] sm:$0xff] }
 0x172   : > { %2113 = vst [vmem:[%s2769_s20 + $0xba0] sm:$0xff] %v1601_v31  ;;  %v1604_v40 = vadd.f32 %v1092_v38, %v580_v37  ;;  %v1093_v41 = vld [vmem:[%s2754_s29 + $0xbc0] sm:$0xff]  ;;  %v1094_v43 = vld [vmem:[%s2754_s29 + $0xbc8] sm:$0xff]  ;;  %2114 = vst [vmem:[%s2769_s20 + $0xba8] sm:$0xff] %v1602_v35 }
 0x173   : > { %2115 = vst [vmem:[%s2769_s20 + $0xbb0] sm:$0xff] %v1603_v36  ;;  %v1605_v44 = vadd.f32 %v1093_v41, %v581_v39  ;;  %v1606_v45 = vadd.f32 %v1094_v43, %v582_v42  ;;  %v583_v46 = vld [vmem:[%s2747_s19 + $0xbd0] sm:$0xff]  ;;  %v584_v48 = vld [vmem:[%s2747_s19 + $0xbd8] sm:$0xff]  ;;  %v585_v51 = vld [vmem:[%s2747_s19 + $0xbe0] sm:$0xff] }
 0x174   : > { %v1095_v47 = vld [vmem:[%s2754_s29 + $0xbd0] sm:$0xff]  ;;  %2116 = vst [vmem:[%s2769_s20 + $0xbb8] sm:$0xff] %v1604_v40  ;;  %v1096_v50 = vld [vmem:[%s2754_s29 + $0xbd8] sm:$0xff]  ;;  %v1097_v52 = vld [vmem:[%s2754_s29 + $0xbe0] sm:$0xff] }
 0x175   : > { %v1607_v49 = vadd.f32 %v1095_v47, %v583_v46  ;;  %2117 = vst [vmem:[%s2769_s20 + $0xbc0] sm:$0xff] %v1605_v44  ;;  %2118 = vst [vmem:[%s2769_s20 + $0xbc8] sm:$0xff] %v1606_v45  ;;  %v1608_v53 = vadd.f32 %v1096_v50, %v584_v48  ;;  %v1609_v54 = vadd.f32 %v1097_v52, %v585_v51  ;;  %v586_v55 = vld [vmem:[%s2747_s19 + $0xbe8] sm:$0xff]  ;;  %v587_v57 = vld [vmem:[%s2747_s19 + $0xbf0] sm:$0xff] }
 0x176   : > { %v1098_v56 = vld [vmem:[%s2754_s29 + $0xbe8] sm:$0xff]  ;;  %v1099_v59 = vld [vmem:[%s2754_s29 + $0xbf0] sm:$0xff]  ;;  %v588_v60 = vld [vmem:[%s2747_s19 + $0xbf8] sm:$0xff] }
 0x177   : > { %2119 = vst [vmem:[%s2769_s20 + $0xbd0] sm:$0xff] %v1607_v49  ;;  %v1610_v58 = vadd.f32 %v1098_v56, %v586_v55  ;;  %v1100_v61 = vld [vmem:[%s2754_s29 + $0xbf8] sm:$0xff]  ;;  %2120 = vst [vmem:[%s2769_s20 + $0xbd8] sm:$0xff] %v1608_v53  ;;  %v1611_v62 = vadd.f32 %v1099_v59, %v587_v57  ;;  %v589_v0 = vld [vmem:[%s2747_s19 + $0xc00] sm:$0xff] }
 0x178   : > { %2121 = vst [vmem:[%s2769_s20 + $0xbe0] sm:$0xff] %v1609_v54  ;;  %v1612_v63 = vadd.f32 %v1100_v61, %v588_v60  ;;  %v1101_v1 = vld [vmem:[%s2754_s29 + $0xc00] sm:$0xff]  ;;  %v590_v2 = vld [vmem:[%s2747_s19 + $0xc08] sm:$0xff]  ;;  %v591_v5 = vld [vmem:[%s2747_s19 + $0xc10] sm:$0xff] }
 0x179   : > { %2122 = vst [vmem:[%s2769_s20 + $0xbe8] sm:$0xff] %v1610_v58  ;;  %v1613_v3 = vadd.f32 %v1101_v1, %v589_v0  ;;  %v1102_v4 = vld [vmem:[%s2754_s29 + $0xc08] sm:$0xff]  ;;  %v1103_v6 = vld [vmem:[%s2754_s29 + $0xc10] sm:$0xff]  ;;  %2123 = vst [vmem:[%s2769_s20 + $0xbf0] sm:$0xff] %v1611_v62 }
 0x17a   : > { %2124 = vst [vmem:[%s2769_s20 + $0xbf8] sm:$0xff] %v1612_v63  ;;  %v1614_v7 = vadd.f32 %v1102_v4, %v590_v2  ;;  %v1615_v8 = vadd.f32 %v1103_v6, %v591_v5  ;;  %v592_v9 = vld [vmem:[%s2747_s19 + $0xc18] sm:$0xff]  ;;  %v593_v11 = vld [vmem:[%s2747_s19 + $0xc20] sm:$0xff]  ;;  %v594_v14 = vld [vmem:[%s2747_s19 + $0xc28] sm:$0xff] }
 0x17b   : > { %v1104_v10 = vld [vmem:[%s2754_s29 + $0xc18] sm:$0xff]  ;;  %2125 = vst [vmem:[%s2769_s20 + $0xc00] sm:$0xff] %v1613_v3  ;;  %v1105_v13 = vld [vmem:[%s2754_s29 + $0xc20] sm:$0xff]  ;;  %v1106_v15 = vld [vmem:[%s2754_s29 + $0xc28] sm:$0xff] }
 0x17c   : > { %v1616_v12 = vadd.f32 %v1104_v10, %v592_v9  ;;  %2126 = vst [vmem:[%s2769_s20 + $0xc08] sm:$0xff] %v1614_v7  ;;  %2127 = vst [vmem:[%s2769_s20 + $0xc10] sm:$0xff] %v1615_v8  ;;  %v1617_v16 = vadd.f32 %v1105_v13, %v593_v11  ;;  %v1618_v17 = vadd.f32 %v1106_v15, %v594_v14  ;;  %v595_v18 = vld [vmem:[%s2747_s19 + $0xc30] sm:$0xff]  ;;  %v596_v20 = vld [vmem:[%s2747_s19 + $0xc38] sm:$0xff] }
 0x17d   : > { %v1107_v19 = vld [vmem:[%s2754_s29 + $0xc30] sm:$0xff]  ;;  %v1108_v22 = vld [vmem:[%s2754_s29 + $0xc38] sm:$0xff]  ;;  %v597_v23 = vld [vmem:[%s2747_s19 + $0xc40] sm:$0xff] }
 0x17e   : > { %2128 = vst [vmem:[%s2769_s20 + $0xc18] sm:$0xff] %v1616_v12  ;;  %v1619_v21 = vadd.f32 %v1107_v19, %v595_v18  ;;  %v1109_v24 = vld [vmem:[%s2754_s29 + $0xc40] sm:$0xff]  ;;  %2129 = vst [vmem:[%s2769_s20 + $0xc20] sm:$0xff] %v1617_v16  ;;  %v1620_v25 = vadd.f32 %v1108_v22, %v596_v20  ;;  %v598_v27 = vld [vmem:[%s2747_s19 + $0xc48] sm:$0xff] }
 0x17f   : > { %2130 = vst [vmem:[%s2769_s20 + $0xc28] sm:$0xff] %v1618_v17  ;;  %v1621_v26 = vadd.f32 %v1109_v24, %v597_v23  ;;  %v1110_v28 = vld [vmem:[%s2754_s29 + $0xc48] sm:$0xff]  ;;  %v599_v29 = vld [vmem:[%s2747_s19 + $0xc50] sm:$0xff]  ;;  %v600_v32 = vld [vmem:[%s2747_s19 + $0xc58] sm:$0xff] }
 0x180   : > { %2131 = vst [vmem:[%s2769_s20 + $0xc30] sm:$0xff] %v1619_v21  ;;  %v1622_v30 = vadd.f32 %v1110_v28, %v598_v27  ;;  %v1111_v31 = vld [vmem:[%s2754_s29 + $0xc50] sm:$0xff]  ;;  %v1112_v33 = vld [vmem:[%s2754_s29 + $0xc58] sm:$0xff]  ;;  %2132 = vst [vmem:[%s2769_s20 + $0xc38] sm:$0xff] %v1620_v25 }
 0x181   : > { %2133 = vst [vmem:[%s2769_s20 + $0xc40] sm:$0xff] %v1621_v26  ;;  %v1623_v34 = vadd.f32 %v1111_v31, %v599_v29  ;;  %v1624_v35 = vadd.f32 %v1112_v33, %v600_v32  ;;  %v601_v36 = vld [vmem:[%s2747_s19 + $0xc60] sm:$0xff]  ;;  %v602_v38 = vld [vmem:[%s2747_s19 + $0xc68] sm:$0xff]  ;;  %v603_v41 = vld [vmem:[%s2747_s19 + $0xc70] sm:$0xff] }
 0x182   : > { %v1113_v37 = vld [vmem:[%s2754_s29 + $0xc60] sm:$0xff]  ;;  %2134 = vst [vmem:[%s2769_s20 + $0xc48] sm:$0xff] %v1622_v30  ;;  %v1114_v40 = vld [vmem:[%s2754_s29 + $0xc68] sm:$0xff]  ;;  %v1115_v42 = vld [vmem:[%s2754_s29 + $0xc70] sm:$0xff] }
 0x183   : > { %v1625_v39 = vadd.f32 %v1113_v37, %v601_v36  ;;  %2135 = vst [vmem:[%s2769_s20 + $0xc50] sm:$0xff] %v1623_v34  ;;  %2136 = vst [vmem:[%s2769_s20 + $0xc58] sm:$0xff] %v1624_v35  ;;  %v1626_v43 = vadd.f32 %v1114_v40, %v602_v38  ;;  %v1627_v44 = vadd.f32 %v1115_v42, %v603_v41  ;;  %v604_v45 = vld [vmem:[%s2747_s19 + $0xc78] sm:$0xff]  ;;  %v605_v47 = vld [vmem:[%s2747_s19 + $0xc80] sm:$0xff] }
 0x184   : > { %v1116_v46 = vld [vmem:[%s2754_s29 + $0xc78] sm:$0xff]  ;;  %v1117_v49 = vld [vmem:[%s2754_s29 + $0xc80] sm:$0xff]  ;;  %v606_v50 = vld [vmem:[%s2747_s19 + $0xc88] sm:$0xff] }
 0x185   : > { %2137 = vst [vmem:[%s2769_s20 + $0xc60] sm:$0xff] %v1625_v39  ;;  %v1628_v48 = vadd.f32 %v1116_v46, %v604_v45  ;;  %v1118_v51 = vld [vmem:[%s2754_s29 + $0xc88] sm:$0xff]  ;;  %2138 = vst [vmem:[%s2769_s20 + $0xc68] sm:$0xff] %v1626_v43  ;;  %v1629_v52 = vadd.f32 %v1117_v49, %v605_v47  ;;  %v607_v54 = vld [vmem:[%s2747_s19 + $0xc90] sm:$0xff] }
 0x186   : > { %2139 = vst [vmem:[%s2769_s20 + $0xc70] sm:$0xff] %v1627_v44  ;;  %v1630_v53 = vadd.f32 %v1118_v51, %v606_v50  ;;  %v1119_v55 = vld [vmem:[%s2754_s29 + $0xc90] sm:$0xff]  ;;  %v608_v56 = vld [vmem:[%s2747_s19 + $0xc98] sm:$0xff]  ;;  %v609_v59 = vld [vmem:[%s2747_s19 + $0xca0] sm:$0xff] }
 0x187   : > { %2140 = vst [vmem:[%s2769_s20 + $0xc78] sm:$0xff] %v1628_v48  ;;  %v1631_v57 = vadd.f32 %v1119_v55, %v607_v54  ;;  %v1120_v58 = vld [vmem:[%s2754_s29 + $0xc98] sm:$0xff]  ;;  %v1121_v60 = vld [vmem:[%s2754_s29 + $0xca0] sm:$0xff]  ;;  %2141 = vst [vmem:[%s2769_s20 + $0xc80] sm:$0xff] %v1629_v52 }
 0x188   : > { %2142 = vst [vmem:[%s2769_s20 + $0xc88] sm:$0xff] %v1630_v53  ;;  %v1632_v61 = vadd.f32 %v1120_v58, %v608_v56  ;;  %v1633_v62 = vadd.f32 %v1121_v60, %v609_v59  ;;  %v610_v63 = vld [vmem:[%s2747_s19 + $0xca8] sm:$0xff]  ;;  %v611_v1 = vld [vmem:[%s2747_s19 + $0xcb0] sm:$0xff]  ;;  %v612_v4 = vld [vmem:[%s2747_s19 + $0xcb8] sm:$0xff] }
 0x189   : > { %v1122_v0 = vld [vmem:[%s2754_s29 + $0xca8] sm:$0xff]  ;;  %2143 = vst [vmem:[%s2769_s20 + $0xc90] sm:$0xff] %v1631_v57  ;;  %v1123_v3 = vld [vmem:[%s2754_s29 + $0xcb0] sm:$0xff]  ;;  %v1124_v5 = vld [vmem:[%s2754_s29 + $0xcb8] sm:$0xff] }
 0x18a   : > { %v1634_v2 = vadd.f32 %v1122_v0, %v610_v63  ;;  %2144 = vst [vmem:[%s2769_s20 + $0xc98] sm:$0xff] %v1632_v61  ;;  %2145 = vst [vmem:[%s2769_s20 + $0xca0] sm:$0xff] %v1633_v62  ;;  %v1635_v6 = vadd.f32 %v1123_v3, %v611_v1  ;;  %v1636_v7 = vadd.f32 %v1124_v5, %v612_v4  ;;  %v613_v8 = vld [vmem:[%s2747_s19 + $0xcc0] sm:$0xff]  ;;  %v614_v10 = vld [vmem:[%s2747_s19 + $0xcc8] sm:$0xff] }
 0x18b   : > { %v1125_v9 = vld [vmem:[%s2754_s29 + $0xcc0] sm:$0xff]  ;;  %v1126_v12 = vld [vmem:[%s2754_s29 + $0xcc8] sm:$0xff]  ;;  %v615_v13 = vld [vmem:[%s2747_s19 + $0xcd0] sm:$0xff] }
 0x18c   : > { %2146 = vst [vmem:[%s2769_s20 + $0xca8] sm:$0xff] %v1634_v2  ;;  %v1637_v11 = vadd.f32 %v1125_v9, %v613_v8  ;;  %v1127_v14 = vld [vmem:[%s2754_s29 + $0xcd0] sm:$0xff]  ;;  %2147 = vst [vmem:[%s2769_s20 + $0xcb0] sm:$0xff] %v1635_v6  ;;  %v1638_v15 = vadd.f32 %v1126_v12, %v614_v10  ;;  %v616_v17 = vld [vmem:[%s2747_s19 + $0xcd8] sm:$0xff] }
 0x18d   : > { %2148 = vst [vmem:[%s2769_s20 + $0xcb8] sm:$0xff] %v1636_v7  ;;  %v1639_v16 = vadd.f32 %v1127_v14, %v615_v13  ;;  %v1128_v18 = vld [vmem:[%s2754_s29 + $0xcd8] sm:$0xff]  ;;  %v617_v19 = vld [vmem:[%s2747_s19 + $0xce0] sm:$0xff]  ;;  %v618_v22 = vld [vmem:[%s2747_s19 + $0xce8] sm:$0xff] }
 0x18e   : > { %2149 = vst [vmem:[%s2769_s20 + $0xcc0] sm:$0xff] %v1637_v11  ;;  %v1640_v20 = vadd.f32 %v1128_v18, %v616_v17  ;;  %v1129_v21 = vld [vmem:[%s2754_s29 + $0xce0] sm:$0xff]  ;;  %v1130_v23 = vld [vmem:[%s2754_s29 + $0xce8] sm:$0xff]  ;;  %2150 = vst [vmem:[%s2769_s20 + $0xcc8] sm:$0xff] %v1638_v15 }
 0x18f   : > { %2151 = vst [vmem:[%s2769_s20 + $0xcd0] sm:$0xff] %v1639_v16  ;;  %v1641_v24 = vadd.f32 %v1129_v21, %v617_v19  ;;  %v1642_v25 = vadd.f32 %v1130_v23, %v618_v22  ;;  %v619_v26 = vld [vmem:[%s2747_s19 + $0xcf0] sm:$0xff]  ;;  %v620_v28 = vld [vmem:[%s2747_s19 + $0xcf8] sm:$0xff]  ;;  %v621_v31 = vld [vmem:[%s2747_s19 + $0xd00] sm:$0xff] }
 0x190   : > { %v1131_v27 = vld [vmem:[%s2754_s29 + $0xcf0] sm:$0xff]  ;;  %2152 = vst [vmem:[%s2769_s20 + $0xcd8] sm:$0xff] %v1640_v20  ;;  %v1132_v30 = vld [vmem:[%s2754_s29 + $0xcf8] sm:$0xff]  ;;  %v1133_v32 = vld [vmem:[%s2754_s29 + $0xd00] sm:$0xff] }
 0x191   : > { %v1643_v29 = vadd.f32 %v1131_v27, %v619_v26  ;;  %2153 = vst [vmem:[%s2769_s20 + $0xce0] sm:$0xff] %v1641_v24  ;;  %2154 = vst [vmem:[%s2769_s20 + $0xce8] sm:$0xff] %v1642_v25  ;;  %v1644_v33 = vadd.f32 %v1132_v30, %v620_v28  ;;  %v1645_v34 = vadd.f32 %v1133_v32, %v621_v31  ;;  %v622_v35 = vld [vmem:[%s2747_s19 + $0xd08] sm:$0xff]  ;;  %v623_v37 = vld [vmem:[%s2747_s19 + $0xd10] sm:$0xff] }
 0x192   : > { %v1134_v36 = vld [vmem:[%s2754_s29 + $0xd08] sm:$0xff]  ;;  %v1135_v39 = vld [vmem:[%s2754_s29 + $0xd10] sm:$0xff]  ;;  %v624_v40 = vld [vmem:[%s2747_s19 + $0xd18] sm:$0xff] }
 0x193   : > { %2155 = vst [vmem:[%s2769_s20 + $0xcf0] sm:$0xff] %v1643_v29  ;;  %v1646_v38 = vadd.f32 %v1134_v36, %v622_v35  ;;  %v1136_v41 = vld [vmem:[%s2754_s29 + $0xd18] sm:$0xff]  ;;  %2156 = vst [vmem:[%s2769_s20 + $0xcf8] sm:$0xff] %v1644_v33  ;;  %v1647_v42 = vadd.f32 %v1135_v39, %v623_v37  ;;  %v625_v44 = vld [vmem:[%s2747_s19 + $0xd20] sm:$0xff] }
 0x194   : > { %2157 = vst [vmem:[%s2769_s20 + $0xd00] sm:$0xff] %v1645_v34  ;;  %v1648_v43 = vadd.f32 %v1136_v41, %v624_v40  ;;  %v1137_v45 = vld [vmem:[%s2754_s29 + $0xd20] sm:$0xff]  ;;  %v626_v46 = vld [vmem:[%s2747_s19 + $0xd28] sm:$0xff]  ;;  %v627_v49 = vld [vmem:[%s2747_s19 + $0xd30] sm:$0xff] }
 0x195   : > { %2158 = vst [vmem:[%s2769_s20 + $0xd08] sm:$0xff] %v1646_v38  ;;  %v1649_v47 = vadd.f32 %v1137_v45, %v625_v44  ;;  %v1138_v48 = vld [vmem:[%s2754_s29 + $0xd28] sm:$0xff]  ;;  %v1139_v50 = vld [vmem:[%s2754_s29 + $0xd30] sm:$0xff]  ;;  %2159 = vst [vmem:[%s2769_s20 + $0xd10] sm:$0xff] %v1647_v42 }
 0x196   : > { %2160 = vst [vmem:[%s2769_s20 + $0xd18] sm:$0xff] %v1648_v43  ;;  %v1650_v51 = vadd.f32 %v1138_v48, %v626_v46  ;;  %v1651_v52 = vadd.f32 %v1139_v50, %v627_v49  ;;  %v628_v53 = vld [vmem:[%s2747_s19 + $0xd38] sm:$0xff]  ;;  %v629_v55 = vld [vmem:[%s2747_s19 + $0xd40] sm:$0xff]  ;;  %v630_v58 = vld [vmem:[%s2747_s19 + $0xd48] sm:$0xff] }
 0x197   : > { %v1140_v54 = vld [vmem:[%s2754_s29 + $0xd38] sm:$0xff]  ;;  %2161 = vst [vmem:[%s2769_s20 + $0xd20] sm:$0xff] %v1649_v47  ;;  %v1141_v57 = vld [vmem:[%s2754_s29 + $0xd40] sm:$0xff]  ;;  %v1142_v59 = vld [vmem:[%s2754_s29 + $0xd48] sm:$0xff] }
 0x198   : > { %v1652_v56 = vadd.f32 %v1140_v54, %v628_v53  ;;  %2162 = vst [vmem:[%s2769_s20 + $0xd28] sm:$0xff] %v1650_v51  ;;  %2163 = vst [vmem:[%s2769_s20 + $0xd30] sm:$0xff] %v1651_v52  ;;  %v1653_v60 = vadd.f32 %v1141_v57, %v629_v55  ;;  %v1654_v61 = vadd.f32 %v1142_v59, %v630_v58  ;;  %v631_v62 = vld [vmem:[%s2747_s19 + $0xd50] sm:$0xff]  ;;  %v632_v0 = vld [vmem:[%s2747_s19 + $0xd58] sm:$0xff] }
 0x199   : > { %v1143_v63 = vld [vmem:[%s2754_s29 + $0xd50] sm:$0xff]  ;;  %v1144_v2 = vld [vmem:[%s2754_s29 + $0xd58] sm:$0xff]  ;;  %v633_v3 = vld [vmem:[%s2747_s19 + $0xd60] sm:$0xff] }
 0x19a   : > { %2164 = vst [vmem:[%s2769_s20 + $0xd38] sm:$0xff] %v1652_v56  ;;  %v1655_v1 = vadd.f32 %v1143_v63, %v631_v62  ;;  %v1145_v4 = vld [vmem:[%s2754_s29 + $0xd60] sm:$0xff]  ;;  %2165 = vst [vmem:[%s2769_s20 + $0xd40] sm:$0xff] %v1653_v60  ;;  %v1656_v5 = vadd.f32 %v1144_v2, %v632_v0  ;;  %v634_v7 = vld [vmem:[%s2747_s19 + $0xd68] sm:$0xff] }
 0x19b   : > { %2166 = vst [vmem:[%s2769_s20 + $0xd48] sm:$0xff] %v1654_v61  ;;  %v1657_v6 = vadd.f32 %v1145_v4, %v633_v3  ;;  %v1146_v8 = vld [vmem:[%s2754_s29 + $0xd68] sm:$0xff]  ;;  %v635_v9 = vld [vmem:[%s2747_s19 + $0xd70] sm:$0xff]  ;;  %v636_v12 = vld [vmem:[%s2747_s19 + $0xd78] sm:$0xff] }
 0x19c   : > { %2167 = vst [vmem:[%s2769_s20 + $0xd50] sm:$0xff] %v1655_v1  ;;  %v1658_v10 = vadd.f32 %v1146_v8, %v634_v7  ;;  %v1147_v11 = vld [vmem:[%s2754_s29 + $0xd70] sm:$0xff]  ;;  %v1148_v13 = vld [vmem:[%s2754_s29 + $0xd78] sm:$0xff]  ;;  %2168 = vst [vmem:[%s2769_s20 + $0xd58] sm:$0xff] %v1656_v5 }
 0x19d   : > { %2169 = vst [vmem:[%s2769_s20 + $0xd60] sm:$0xff] %v1657_v6  ;;  %v1659_v14 = vadd.f32 %v1147_v11, %v635_v9  ;;  %v1660_v15 = vadd.f32 %v1148_v13, %v636_v12  ;;  %v637_v16 = vld [vmem:[%s2747_s19 + $0xd80] sm:$0xff]  ;;  %v638_v18 = vld [vmem:[%s2747_s19 + $0xd88] sm:$0xff]  ;;  %v639_v21 = vld [vmem:[%s2747_s19 + $0xd90] sm:$0xff] }
 0x19e   : > { %v1149_v17 = vld [vmem:[%s2754_s29 + $0xd80] sm:$0xff]  ;;  %2170 = vst [vmem:[%s2769_s20 + $0xd68] sm:$0xff] %v1658_v10  ;;  %v1150_v20 = vld [vmem:[%s2754_s29 + $0xd88] sm:$0xff]  ;;  %v1151_v22 = vld [vmem:[%s2754_s29 + $0xd90] sm:$0xff] }
 0x19f   : > { %v1661_v19 = vadd.f32 %v1149_v17, %v637_v16  ;;  %2171 = vst [vmem:[%s2769_s20 + $0xd70] sm:$0xff] %v1659_v14  ;;  %2172 = vst [vmem:[%s2769_s20 + $0xd78] sm:$0xff] %v1660_v15  ;;  %v1662_v23 = vadd.f32 %v1150_v20, %v638_v18  ;;  %v1663_v24 = vadd.f32 %v1151_v22, %v639_v21  ;;  %v640_v25 = vld [vmem:[%s2747_s19 + $0xd98] sm:$0xff]  ;;  %v641_v27 = vld [vmem:[%s2747_s19 + $0xda0] sm:$0xff] }
 0x1a0   : > { %v1152_v26 = vld [vmem:[%s2754_s29 + $0xd98] sm:$0xff]  ;;  %v1153_v29 = vld [vmem:[%s2754_s29 + $0xda0] sm:$0xff]  ;;  %v642_v30 = vld [vmem:[%s2747_s19 + $0xda8] sm:$0xff] }
 0x1a1   : > { %2173 = vst [vmem:[%s2769_s20 + $0xd80] sm:$0xff] %v1661_v19  ;;  %v1664_v28 = vadd.f32 %v1152_v26, %v640_v25  ;;  %v1154_v31 = vld [vmem:[%s2754_s29 + $0xda8] sm:$0xff]  ;;  %2174 = vst [vmem:[%s2769_s20 + $0xd88] sm:$0xff] %v1662_v23  ;;  %v1665_v32 = vadd.f32 %v1153_v29, %v641_v27  ;;  %v643_v34 = vld [vmem:[%s2747_s19 + $0xdb0] sm:$0xff] }
 0x1a2   : > { %2175 = vst [vmem:[%s2769_s20 + $0xd90] sm:$0xff] %v1663_v24  ;;  %v1666_v33 = vadd.f32 %v1154_v31, %v642_v30  ;;  %v1155_v35 = vld [vmem:[%s2754_s29 + $0xdb0] sm:$0xff]  ;;  %v644_v36 = vld [vmem:[%s2747_s19 + $0xdb8] sm:$0xff]  ;;  %v645_v39 = vld [vmem:[%s2747_s19 + $0xdc0] sm:$0xff] }
 0x1a3   : > { %2176 = vst [vmem:[%s2769_s20 + $0xd98] sm:$0xff] %v1664_v28  ;;  %v1667_v37 = vadd.f32 %v1155_v35, %v643_v34  ;;  %v1156_v38 = vld [vmem:[%s2754_s29 + $0xdb8] sm:$0xff]  ;;  %v1157_v40 = vld [vmem:[%s2754_s29 + $0xdc0] sm:$0xff]  ;;  %2177 = vst [vmem:[%s2769_s20 + $0xda0] sm:$0xff] %v1665_v32 }
 0x1a4   : > { %2178 = vst [vmem:[%s2769_s20 + $0xda8] sm:$0xff] %v1666_v33  ;;  %v1668_v41 = vadd.f32 %v1156_v38, %v644_v36  ;;  %v1669_v42 = vadd.f32 %v1157_v40, %v645_v39  ;;  %v646_v43 = vld [vmem:[%s2747_s19 + $0xdc8] sm:$0xff]  ;;  %v647_v45 = vld [vmem:[%s2747_s19 + $0xdd0] sm:$0xff]  ;;  %v648_v48 = vld [vmem:[%s2747_s19 + $0xdd8] sm:$0xff] }
 0x1a5   : > { %v1158_v44 = vld [vmem:[%s2754_s29 + $0xdc8] sm:$0xff]  ;;  %2179 = vst [vmem:[%s2769_s20 + $0xdb0] sm:$0xff] %v1667_v37  ;;  %v1159_v47 = vld [vmem:[%s2754_s29 + $0xdd0] sm:$0xff]  ;;  %v1160_v49 = vld [vmem:[%s2754_s29 + $0xdd8] sm:$0xff] }
 0x1a6   : > { %v1670_v46 = vadd.f32 %v1158_v44, %v646_v43  ;;  %2180 = vst [vmem:[%s2769_s20 + $0xdb8] sm:$0xff] %v1668_v41  ;;  %2181 = vst [vmem:[%s2769_s20 + $0xdc0] sm:$0xff] %v1669_v42  ;;  %v1671_v50 = vadd.f32 %v1159_v47, %v647_v45  ;;  %v1672_v51 = vadd.f32 %v1160_v49, %v648_v48  ;;  %v649_v52 = vld [vmem:[%s2747_s19 + $0xde0] sm:$0xff]  ;;  %v650_v54 = vld [vmem:[%s2747_s19 + $0xde8] sm:$0xff] }
 0x1a7   : > { %v1161_v53 = vld [vmem:[%s2754_s29 + $0xde0] sm:$0xff]  ;;  %v1162_v56 = vld [vmem:[%s2754_s29 + $0xde8] sm:$0xff]  ;;  %v651_v57 = vld [vmem:[%s2747_s19 + $0xdf0] sm:$0xff] }
 0x1a8   : > { %2182 = vst [vmem:[%s2769_s20 + $0xdc8] sm:$0xff] %v1670_v46  ;;  %v1673_v55 = vadd.f32 %v1161_v53, %v649_v52  ;;  %v1163_v58 = vld [vmem:[%s2754_s29 + $0xdf0] sm:$0xff]  ;;  %2183 = vst [vmem:[%s2769_s20 + $0xdd0] sm:$0xff] %v1671_v50  ;;  %v1674_v59 = vadd.f32 %v1162_v56, %v650_v54  ;;  %v652_v61 = vld [vmem:[%s2747_s19 + $0xdf8] sm:$0xff] }
 0x1a9   : > { %2184 = vst [vmem:[%s2769_s20 + $0xdd8] sm:$0xff] %v1672_v51  ;;  %v1675_v60 = vadd.f32 %v1163_v58, %v651_v57  ;;  %v1164_v62 = vld [vmem:[%s2754_s29 + $0xdf8] sm:$0xff]  ;;  %v653_v63 = vld [vmem:[%s2747_s19 + $0xe00] sm:$0xff]  ;;  %v654_v2 = vld [vmem:[%s2747_s19 + $0xe08] sm:$0xff] }
 0x1aa   : > { %2185 = vst [vmem:[%s2769_s20 + $0xde0] sm:$0xff] %v1673_v55  ;;  %v1676_v0 = vadd.f32 %v1164_v62, %v652_v61  ;;  %v1165_v1 = vld [vmem:[%s2754_s29 + $0xe00] sm:$0xff]  ;;  %v1166_v3 = vld [vmem:[%s2754_s29 + $0xe08] sm:$0xff]  ;;  %2186 = vst [vmem:[%s2769_s20 + $0xde8] sm:$0xff] %v1674_v59 }
 0x1ab   : > { %2187 = vst [vmem:[%s2769_s20 + $0xdf0] sm:$0xff] %v1675_v60  ;;  %v1677_v4 = vadd.f32 %v1165_v1, %v653_v63  ;;  %v1678_v5 = vadd.f32 %v1166_v3, %v654_v2  ;;  %v655_v6 = vld [vmem:[%s2747_s19 + $0xe10] sm:$0xff]  ;;  %v656_v8 = vld [vmem:[%s2747_s19 + $0xe18] sm:$0xff]  ;;  %v657_v11 = vld [vmem:[%s2747_s19 + $0xe20] sm:$0xff] }
 0x1ac   : > { %v1167_v7 = vld [vmem:[%s2754_s29 + $0xe10] sm:$0xff]  ;;  %2188 = vst [vmem:[%s2769_s20 + $0xdf8] sm:$0xff] %v1676_v0  ;;  %v1168_v10 = vld [vmem:[%s2754_s29 + $0xe18] sm:$0xff]  ;;  %v1169_v12 = vld [vmem:[%s2754_s29 + $0xe20] sm:$0xff] }
 0x1ad   : > { %v1679_v9 = vadd.f32 %v1167_v7, %v655_v6  ;;  %2189 = vst [vmem:[%s2769_s20 + $0xe00] sm:$0xff] %v1677_v4  ;;  %2190 = vst [vmem:[%s2769_s20 + $0xe08] sm:$0xff] %v1678_v5  ;;  %v1680_v13 = vadd.f32 %v1168_v10, %v656_v8  ;;  %v1681_v14 = vadd.f32 %v1169_v12, %v657_v11  ;;  %v658_v15 = vld [vmem:[%s2747_s19 + $0xe28] sm:$0xff]  ;;  %v659_v17 = vld [vmem:[%s2747_s19 + $0xe30] sm:$0xff] }
 0x1ae   : > { %v1170_v16 = vld [vmem:[%s2754_s29 + $0xe28] sm:$0xff]  ;;  %v1171_v19 = vld [vmem:[%s2754_s29 + $0xe30] sm:$0xff]  ;;  %v660_v20 = vld [vmem:[%s2747_s19 + $0xe38] sm:$0xff] }
 0x1af   : > { %2191 = vst [vmem:[%s2769_s20 + $0xe10] sm:$0xff] %v1679_v9  ;;  %v1682_v18 = vadd.f32 %v1170_v16, %v658_v15  ;;  %v1172_v21 = vld [vmem:[%s2754_s29 + $0xe38] sm:$0xff]  ;;  %2192 = vst [vmem:[%s2769_s20 + $0xe18] sm:$0xff] %v1680_v13  ;;  %v1683_v22 = vadd.f32 %v1171_v19, %v659_v17  ;;  %v661_v24 = vld [vmem:[%s2747_s19 + $0xe40] sm:$0xff] }
 0x1b0   : > { %2193 = vst [vmem:[%s2769_s20 + $0xe20] sm:$0xff] %v1681_v14  ;;  %v1684_v23 = vadd.f32 %v1172_v21, %v660_v20  ;;  %v1173_v25 = vld [vmem:[%s2754_s29 + $0xe40] sm:$0xff]  ;;  %v662_v26 = vld [vmem:[%s2747_s19 + $0xe48] sm:$0xff]  ;;  %v663_v29 = vld [vmem:[%s2747_s19 + $0xe50] sm:$0xff] }
 0x1b1   : > { %2194 = vst [vmem:[%s2769_s20 + $0xe28] sm:$0xff] %v1682_v18  ;;  %v1685_v27 = vadd.f32 %v1173_v25, %v661_v24  ;;  %v1174_v28 = vld [vmem:[%s2754_s29 + $0xe48] sm:$0xff]  ;;  %v1175_v30 = vld [vmem:[%s2754_s29 + $0xe50] sm:$0xff]  ;;  %2195 = vst [vmem:[%s2769_s20 + $0xe30] sm:$0xff] %v1683_v22 }
 0x1b2   : > { %2196 = vst [vmem:[%s2769_s20 + $0xe38] sm:$0xff] %v1684_v23  ;;  %v1686_v31 = vadd.f32 %v1174_v28, %v662_v26  ;;  %v1687_v32 = vadd.f32 %v1175_v30, %v663_v29  ;;  %v664_v33 = vld [vmem:[%s2747_s19 + $0xe58] sm:$0xff]  ;;  %v665_v35 = vld [vmem:[%s2747_s19 + $0xe60] sm:$0xff]  ;;  %v666_v38 = vld [vmem:[%s2747_s19 + $0xe68] sm:$0xff] }
 0x1b3   : > { %v1176_v34 = vld [vmem:[%s2754_s29 + $0xe58] sm:$0xff]  ;;  %2197 = vst [vmem:[%s2769_s20 + $0xe40] sm:$0xff] %v1685_v27  ;;  %v1177_v37 = vld [vmem:[%s2754_s29 + $0xe60] sm:$0xff]  ;;  %v1178_v39 = vld [vmem:[%s2754_s29 + $0xe68] sm:$0xff] }
 0x1b4   : > { %v1688_v36 = vadd.f32 %v1176_v34, %v664_v33  ;;  %2198 = vst [vmem:[%s2769_s20 + $0xe48] sm:$0xff] %v1686_v31  ;;  %2199 = vst [vmem:[%s2769_s20 + $0xe50] sm:$0xff] %v1687_v32  ;;  %v1689_v40 = vadd.f32 %v1177_v37, %v665_v35  ;;  %v1690_v41 = vadd.f32 %v1178_v39, %v666_v38  ;;  %v667_v42 = vld [vmem:[%s2747_s19 + $0xe70] sm:$0xff]  ;;  %v668_v44 = vld [vmem:[%s2747_s19 + $0xe78] sm:$0xff] }
 0x1b5   : > { %v1179_v43 = vld [vmem:[%s2754_s29 + $0xe70] sm:$0xff]  ;;  %v1180_v46 = vld [vmem:[%s2754_s29 + $0xe78] sm:$0xff]  ;;  %v669_v47 = vld [vmem:[%s2747_s19 + $0xe80] sm:$0xff] }
 0x1b6   : > { %2200 = vst [vmem:[%s2769_s20 + $0xe58] sm:$0xff] %v1688_v36  ;;  %v1691_v45 = vadd.f32 %v1179_v43, %v667_v42  ;;  %v1181_v48 = vld [vmem:[%s2754_s29 + $0xe80] sm:$0xff]  ;;  %2201 = vst [vmem:[%s2769_s20 + $0xe60] sm:$0xff] %v1689_v40  ;;  %v1692_v49 = vadd.f32 %v1180_v46, %v668_v44  ;;  %v670_v51 = vld [vmem:[%s2747_s19 + $0xe88] sm:$0xff] }
 0x1b7   : > { %2202 = vst [vmem:[%s2769_s20 + $0xe68] sm:$0xff] %v1690_v41  ;;  %v1693_v50 = vadd.f32 %v1181_v48, %v669_v47  ;;  %v1182_v52 = vld [vmem:[%s2754_s29 + $0xe88] sm:$0xff]  ;;  %v671_v53 = vld [vmem:[%s2747_s19 + $0xe90] sm:$0xff]  ;;  %v672_v56 = vld [vmem:[%s2747_s19 + $0xe98] sm:$0xff] }
 0x1b8   : > { %2203 = vst [vmem:[%s2769_s20 + $0xe70] sm:$0xff] %v1691_v45  ;;  %v1694_v54 = vadd.f32 %v1182_v52, %v670_v51  ;;  %v1183_v55 = vld [vmem:[%s2754_s29 + $0xe90] sm:$0xff]  ;;  %v1184_v57 = vld [vmem:[%s2754_s29 + $0xe98] sm:$0xff]  ;;  %2204 = vst [vmem:[%s2769_s20 + $0xe78] sm:$0xff] %v1692_v49 }
 0x1b9   : > { %2205 = vst [vmem:[%s2769_s20 + $0xe80] sm:$0xff] %v1693_v50  ;;  %v1695_v58 = vadd.f32 %v1183_v55, %v671_v53  ;;  %v1696_v59 = vadd.f32 %v1184_v57, %v672_v56  ;;  %v673_v60 = vld [vmem:[%s2747_s19 + $0xea0] sm:$0xff]  ;;  %v674_v62 = vld [vmem:[%s2747_s19 + $0xea8] sm:$0xff]  ;;  %v675_v1 = vld [vmem:[%s2747_s19 + $0xeb0] sm:$0xff] }
 0x1ba   : > { %v1185_v61 = vld [vmem:[%s2754_s29 + $0xea0] sm:$0xff]  ;;  %2206 = vst [vmem:[%s2769_s20 + $0xe88] sm:$0xff] %v1694_v54  ;;  %v1186_v0 = vld [vmem:[%s2754_s29 + $0xea8] sm:$0xff]  ;;  %v1187_v2 = vld [vmem:[%s2754_s29 + $0xeb0] sm:$0xff] }
 0x1bb   : > { %v1697_v63 = vadd.f32 %v1185_v61, %v673_v60  ;;  %2207 = vst [vmem:[%s2769_s20 + $0xe90] sm:$0xff] %v1695_v58  ;;  %2208 = vst [vmem:[%s2769_s20 + $0xe98] sm:$0xff] %v1696_v59  ;;  %v1698_v3 = vadd.f32 %v1186_v0, %v674_v62  ;;  %v1699_v4 = vadd.f32 %v1187_v2, %v675_v1  ;;  %v676_v5 = vld [vmem:[%s2747_s19 + $0xeb8] sm:$0xff]  ;;  %v677_v7 = vld [vmem:[%s2747_s19 + $0xec0] sm:$0xff] }
 0x1bc   : > { %v1188_v6 = vld [vmem:[%s2754_s29 + $0xeb8] sm:$0xff]  ;;  %v1189_v9 = vld [vmem:[%s2754_s29 + $0xec0] sm:$0xff]  ;;  %v678_v10 = vld [vmem:[%s2747_s19 + $0xec8] sm:$0xff] }
 0x1bd   : > { %2209 = vst [vmem:[%s2769_s20 + $0xea0] sm:$0xff] %v1697_v63  ;;  %v1700_v8 = vadd.f32 %v1188_v6, %v676_v5  ;;  %v1190_v11 = vld [vmem:[%s2754_s29 + $0xec8] sm:$0xff]  ;;  %2210 = vst [vmem:[%s2769_s20 + $0xea8] sm:$0xff] %v1698_v3  ;;  %v1701_v12 = vadd.f32 %v1189_v9, %v677_v7  ;;  %v679_v14 = vld [vmem:[%s2747_s19 + $0xed0] sm:$0xff] }
 0x1be   : > { %2211 = vst [vmem:[%s2769_s20 + $0xeb0] sm:$0xff] %v1699_v4  ;;  %v1702_v13 = vadd.f32 %v1190_v11, %v678_v10  ;;  %v1191_v15 = vld [vmem:[%s2754_s29 + $0xed0] sm:$0xff]  ;;  %v680_v16 = vld [vmem:[%s2747_s19 + $0xed8] sm:$0xff]  ;;  %v681_v19 = vld [vmem:[%s2747_s19 + $0xee0] sm:$0xff] }
 0x1bf   : > { %2212 = vst [vmem:[%s2769_s20 + $0xeb8] sm:$0xff] %v1700_v8  ;;  %v1703_v17 = vadd.f32 %v1191_v15, %v679_v14  ;;  %v1192_v18 = vld [vmem:[%s2754_s29 + $0xed8] sm:$0xff]  ;;  %v1193_v20 = vld [vmem:[%s2754_s29 + $0xee0] sm:$0xff]  ;;  %2213 = vst [vmem:[%s2769_s20 + $0xec0] sm:$0xff] %v1701_v12 }
 0x1c0   : > { %2214 = vst [vmem:[%s2769_s20 + $0xec8] sm:$0xff] %v1702_v13  ;;  %v1704_v21 = vadd.f32 %v1192_v18, %v680_v16  ;;  %v1705_v22 = vadd.f32 %v1193_v20, %v681_v19  ;;  %v682_v23 = vld [vmem:[%s2747_s19 + $0xee8] sm:$0xff]  ;;  %v683_v25 = vld [vmem:[%s2747_s19 + $0xef0] sm:$0xff]  ;;  %v684_v28 = vld [vmem:[%s2747_s19 + $0xef8] sm:$0xff] }
 0x1c1   : > { %v1194_v24 = vld [vmem:[%s2754_s29 + $0xee8] sm:$0xff]  ;;  %2215 = vst [vmem:[%s2769_s20 + $0xed0] sm:$0xff] %v1703_v17  ;;  %v1195_v27 = vld [vmem:[%s2754_s29 + $0xef0] sm:$0xff]  ;;  %v1196_v29 = vld [vmem:[%s2754_s29 + $0xef8] sm:$0xff] }
 0x1c2   : > { %v1706_v26 = vadd.f32 %v1194_v24, %v682_v23  ;;  %2216 = vst [vmem:[%s2769_s20 + $0xed8] sm:$0xff] %v1704_v21  ;;  %2217 = vst [vmem:[%s2769_s20 + $0xee0] sm:$0xff] %v1705_v22  ;;  %v1707_v30 = vadd.f32 %v1195_v27, %v683_v25  ;;  %v1708_v31 = vadd.f32 %v1196_v29, %v684_v28  ;;  %v685_v32 = vld [vmem:[%s2747_s19 + $0xf00] sm:$0xff]  ;;  %v686_v34 = vld [vmem:[%s2747_s19 + $0xf08] sm:$0xff] }
 0x1c3   : > { %v1197_v33 = vld [vmem:[%s2754_s29 + $0xf00] sm:$0xff]  ;;  %v1198_v36 = vld [vmem:[%s2754_s29 + $0xf08] sm:$0xff]  ;;  %v687_v37 = vld [vmem:[%s2747_s19 + $0xf10] sm:$0xff] }
 0x1c4   : > { %2218 = vst [vmem:[%s2769_s20 + $0xee8] sm:$0xff] %v1706_v26  ;;  %v1709_v35 = vadd.f32 %v1197_v33, %v685_v32  ;;  %v1199_v38 = vld [vmem:[%s2754_s29 + $0xf10] sm:$0xff]  ;;  %2219 = vst [vmem:[%s2769_s20 + $0xef0] sm:$0xff] %v1707_v30  ;;  %v1710_v39 = vadd.f32 %v1198_v36, %v686_v34  ;;  %v688_v41 = vld [vmem:[%s2747_s19 + $0xf18] sm:$0xff] }
 0x1c5   : > { %2220 = vst [vmem:[%s2769_s20 + $0xef8] sm:$0xff] %v1708_v31  ;;  %v1711_v40 = vadd.f32 %v1199_v38, %v687_v37  ;;  %v1200_v42 = vld [vmem:[%s2754_s29 + $0xf18] sm:$0xff]  ;;  %v689_v43 = vld [vmem:[%s2747_s19 + $0xf20] sm:$0xff]  ;;  %v690_v46 = vld [vmem:[%s2747_s19 + $0xf28] sm:$0xff] }
 0x1c6   : > { %2221 = vst [vmem:[%s2769_s20 + $0xf00] sm:$0xff] %v1709_v35  ;;  %v1712_v44 = vadd.f32 %v1200_v42, %v688_v41  ;;  %v1201_v45 = vld [vmem:[%s2754_s29 + $0xf20] sm:$0xff]  ;;  %v1202_v47 = vld [vmem:[%s2754_s29 + $0xf28] sm:$0xff]  ;;  %2222 = vst [vmem:[%s2769_s20 + $0xf08] sm:$0xff] %v1710_v39 }
 0x1c7   : > { %2223 = vst [vmem:[%s2769_s20 + $0xf10] sm:$0xff] %v1711_v40  ;;  %v1713_v48 = vadd.f32 %v1201_v45, %v689_v43  ;;  %v1714_v49 = vadd.f32 %v1202_v47, %v690_v46  ;;  %v691_v50 = vld [vmem:[%s2747_s19 + $0xf30] sm:$0xff]  ;;  %v692_v52 = vld [vmem:[%s2747_s19 + $0xf38] sm:$0xff]  ;;  %v693_v55 = vld [vmem:[%s2747_s19 + $0xf40] sm:$0xff] }
 0x1c8   : > { %v1203_v51 = vld [vmem:[%s2754_s29 + $0xf30] sm:$0xff]  ;;  %2224 = vst [vmem:[%s2769_s20 + $0xf18] sm:$0xff] %v1712_v44  ;;  %v1204_v54 = vld [vmem:[%s2754_s29 + $0xf38] sm:$0xff]  ;;  %v1205_v56 = vld [vmem:[%s2754_s29 + $0xf40] sm:$0xff] }
 0x1c9   : > { %v1715_v53 = vadd.f32 %v1203_v51, %v691_v50  ;;  %2225 = vst [vmem:[%s2769_s20 + $0xf20] sm:$0xff] %v1713_v48  ;;  %2226 = vst [vmem:[%s2769_s20 + $0xf28] sm:$0xff] %v1714_v49  ;;  %v1716_v57 = vadd.f32 %v1204_v54, %v692_v52  ;;  %v1717_v58 = vadd.f32 %v1205_v56, %v693_v55  ;;  %v694_v59 = vld [vmem:[%s2747_s19 + $0xf48] sm:$0xff]  ;;  %v695_v61 = vld [vmem:[%s2747_s19 + $0xf50] sm:$0xff] }
 0x1ca   : > { %v1206_v60 = vld [vmem:[%s2754_s29 + $0xf48] sm:$0xff]  ;;  %v1207_v63 = vld [vmem:[%s2754_s29 + $0xf50] sm:$0xff]  ;;  %v696_v0 = vld [vmem:[%s2747_s19 + $0xf58] sm:$0xff] }
 0x1cb   : > { %2227 = vst [vmem:[%s2769_s20 + $0xf30] sm:$0xff] %v1715_v53  ;;  %v1718_v62 = vadd.f32 %v1206_v60, %v694_v59  ;;  %v1208_v1 = vld [vmem:[%s2754_s29 + $0xf58] sm:$0xff]  ;;  %2228 = vst [vmem:[%s2769_s20 + $0xf38] sm:$0xff] %v1716_v57  ;;  %v1719_v2 = vadd.f32 %v1207_v63, %v695_v61  ;;  %v697_v4 = vld [vmem:[%s2747_s19 + $0xf60] sm:$0xff] }
 0x1cc   : > { %2229 = vst [vmem:[%s2769_s20 + $0xf40] sm:$0xff] %v1717_v58  ;;  %v1720_v3 = vadd.f32 %v1208_v1, %v696_v0  ;;  %v1209_v5 = vld [vmem:[%s2754_s29 + $0xf60] sm:$0xff]  ;;  %v698_v6 = vld [vmem:[%s2747_s19 + $0xf68] sm:$0xff]  ;;  %v699_v9 = vld [vmem:[%s2747_s19 + $0xf70] sm:$0xff] }
 0x1cd   : > { %2230 = vst [vmem:[%s2769_s20 + $0xf48] sm:$0xff] %v1718_v62  ;;  %v1721_v7 = vadd.f32 %v1209_v5, %v697_v4  ;;  %v1210_v8 = vld [vmem:[%s2754_s29 + $0xf68] sm:$0xff]  ;;  %v1211_v10 = vld [vmem:[%s2754_s29 + $0xf70] sm:$0xff]  ;;  %2231 = vst [vmem:[%s2769_s20 + $0xf50] sm:$0xff] %v1719_v2 }
 0x1ce   : > { %2232 = vst [vmem:[%s2769_s20 + $0xf58] sm:$0xff] %v1720_v3  ;;  %v1722_v11 = vadd.f32 %v1210_v8, %v698_v6  ;;  %v1723_v12 = vadd.f32 %v1211_v10, %v699_v9  ;;  %v700_v13 = vld [vmem:[%s2747_s19 + $0xf78] sm:$0xff]  ;;  %v701_v15 = vld [vmem:[%s2747_s19 + $0xf80] sm:$0xff]  ;;  %v702_v18 = vld [vmem:[%s2747_s19 + $0xf88] sm:$0xff] }
 0x1cf   : > { %v1212_v14 = vld [vmem:[%s2754_s29 + $0xf78] sm:$0xff]  ;;  %2233 = vst [vmem:[%s2769_s20 + $0xf60] sm:$0xff] %v1721_v7  ;;  %v1213_v17 = vld [vmem:[%s2754_s29 + $0xf80] sm:$0xff]  ;;  %v1214_v19 = vld [vmem:[%s2754_s29 + $0xf88] sm:$0xff] }
 0x1d0   : > { %v1724_v16 = vadd.f32 %v1212_v14, %v700_v13  ;;  %2234 = vst [vmem:[%s2769_s20 + $0xf68] sm:$0xff] %v1722_v11  ;;  %2235 = vst [vmem:[%s2769_s20 + $0xf70] sm:$0xff] %v1723_v12  ;;  %v1725_v20 = vadd.f32 %v1213_v17, %v701_v15  ;;  %v1726_v21 = vadd.f32 %v1214_v19, %v702_v18  ;;  %v703_v22 = vld [vmem:[%s2747_s19 + $0xf90] sm:$0xff]  ;;  %v704_v24 = vld [vmem:[%s2747_s19 + $0xf98] sm:$0xff] }
 0x1d1   : > { %v1215_v23 = vld [vmem:[%s2754_s29 + $0xf90] sm:$0xff]  ;;  %v1216_v26 = vld [vmem:[%s2754_s29 + $0xf98] sm:$0xff]  ;;  %v705_v27 = vld [vmem:[%s2747_s19 + $0xfa0] sm:$0xff] }
 0x1d2   : > { %2236 = vst [vmem:[%s2769_s20 + $0xf78] sm:$0xff] %v1724_v16  ;;  %v1727_v25 = vadd.f32 %v1215_v23, %v703_v22  ;;  %v1217_v28 = vld [vmem:[%s2754_s29 + $0xfa0] sm:$0xff]  ;;  %2237 = vst [vmem:[%s2769_s20 + $0xf80] sm:$0xff] %v1725_v20  ;;  %v1728_v29 = vadd.f32 %v1216_v26, %v704_v24  ;;  %v706_v31 = vld [vmem:[%s2747_s19 + $0xfa8] sm:$0xff] }
 0x1d3   : > { %2238 = vst [vmem:[%s2769_s20 + $0xf88] sm:$0xff] %v1726_v21  ;;  %v1729_v30 = vadd.f32 %v1217_v28, %v705_v27  ;;  %v1218_v32 = vld [vmem:[%s2754_s29 + $0xfa8] sm:$0xff]  ;;  %v707_v33 = vld [vmem:[%s2747_s19 + $0xfb0] sm:$0xff]  ;;  %v708_v36 = vld [vmem:[%s2747_s19 + $0xfb8] sm:$0xff] }
 0x1d4   : > { %2239 = vst [vmem:[%s2769_s20 + $0xf90] sm:$0xff] %v1727_v25  ;;  %v1730_v34 = vadd.f32 %v1218_v32, %v706_v31  ;;  %v1219_v35 = vld [vmem:[%s2754_s29 + $0xfb0] sm:$0xff]  ;;  %v1220_v37 = vld [vmem:[%s2754_s29 + $0xfb8] sm:$0xff]  ;;  %2240 = vst [vmem:[%s2769_s20 + $0xf98] sm:$0xff] %v1728_v29 }
 0x1d5   : > { %2241 = vst [vmem:[%s2769_s20 + $0xfa0] sm:$0xff] %v1729_v30  ;;  %v1731_v38 = vadd.f32 %v1219_v35, %v707_v33  ;;  %v1732_v39 = vadd.f32 %v1220_v37, %v708_v36  ;;  %v709_v40 = vld [vmem:[%s2747_s19 + $0xfc0] sm:$0xff]  ;;  %v710_v42 = vld [vmem:[%s2747_s19 + $0xfc8] sm:$0xff]  ;;  %v711_v45 = vld [vmem:[%s2747_s19 + $0xfd0] sm:$0xff] }
 0x1d6   : > { %v1221_v41 = vld [vmem:[%s2754_s29 + $0xfc0] sm:$0xff]  ;;  %2242 = vst [vmem:[%s2769_s20 + $0xfa8] sm:$0xff] %v1730_v34  ;;  %v1222_v44 = vld [vmem:[%s2754_s29 + $0xfc8] sm:$0xff]  ;;  %v1223_v46 = vld [vmem:[%s2754_s29 + $0xfd0] sm:$0xff] }
 0x1d7   : > { %v1733_v43 = vadd.f32 %v1221_v41, %v709_v40  ;;  %2243 = vst [vmem:[%s2769_s20 + $0xfb0] sm:$0xff] %v1731_v38  ;;  %2244 = vst [vmem:[%s2769_s20 + $0xfb8] sm:$0xff] %v1732_v39  ;;  %v1734_v47 = vadd.f32 %v1222_v44, %v710_v42  ;;  %v1735_v48 = vadd.f32 %v1223_v46, %v711_v45  ;;  %v712_v49 = vld [vmem:[%s2747_s19 + $0xfd8] sm:$0xff]  ;;  %v713_v51 = vld [vmem:[%s2747_s19 + $0xfe0] sm:$0xff] }
 0x1d8   : > { %v1224_v50 = vld [vmem:[%s2754_s29 + $0xfd8] sm:$0xff]  ;;  %v1225_v53 = vld [vmem:[%s2754_s29 + $0xfe0] sm:$0xff]  ;;  %v714_v54 = vld [vmem:[%s2747_s19 + $0xfe8] sm:$0xff] }
 0x1d9   : > { %2245 = vst [vmem:[%s2769_s20 + $0xfc0] sm:$0xff] %v1733_v43  ;;  %v1736_v52 = vadd.f32 %v1224_v50, %v712_v49  ;;  %v1226_v55 = vld [vmem:[%s2754_s29 + $0xfe8] sm:$0xff]  ;;  %2246 = vst [vmem:[%s2769_s20 + $0xfc8] sm:$0xff] %v1734_v47  ;;  %v1737_v56 = vadd.f32 %v1225_v53, %v713_v51  ;;  %v715_v58 = vld [vmem:[%s2747_s19 + $0xff0] sm:$0xff] }
 0x1da   : > { %2247 = vst [vmem:[%s2769_s20 + $0xfd0] sm:$0xff] %v1735_v48  ;;  %v1738_v57 = vadd.f32 %v1226_v55, %v714_v54  ;;  %v1227_v59 = vld [vmem:[%s2754_s29 + $0xff0] sm:$0xff]  ;;  %v716_v60 = vld [vmem:[%s2747_s19 + $0xff8] sm:$0xff] }
 0x1db   : > { %2248 = vst [vmem:[%s2769_s20 + $0xfd8] sm:$0xff] %v1736_v52  ;;  %v1739_v61 = vadd.f32 %v1227_v59, %v715_v58  ;;  %v1228_v62 = vld [vmem:[%s2754_s29 + $0xff8] sm:$0xff]  ;;  %2249 = vst [vmem:[%s2769_s20 + $0xfe0] sm:$0xff] %v1737_v56 }
 0x1dc   : > { %2250 = vst [vmem:[%s2769_s20 + $0xfe8] sm:$0xff] %v1738_v57  ;;  %v1740_v63 = vadd.f32 %v1228_v62, %v716_v60 }
 0x1dd   : > { %2251 = vst [vmem:[%s2769_s20 + $0xff0] sm:$0xff] %v1739_v61 }
 0x1de   : > { %2252 = vst [vmem:[%s2769_s20 + $0xff8] sm:$0xff] %v1740_v63 }
 0x1df   : > { %2508 = shalt.err (!%p2505_p4)
}
 0x1e0   : > { %s2509_s25 = scalar_lea.hbm %s4299_s17, 65536  ;;  %s2513_s30 = scalar_lea.hbm %s4350_s2, 131072 }
 0x1e1   : > { %p2510_p9 = scmp.ne.s32.totalorder %s4299_s17, %s2509_s25  ;;  %p2514_p5 = scmp.lt.s32.totalorder %s4299_s17, %s4350_s2 }
 0x1e2   : > { %p2515_p8 = scmp.lt.s32.totalorder %s2513_s30, %s2509_s25 }
 0x1e3   : > { %p2511_p11 = pnand %p2510_p9, %p4360_p1 }
 0x1e4   : > { %p2516_p6 = por %p2515_p8, %p2514_p5 }
 0x1e5   : > { %p2512_p3 = pneg %p2511_p11 }
 0x1e7   : > { %p2517_p13 = pnand %p2516_p6, %p2512_p3 }
 0x1e9   : > { %2520 = shalt.err (!%p2517_p13)
}
 0x1ea   : > { %s2570_s3 = smov 128   ;;  %s2571_s29 = smov 8  }
 0x1eb   : > { %2388 = dma.vmem_to_hbm [thread:$0]  (%p4360_p1), %s4301_s6, 65536, %s4299_s17, %s2254_s28, %s2570_s3, %s2570_s3, %s2571_s29  }
 0x1ec PF: > { %s2282_s20 = sand.u32 1, %s2551_s9   ;;  %p4361_p12 = scmp.ne.s32.totalorder %s4356_s22, 0 }
 0x1ed   : > { %p4362_p7 = scmp.ge.s32.totalorder %s2563_s12, 2  ;;  %s2283_s5 = scalar_lea.sflag [#allocation4], %s2282_s20 }
 0x1ef   : > { %p2398_p10 = pnand %p4362_p7, %p4361_p12 }
 0x1f1   : > { %p2399_p0 = pneg %p2398_p10 }
 0x1f3   : > { %2546 = dma.done.wait (%p2399_p0), %s2283_s5, 65536  }
 0x1f4   : > { %2548 = vsyncadd (%p2399_p0), %s2283_s5, 4294901760  ;;  %p18_p2 = scmp.ge.s32.totalorder %s2612_s15, 4   ;;  %s4363_s9 = smov %s2555_s10 }
 0x1f5   : > { %s4364_s10 = smov %s2559_s11  ;;  %s4365_s11 = smov %s2624_s18 }
 0x1f6   : > { %s4366_s12 = smov %s2612_s15  ;;  %20 = sbr.rel (!%p18_p2) target bundleno = 7 (0x7), region = 86 }
 0x1fb   :  { %2288 = vsyncpa [#allocation3], 1 }
 0x1fc   :  { %2290 = vsyncpa [#allocation3 + $0x1], 1 }
 0x1fd   :  { %2291 = vsyncpa [#allocation6], 1 }
 0x1fe   :  { %2293 = vsyncpa [#allocation6 + $0x1], 1 }
 0x1ff   :  { %2294 = vsyncpa [#allocation4], 1 }
 0x200   :  { %2296 = vsyncpa [#allocation4 + $0x1], 1 }

</bundles_post_ra>
